<compile_context>
chip_gen: v5e
topology: v5e:2x2
jax: 0.10.0
libtpu: 0.0.40
codegen_flags: <defaults>
</compile_context>

<pallas_src>
import jax
import jax.numpy as jnp
from jax.experimental import pallas as pl
from jax.experimental.pallas import tpu as pltpu

HIDDEN = 500          # pyraug default MLP hidden width
LANE = 128
SUBLANE = 8
BATCH_TILE = 128      # medium-batch tile (v5e-friendly)
BATCH_TILE_BIG = 256  # large-batch tile (fills v6e/v7x 256-wide MXU)


def _round_up(n, m):
    return (n + m - 1) // m * m


# ---------------------------------------------------------------------------
# Fused Pallas kernel: encode -> reparameterize -> decode
# ---------------------------------------------------------------------------
def _vae_fused_kernel(x_ref, eps_ref,
                      ew1_ref, eb1_ref, ewh_ref, ebh_ref,
                      dw1_ref, db1_ref, dw2_ref, db2_ref,
                      recon_ref, lat_ref):
    lpad = eps_ref.shape[-1]
    cdt = ew1_ref.dtype                       # bf16 compute dtype

    # ---- encoder: h = ReLU(x @ W1 + b1) ------------------------------------
    # x arrives f32 (no wrapper-side copy); cast on the VPU (free under MXU
    # slack), accumulate in f32 on the MXU, then drop h back to bf16 so the
    # (tm, hpad) f32 intermediate never stays live in VMEM.
    h = jnp.dot(x_ref[...].astype(cdt), ew1_ref[...],
                preferred_element_type=jnp.float32)
    h = jnp.maximum(h + eb1_ref[...], 0.0).astype(cdt)

    # ---- merged mu | log_var heads: one lane-dense matmul, static slices ---
    heads = jnp.dot(h, ewh_ref[...],
                    preferred_element_type=jnp.float32) + ebh_ref[...]
    mu = heads[:, :lpad]
    log_var = heads[:, lpad:]

    # ---- reparameterization trick (f32) ------------------------------------
    z = mu + jnp.exp(0.5 * log_var) * eps_ref[...]

    # Single lane-dense latent slab: [ mu | log_var | z ], all 128-aligned.
    lat_ref[:, :2 * lpad] = heads
    lat_ref[:, 2 * lpad:] = z

    # ---- decoder: recon = sigmoid(ReLU(z @ Wd1 + bd1) @ Wd2 + bd2) ----------
    h2 = jnp.dot(z.astype(cdt), dw1_ref[...],
                 preferred_element_type=jnp.float32)
    h2 = jnp.maximum(h2 + db1_ref[...], 0.0).astype(cdt)
    o = jnp.dot(h2, dw2_ref[...],
                preferred_element_type=jnp.float32) + db2_ref[...]
    # sigmoid + bf16 cast fused into the output store (halves recon HBM bytes)
    recon_ref[...] = jax.nn.sigmoid(o).astype(recon_ref.dtype)


# ---------------------------------------------------------------------------
# Wrapper
# ---------------------------------------------------------------------------
def base_vae_forward(x_nchw, eps, packed):
    """VAE forward: flatten -> (fused Pallas) encode/reparam/decode."""
    b = x_nchw.shape[0]
    input_dim = 1
    for d in x_nchw.shape[1:]:
        input_dim *= d
    latent_dim = eps.shape[-1]

    dpad, hpad = packed["enc_w1"].shape          # padded input_dim / hidden
    lpad = packed["dec_w1"].shape[0]             # padded latent_dim

    if b >= BATCH_TILE_BIG:
        tm = BATCH_TILE_BIG                      # fill 256-wide MXU (v6e/v7x)
    elif b >= BATCH_TILE:
        tm = BATCH_TILE
    else:
        tm = _round_up(b, SUBLANE)               # tiny batches: 8-row tile
    bpad = _round_up(b, tm)

    # Feed f32 x directly (cast happens in-kernel); pad only when the batch
    # tile / lane alignment requires it.
    x_flat = x_nchw.reshape(b, input_dim)
    if bpad != b or dpad != input_dim:
        x_flat = jnp.pad(x_flat, ((0, bpad - b), (0, dpad - input_dim)))
    eps_f = eps.astype(jnp.float32)
    if bpad != b or lpad != latent_dim:
        eps_f = jnp.pad(eps_f, ((0, bpad - b), (0, lpad - latent_dim)))

    grid = (bpad // tm,)

    def row_spec(cols):   # batch-tiled activations / outputs
        return pl.BlockSpec((tm, cols), lambda i: (i, 0))

    def full_spec(r, c):  # weights/biases resident across all grid steps
        return pl.BlockSpec((r, c), lambda i: (0, 0))

    out_shape = (
        jax.ShapeDtypeStruct((bpad, dpad), jnp.bfloat16),      # recon (bf16)
        jax.ShapeDtypeStruct((bpad, 3 * lpad), jnp.float32),   # mu|log_var|z
    )

    flops = 2 * bpad * (dpad * hpad + hpad * 2 * lpad + lpad * hpad + hpad * dpad)
    transcendentals = bpad * (lpad + dpad)
    bytes_accessed = int(
        bpad * dpad * 4                      # x (f32 read)
        + bpad * lpad * 4                    # eps
        + sum(int(v.size) * v.dtype.itemsize for v in packed.values())
        + bpad * dpad * 2                    # recon (bf16 write)
        + bpad * 3 * lpad * 4)               # latent slab

    recon_p, lat_p = pl.pallas_call(
        _vae_fused_kernel,
        out_shape=out_shape,
        grid=grid,
        in_specs=[
            row_spec(dpad),             # x (f32)
            row_spec(lpad),             # eps
            full_spec(dpad, hpad),      # enc_w1
            full_spec(1, hpad),         # enc_b1
            full_spec(hpad, 2 * lpad),  # enc_w_heads (mu | log_var)
            full_spec(1, 2 * lpad),     # enc_b_heads
            full_spec(lpad, hpad),      # dec_w1
            full_spec(1, hpad),         # dec_b1
            full_spec(hpad, dpad),      # dec_w2
            full_spec(1, dpad),         # dec_b2
        ],
        out_specs=(row_spec(dpad), row_spec(3 * lpad)),
        compiler_params=pltpu.CompilerParams(
            dimension_semantics=("parallel",)),
        cost_estimate=pl.CostEstimate(
            flops=flops, transcendentals=transcendentals,
            bytes_accessed=bytes_accessed),
    )(x_flat, eps_f,
      packed["enc_w1"], packed["enc_b1"],
      packed["enc_w_heads"], packed["enc_b_heads"],
      packed["dec_w1"], packed["dec_b1"],
      packed["dec_w2"], packed["dec_b2"])

    return {
        "recon_x": recon_p[:b, :input_dim],                         # bf16
        "mu": lat_p[:b, :latent_dim],                               # f32
        "log_var": lat_p[:b, lpad:lpad + latent_dim],               # f32
        "z": lat_p[:b, 2 * lpad:2 * lpad + latent_dim],             # f32
    }


# ---------------------------------------------------------------------------
# Parameters (dense f32 reference set + padded/bf16 packed set for the kernel)
# ---------------------------------------------------------------------------
def init_dense_params(key, input_dim, latent_dim, hidden=HIDDEN):
    ks = jax.random.split(key, 10)
    scale = lambda fan_in: 1.0 / jnp.sqrt(jnp.float32(fan_in))
    return {
        "enc_w1": jax.random.normal(ks[0], (input_dim, hidden), jnp.float32) * scale(input_dim),
        "enc_b1": 0.01 * jax.random.normal(ks[1], (hidden,), jnp.float32),
        "enc_wmu": jax.random.normal(ks[2], (hidden, latent_dim), jnp.float32) * scale(hidden),
        "enc_bmu": 0.01 * jax.random.normal(ks[3], (latent_dim,), jnp.float32),
        "enc_wlv": jax.random.normal(ks[4], (hidden, latent_dim), jnp.float32) * scale(hidden),
        "enc_blv": 0.01 * jax.random.normal(ks[5], (latent_dim,), jnp.float32),
        "dec_w1": jax.random.normal(ks[6], (latent_dim, hidden), jnp.float32) * scale(latent_dim),
        "dec_b1": 0.01 * jax.random.normal(ks[7], (hidden,), jnp.float32),
        "dec_w2": jax.random.normal(ks[8], (hidden, input_dim), jnp.float32) * scale(hidden),
        "dec_b2": 0.01 * jax.random.normal(ks[9], (input_dim,), jnp.float32),
    }


def pack_params(dense, input_dim, latent_dim, hidden=HIDDEN,
                compute_dtype=jnp.bfloat16):
    """Pad to (8,128)-aligned shapes, merge the mu/log_var heads, cast GEMM
    weights to bf16 (biases stay f32). Zero padding keeps math exact for the
    real rows/columns."""
    dpad = _round_up(input_dim, LANE)
    hpad = _round_up(hidden, LANE)      # 500 -> 512
    lpad = _round_up(latent_dim, LANE)  # 10  -> 128

    def pad2(a, rows, cols):
        return jnp.pad(a, ((0, rows - a.shape[0]), (0, cols - a.shape[1])))

    w_heads = jnp.zeros((hpad, 2 * lpad), jnp.float32)
    w_heads = w_heads.at[:hidden, :latent_dim].set(dense["enc_wmu"])
    w_heads = w_heads.at[:hidden, lpad:lpad + latent_dim].set(dense["enc_wlv"])
    b_heads = jnp.zeros((1, 2 * lpad), jnp.float32)
    b_heads = b_heads.at[0, :latent_dim].set(dense["enc_bmu"])
    b_heads = b_heads.at[0, lpad:lpad + latent_dim].set(dense["enc_blv"])

    return {
        "enc_w1": pad2(dense["enc_w1"], dpad, hpad).astype(compute_dtype),
        "enc_b1": jnp.pad(dense["enc_b1"], (0, hpad - hidden)).reshape(1, hpad),
        "enc_w_heads": w_heads.astype(compute_dtype),
        "enc_b_heads": b_heads,
        "dec_w1": pad2(dense["dec_w1"], lpad, hpad).astype(compute_dtype),
        "dec_b1": jnp.pad(dense["dec_b1"], (0, hpad - hidden)).reshape(1, hpad),
        "dec_w2": pad2(dense["dec_w2"], hpad, dpad).astype(compute_dtype),
        "dec_b2": jnp.pad(dense["dec_b2"], (0, dpad - input_dim)).reshape(1, dpad),
    }


# ---------------------------------------------------------------------------
if __name__ == "__main__":
    key = jax.random.PRNGKey(0)
    k_x, k_eps, k_p = jax.random.split(key, 3)

    batch, C, H, W = 2, 4, 16, 16          # NCHW input, as PyTorch would feed
    input_dim = C * H * W                  # 1024 (flattened, pyraug convention)
    latent_dim = 10                        # pyraug default latent dim

    x = jax.random.normal(k_x, (batch, C, H, W), jnp.float32)
    eps = jax.random.normal(k_eps, (batch, latent_dim), jnp.float32)

    dense = init_dense_params(k_p, input_dim, latent_dim)
    packed = pack_params(dense, input_dim, latent_dim)

    fwd = jax.jit(base_vae_forward)
    out = fwd(x, eps, packed)
    jax.block_until_ready(out)

    # f32 reference in plain JAX (unpadded weights).
    x_flat = x.reshape(batch, -1)
    h = jnp.maximum(x_flat @ dense["enc_w1"] + dense["enc_b1"], 0.0)
    mu_ref = h @ dense["enc_wmu"] + dense["enc_bmu"]
    lv_ref = h @ dense["enc_wlv"] + dense["enc_blv"]
    z_ref = mu_ref + jnp.exp(0.5 * lv_ref) * eps
    h2 = jnp.maximum(z_ref @ dense["dec_w1"] + dense["dec_b1"], 0.0)
    recon_ref = jax.nn.sigmoid(h2 @ dense["dec_w2"] + dense["dec_b2"])

    # Kernel runs bf16 GEMM operands with f32 accumulation and emits bf16
    # recon -> tolerances loosened vs. a pure-f32 run (values are O(1)).
    recon_out = out["recon_x"].astype(jnp.float32)
    assert jnp.allclose(out["mu"], mu_ref, atol=3e-2, rtol=3e-2), "mu mismatch"
    assert jnp.allclose(out["log_var"], lv_ref, atol=3e-2, rtol=3e-2), "log_var mismatch"
    assert jnp.allclose(recon_out, recon_ref, atol=3e-2, rtol=3e-2), "recon mismatch"
    assert jnp.allclose(out["z"], z_ref, atol=1e-1, rtol=1e-1), "z mismatch"
    assert out["recon_x"].shape == (batch, input_dim)
    assert out["mu"].shape == (batch, latent_dim)
    assert out["recon_x"].dtype == jnp.bfloat16

    print("KERNEL_OK")
</pallas_src>

<mosaic_0001>
module attributes {stable_mosaic.version = 11 : i64} {
  func.func @_vae_fused_kernel(%arg0: i32, %arg1: memref<8x1024xf32, #tpu.memory_space<vmem>>, %arg2: memref<8x128xf32, #tpu.memory_space<vmem>>, %arg3: memref<1024x512xbf16, #tpu.memory_space<vmem>>, %arg4: memref<1x512xf32, #tpu.memory_space<vmem>>, %arg5: memref<512x256xbf16, #tpu.memory_space<vmem>>, %arg6: memref<1x256xf32, #tpu.memory_space<vmem>>, %arg7: memref<128x512xbf16, #tpu.memory_space<vmem>>, %arg8: memref<1x512xf32, #tpu.memory_space<vmem>>, %arg9: memref<512x1024xbf16, #tpu.memory_space<vmem>>, %arg10: memref<1x1024xf32, #tpu.memory_space<vmem>>, %arg11: memref<8x1024xbf16, #tpu.memory_space<vmem>>, %arg12: memref<8x384xf32, #tpu.memory_space<vmem>>) attributes {dimension_semantics = [#tpu.dimension_semantics<parallel>], iteration_bounds = array<i64: 1>, scalar_prefetch = 0 : i64, scratch_operands = 0 : i64, tpu.core_type = #tpu.core_type<tc>, window_params = [{transform_indices = @transform_0, window_bounds = array<i64: 8, 1024>}, {transform_indices = @transform_1, window_bounds = array<i64: 8, 128>}, {pipeline_mode = #tpu.pipeline_mode<synchronous>, transform_indices = @transform_2, window_bounds = array<i64: 1024, 512>}, {pipeline_mode = #tpu.pipeline_mode<synchronous>, transform_indices = @transform_3, window_bounds = array<i64: 1, 512>}, {pipeline_mode = #tpu.pipeline_mode<synchronous>, transform_indices = @transform_4, window_bounds = array<i64: 512, 256>}, {pipeline_mode = #tpu.pipeline_mode<synchronous>, transform_indices = @transform_5, window_bounds = array<i64: 1, 256>}, {pipeline_mode = #tpu.pipeline_mode<synchronous>, transform_indices = @transform_6, window_bounds = array<i64: 128, 512>}, {pipeline_mode = #tpu.pipeline_mode<synchronous>, transform_indices = @transform_7, window_bounds = array<i64: 1, 512>}, {pipeline_mode = #tpu.pipeline_mode<synchronous>, transform_indices = @transform_8, window_bounds = array<i64: 512, 1024>}, {pipeline_mode = #tpu.pipeline_mode<synchronous>, transform_indices = @transform_9, window_bounds = array<i64: 1, 1024>}, {transform_indices = @transform_10, window_bounds = array<i64: 8, 1024>}, {transform_indices = @transform_11, window_bounds = array<i64: 8, 384>}]} {
    %c0 = arith.constant 0 : index
    %c0_0 = arith.constant 0 : index
    %0 = vector.load %arg1[%c0, %c0_0] : memref<8x1024xf32, #tpu.memory_space<vmem>>, vector<8x1024xf32>
    %1 = arith.truncf %0 : vector<8x1024xf32> to vector<8x1024xbf16>
    %c0_1 = arith.constant 0 : index
    %c0_2 = arith.constant 0 : index
    %2 = vector.load %arg3[%c0_1, %c0_2] : memref<1024x512xbf16, #tpu.memory_space<vmem>>, vector<1024x512xbf16>
    %cst = arith.constant dense<0.000000e+00> : vector<8x512xf32>
    %3 = tpu.matmul %1, %2, %cst {dimension_numbers = #tpu.dot_dimension_numbers<[1], [0], [0], [1], [0, 0, 1, 1], [], []>} : vector<8x1024xbf16>, vector<1024x512xbf16>, vector<8x512xf32> -> vector<8x512xf32>
    %c0_3 = arith.constant 0 : index
    %c0_4 = arith.constant 0 : index
    %4 = vector.load %arg4[%c0_3, %c0_4] : memref<1x512xf32, #tpu.memory_space<vmem>>, vector<1x512xf32>
    %5 = vector.broadcast %4 : vector<1x512xf32> to vector<8x512xf32>
    %6 = arith.addf %3, %5 : vector<8x512xf32>
    %cst_5 = arith.constant 0.000000e+00 : f32
    %7 = vector.broadcast %cst_5 : f32 to vector<8x512xf32>
    %8 = arith.maximumf %6, %7 : vector<8x512xf32>
    %9 = arith.truncf %8 : vector<8x512xf32> to vector<8x512xbf16>
    %c0_6 = arith.constant 0 : index
    %c0_7 = arith.constant 0 : index
    %10 = vector.load %arg5[%c0_6, %c0_7] : memref<512x256xbf16, #tpu.memory_space<vmem>>, vector<512x256xbf16>
    %cst_8 = arith.constant dense<0.000000e+00> : vector<8x256xf32>
    %11 = tpu.matmul %9, %10, %cst_8 {dimension_numbers = #tpu.dot_dimension_numbers<[1], [0], [0], [1], [0, 0, 1, 1], [], []>} : vector<8x512xbf16>, vector<512x256xbf16>, vector<8x256xf32> -> vector<8x256xf32>
    %c0_9 = arith.constant 0 : index
    %c0_10 = arith.constant 0 : index
    %12 = vector.load %arg6[%c0_9, %c0_10] : memref<1x256xf32, #tpu.memory_space<vmem>>, vector<1x256xf32>
    %13 = vector.broadcast %12 : vector<1x256xf32> to vector<8x256xf32>
    %14 = arith.addf %11, %13 : vector<8x256xf32>
    %15 = vector.extract_strided_slice %14 {offsets = [0, 0], sizes = [8, 128], strides = [1, 1]} : vector<8x256xf32> to vector<8x128xf32>
    %16 = vector.extract_strided_slice %14 {offsets = [0, 128], sizes = [8, 128], strides = [1, 1]} : vector<8x256xf32> to vector<8x128xf32>
    %cst_11 = arith.constant 5.000000e-01 : f32
    %17 = vector.broadcast %cst_11 : f32 to vector<8x128xf32>
    %18 = arith.mulf %17, %16 : vector<8x128xf32>
    %19 = math.exp %18 : vector<8x128xf32>
    %c0_12 = arith.constant 0 : index
    %c0_13 = arith.constant 0 : index
    %20 = vector.load %arg2[%c0_12, %c0_13] : memref<8x128xf32, #tpu.memory_space<vmem>>, vector<8x128xf32>
    %21 = arith.mulf %19, %20 : vector<8x128xf32>
    %22 = arith.addf %15, %21 : vector<8x128xf32>
    %c0_14 = arith.constant 0 : index
    %c0_15 = arith.constant 0 : index
    %23 = vector.load %arg12[%c0_14, %c0_15] : memref<8x384xf32, #tpu.memory_space<vmem>>, vector<8x256xf32>
    tpu.vector_store %arg12[%c0_14, %c0_15], %14 {strides = array<i32>} : memref<8x384xf32, #tpu.memory_space<vmem>>, vector<8x256xf32>,
    %c0_16 = arith.constant 0 : index
    %c256 = arith.constant 256 : index
    %24 = vector.load %arg12[%c0_16, %c256] : memref<8x384xf32, #tpu.memory_space<vmem>>, vector<8x128xf32>
    tpu.vector_store %arg12[%c0_16, %c256], %22 {strides = array<i32>} : memref<8x384xf32, #tpu.memory_space<vmem>>, vector<8x128xf32>,
    %25 = arith.truncf %22 : vector<8x128xf32> to vector<8x128xbf16>
    %c0_17 = arith.constant 0 : index
    %c0_18 = arith.constant 0 : index
    %26 = vector.load %arg7[%c0_17, %c0_18] : memref<128x512xbf16, #tpu.memory_space<vmem>>, vector<128x512xbf16>
    %cst_19 = arith.constant dense<0.000000e+00> : vector<8x512xf32>
    %27 = tpu.matmul %25, %26, %cst_19 {dimension_numbers = #tpu.dot_dimension_numbers<[1], [0], [0], [1], [0, 0, 1, 1], [], []>} : vector<8x128xbf16>, vector<128x512xbf16>, vector<8x512xf32> -> vector<8x512xf32>
    %c0_20 = arith.constant 0 : index
    %c0_21 = arith.constant 0 : index
    %28 = vector.load %arg8[%c0_20, %c0_21] : memref<1x512xf32, #tpu.memory_space<vmem>>, vector<1x512xf32>
    %29 = vector.broadcast %28 : vector<1x512xf32> to vector<8x512xf32>
    %30 = arith.addf %27, %29 : vector<8x512xf32>
    %cst_22 = arith.constant 0.000000e+00 : f32
    %31 = vector.broadcast %cst_22 : f32 to vector<8x512xf32>
    %32 = arith.maximumf %30, %31 : vector<8x512xf32>
    %33 = arith.truncf %32 : vector<8x512xf32> to vector<8x512xbf16>
    %c0_23 = arith.constant 0 : index
    %c0_24 = arith.constant 0 : index
    %34 = vector.load %arg9[%c0_23, %c0_24] : memref<512x1024xbf16, #tpu.memory_space<vmem>>, vector<512x1024xbf16>
    %cst_25 = arith.constant dense<0.000000e+00> : vector<8x1024xf32>
    %35 = tpu.matmul %33, %34, %cst_25 {dimension_numbers = #tpu.dot_dimension_numbers<[1], [0], [0], [1], [0, 0, 1, 1], [], []>} : vector<8x512xbf16>, vector<512x1024xbf16>, vector<8x1024xf32> -> vector<8x1024xf32>
    %c0_26 = arith.constant 0 : index
    %c0_27 = arith.constant 0 : index
    %36 = vector.load %arg10[%c0_26, %c0_27] : memref<1x1024xf32, #tpu.memory_space<vmem>>, vector<1x1024xf32>
    %37 = vector.broadcast %36 : vector<1x1024xf32> to vector<8x1024xf32>
    %38 = arith.addf %35, %37 : vector<8x1024xf32>
    %39 = arith.negf %38 : vector<8x1024xf32>
    %40 = math.exp %39 : vector<8x1024xf32>
    %cst_28 = arith.constant 1.000000e+00 : f32
    %41 = vector.broadcast %cst_28 : f32 to vector<8x1024xf32>
    %42 = arith.addf %41, %40 : vector<8x1024xf32>
    %43 = arith.divf %41, %42 : vector<8x1024xf32>
    %44 = arith.truncf %43 : vector<8x1024xf32> to vector<8x1024xbf16>
    %c0_29 = arith.constant 0 : index
    %c0_30 = arith.constant 0 : index
    %45 = vector.load %arg11[%c0_29, %c0_30] : memref<8x1024xbf16, #tpu.memory_space<vmem>>, vector<8x1024xbf16>
    tpu.vector_store %arg11[%c0_29, %c0_30], %44 {strides = array<i32>} : memref<8x1024xbf16, #tpu.memory_space<vmem>>, vector<8x1024xbf16>,
    return
  }
  func.func @transform_0(%arg0: i32) -> (i32, i32) {
    %c0_i32 = arith.constant 0 : i32
    %c0_i32_0 = arith.constant 0 : i32
    return %arg0, %c0_i32 : i32, i32
  }
  func.func @transform_1(%arg0: i32) -> (i32, i32) {
    %c0_i32 = arith.constant 0 : i32
    %c0_i32_0 = arith.constant 0 : i32
    return %arg0, %c0_i32 : i32, i32
  }
  func.func @transform_2(%arg0: i32) -> (i32, i32) {
    %c0_i32 = arith.constant 0 : i32
    %c0_i32_0 = arith.constant 0 : i32
    %c0_i32_1 = arith.constant 0 : i32
    return %c0_i32, %c0_i32_0 : i32, i32
  }
  func.func @transform_3(%arg0: i32) -> (i32, i32) {
    %c0_i32 = arith.constant 0 : i32
    %c0_i32_0 = arith.constant 0 : i32
    %c0_i32_1 = arith.constant 0 : i32
    return %c0_i32, %c0_i32_0 : i32, i32
  }
  func.func @transform_4(%arg0: i32) -> (i32, i32) {
    %c0_i32 = arith.constant 0 : i32
    %c0_i32_0 = arith.constant 0 : i32
    %c0_i32_1 = arith.constant 0 : i32
    return %c0_i32, %c0_i32_0 : i32, i32
  }
  func.func @transform_5(%arg0: i32) -> (i32, i32) {
    %c0_i32 = arith.constant 0 : i32
    %c0_i32_0 = arith.constant 0 : i32
    %c0_i32_1 = arith.constant 0 : i32
    return %c0_i32, %c0_i32_0 : i32, i32
  }
  func.func @transform_6(%arg0: i32) -> (i32, i32) {
    %c0_i32 = arith.constant 0 : i32
    %c0_i32_0 = arith.constant 0 : i32
    %c0_i32_1 = arith.constant 0 : i32
    return %c0_i32, %c0_i32_0 : i32, i32
  }
  func.func @transform_7(%arg0: i32) -> (i32, i32) {
    %c0_i32 = arith.constant 0 : i32
    %c0_i32_0 = arith.constant 0 : i32
    %c0_i32_1 = arith.constant 0 : i32
    return %c0_i32, %c0_i32_0 : i32, i32
  }
  func.func @transform_8(%arg0: i32) -> (i32, i32) {
    %c0_i32 = arith.constant 0 : i32
    %c0_i32_0 = arith.constant 0 : i32
    %c0_i32_1 = arith.constant 0 : i32
    return %c0_i32, %c0_i32_0 : i32, i32
  }
  func.func @transform_9(%arg0: i32) -> (i32, i32) {
    %c0_i32 = arith.constant 0 : i32
    %c0_i32_0 = arith.constant 0 : i32
    %c0_i32_1 = arith.constant 0 : i32
    return %c0_i32, %c0_i32_0 : i32, i32
  }
  func.func @transform_10(%arg0: i32) -> (i32, i32) {
    %c0_i32 = arith.constant 0 : i32
    %c0_i32_0 = arith.constant 0 : i32
    return %arg0, %c0_i32 : i32, i32
  }
  func.func @transform_11(%arg0: i32) -> (i32, i32) {
    %c0_i32 = arith.constant 0 : i32
    %c0_i32_0 = arith.constant 0 : i32
    return %arg0, %c0_i32 : i32, i32
  }
}

</mosaic_0001>

<bundles_post_ra>
// kernel: base_vae_forward.1
= control target key start
LH: loop header
LB: loop body
LE: loop exit
PB: predicated region body
PF: predicated region fallthrough
CT: control target
= control target key end

     0   :  { %17 = vsyncpa [#allocation3], 0  ;;  %s8519_s0 = inlined_call_operand.vmem [shape: f32[8,1024], index: 0, kind: input, shape index: {}]   ;;  %s8520_s1 = inlined_call_operand.vmem [shape: f32[8,128], index: 1, kind: input, shape index: {}]   ;;  %s8521_s2 = inlined_call_operand.hbm [shape: bf16[1024,512], index: 2, kind: input, shape index: {}]   ;;  %s8522_s3 = inlined_call_operand.vmem [shape: f32[1,512], index: 3, kind: input, shape index: {}]   ;;  %s8523_s4 = inlined_call_operand.hbm [shape: bf16[512,256], index: 4, kind: input, shape index: {}]   ;;  %s8524_s5 = inlined_call_operand.vmem [shape: f32[1,256], index: 5, kind: input, shape index: {}]   ;;  %s8525_s6 = inlined_call_operand.hbm [shape: bf16[128,512], index: 6, kind: input, shape index: {}]   ;;  %s8526_s7 = inlined_call_operand.vmem [shape: f32[1,512], index: 7, kind: input, shape index: {}]   ;;  %s8527_s8 = inlined_call_operand.hbm [shape: bf16[512,1024], index: 8, kind: input, shape index: {}]   ;;  %s8528_s9 = inlined_call_operand.vmem [shape: f32[1,1024], index: 9, kind: input, shape index: {}]   ;;  %s8529_s10 = inlined_call_operand.vmem [shape: bf16[8,1024], index: 10, kind: output, shape index: {0}]   ;;  %s8530_s11 = inlined_call_operand.vmem [shape: f32[8,384], index: 11, kind: output, shape index: {1}]  }
   0x1   :  { %18 = vsyncpa [#allocation5], 0  ;;  %s43_s19 = sshll.u32 %s8523_s4, 4  ;;  %s44_s19 = int_to_ptr.hbm [resolvable:$true] %s43_s19 }
   0x2   :  { %19 = vsyncpa [#allocation8], 0  ;;  %s8188_s20 = smov [#allocation4]   ;;  %s28_s24 = sshll.u32 %s8521_s2, 4  ;;  %s29_s24 = int_to_ptr.hbm [resolvable:$true] %s28_s24 }
   0x3   :  { %s45_s21 = sshll.u32 %s8188_s20, 4  ;;  %s8189_s25 = smov 128   ;;  %s46_s21 = int_to_ptr.vmem [resolvable:$true] %s45_s21 }
   0x4   :  { %s8190_s26 = smov 8   ;;  %s8191_s27 = smov [#allocation2]  }
   0x5   :  { %51 = dma.hbm_to_vmem [thread:$0]  %s44_s19, 8192, %s46_s21, [#allocation5], %s8189_s25, %s8189_s25, %s8190_s26  }
   0x6   :  { %s30_s28 = sshll.u32 %s8191_s27, 4  ;;  %s8192_s29 = smov 256   ;;  %s31_s28 = int_to_ptr.vmem [resolvable:$true] %s30_s28 }
   0x7   :  { %s8193_s30 = smov 16   ;;  %s58_s13 = sshll.u32 %s8525_s6, 4  ;;  %s59_s13 = int_to_ptr.hbm [resolvable:$true] %s58_s13 }
   0x8   :  { %36 = dma.hbm_to_vmem [thread:$0]  %s29_s24, 32768, %s31_s28, [#allocation3], %s8192_s29, %s8192_s29, %s8193_s30  }
   0x9   :  { %s8194_s14 = smov [#allocation6]   ;;  %s73_s17 = sshll.u32 %s8527_s8, 4  ;;  %s74_s17 = int_to_ptr.hbm [resolvable:$true] %s73_s17 }
   0xa   :  { %s60_s15 = sshll.u32 %s8194_s14, 4  ;;  %s8195_s18 = smov [#allocation7]   ;;  %s61_s15 = int_to_ptr.vmem [resolvable:$true] %s60_s15 }
   0xb   :  { %66 = dma.hbm_to_vmem [thread:$0]  %s59_s13, 4096, %s61_s15, [#allocation5], %s8192_s29, %s8192_s29, %s8193_s30  }
   0xc   :  { %s75_s19 = sshll.u32 %s8195_s18, 4  ;;  %s8196_s20 = smov 512   ;;  %s76_s19 = int_to_ptr.vmem [resolvable:$true] %s75_s19 }
   0xd   :  { %s8197_s21 = smov 32  }
   0xe   :  { %81 = dma.hbm_to_vmem [thread:$0]  %s74_s17, 32768, %s76_s19, [#allocation8], %s8196_s20, %s8196_s20, %s8197_s21  }
   0xf   :  { %8182 = dma.done.wait [#allocation3], 32768  }
  0x10   :  { %8183 = vsyncadd [#allocation3], 4294934528 }
  0x11   :  { %8184 = dma.done.wait [#allocation5], 12288  }
  0x12   :  { %8185 = vsyncadd [#allocation5], 4294955008 }
  0x13   :  { %8186 = dma.done.wait [#allocation8], 32768  }
  0x14   :  { %8187 = vsyncadd [#allocation8], 4294934528  ;;  %v5107_v0 = vld [vmem:[#allocation2 + $0xe0] sm:$0xf]  ;;  %v7463_v1 = vld [vmem:[#allocation2 + $0xec] sm:$0xf0] }
  0x15   :  { %v5235_v2 = vld [vmem:[#allocation2 + $0x1e0] sm:$0xf]  ;;  %v5108_v3 = vor.u32 %v7463_v1, %v5107_v0  ;;  %v7495_v4 = vld [vmem:[#allocation2 + $0x1ec] sm:$0xf0] }
  0x16   :  { %v5363_v5 = vld [vmem:[#allocation2 + $0x2e0] sm:$0xf]  ;;  %v7527_v6 = vld [vmem:[#allocation2 + $0x2ec] sm:$0xf0]  ;;  %v5236_v7 = vor.u32 %v7495_v4, %v5235_v2 }
  0x17   :  { %v5364_v8 = vor.u32 %v7527_v6, %v5363_v5  ;;  %v5491_v9 = vld [vmem:[#allocation2 + $0x3e0] sm:$0xf]  ;;  %v7559_v10 = vld [vmem:[#allocation2 + $0x3ec] sm:$0xf0]  ;;  %1662 = vmatpush.bf16.msra.mxu0 %v5108_v3 }
  0x18   :  { %v5091_v11 = vld [vmem:[#allocation2 + $0xc0] sm:$0xf]  ;;  %v5492_v12 = vor.u32 %v7559_v10, %v5491_v9  ;;  %v7459_v13 = vld [vmem:[#allocation2 + $0xcc] sm:$0xf0]  ;;  %1675 = vmatpush.bf16.msra.mxu1 %v5236_v7 }
  0x19   :  { %v5219_v14 = vld [vmem:[#allocation2 + $0x1c0] sm:$0xf]  ;;  %v7491_v15 = vld [vmem:[#allocation2 + $0x1cc] sm:$0xf0]  ;;  %1688 = vmatpush.bf16.msra.mxu2 %v5364_v8  ;;  %v5092_v16 = vor.u32 %v7459_v13, %v5091_v11 }
  0x1a   :  { %v5220_v17 = vor.u32 %v7491_v15, %v5219_v14  ;;  %v5347_v18 = vld [vmem:[#allocation2 + $0x2c0] sm:$0xf]  ;;  %v7523_v19 = vld [vmem:[#allocation2 + $0x2cc] sm:$0xf0]  ;;  %1701 = vmatpush.bf16.msra.mxu3 %v5492_v12 }
  0x1b   :  { %v5475_v20 = vld [vmem:[#allocation2 + $0x3c0] sm:$0xf]  ;;  %v5348_v21 = vor.u32 %v7523_v19, %v5347_v18  ;;  %v7555_v22 = vld [vmem:[#allocation2 + $0x3cc] sm:$0xf0]  ;;  %1663 = vmatpush.bf16.msra.mxu0 %v5092_v16 }
  0x1c   :  { %v5075_v23 = vld [vmem:[#allocation2 + $0xa0] sm:$0xf]  ;;  %v7455_v24 = vld [vmem:[#allocation2 + $0xac] sm:$0xf0]  ;;  %v5476_v25 = vor.u32 %v7555_v22, %v5475_v20  ;;  %1676 = vmatpush.bf16.msra.mxu1 %v5220_v17 }
  0x1d   :  { %v5203_v26 = vld [vmem:[#allocation2 + $0x1a0] sm:$0xf]  ;;  %v7487_v27 = vld [vmem:[#allocation2 + $0x1ac] sm:$0xf0]  ;;  %v5076_v29 = vor.u32 %v7455_v24, %v5075_v23  ;;  %1689 = vmatpush.bf16.msra.mxu2 %v5348_v21 }
  0x1e   :  { %v5331_v28 = vld [vmem:[#allocation2 + $0x2a0] sm:$0xf]  ;;  %v7519_v30 = vld [vmem:[#allocation2 + $0x2ac] sm:$0xf0]  ;;  %v5204_v33 = vor.u32 %v7487_v27, %v5203_v26  ;;  %1702 = vmatpush.bf16.msra.mxu3 %v5476_v25 }
  0x1f   :  { %v5459_v31 = vld [vmem:[#allocation2 + $0x3a0] sm:$0xf]  ;;  %v7551_v32 = vld [vmem:[#allocation2 + $0x3ac] sm:$0xf0]  ;;  %v5332_v34 = vor.u32 %v7519_v30, %v5331_v28  ;;  %1664 = vmatpush.bf16.msra.mxu0 %v5076_v29 }
  0x20   :  { %v5059_v35 = vld [vmem:[#allocation2 + $0x80] sm:$0xf]  ;;  %v7451_v36 = vld [vmem:[#allocation2 + $0x8c] sm:$0xf0]  ;;  %v5460_v38 = vor.u32 %v7551_v32, %v5459_v31  ;;  %1677 = vmatpush.bf16.msra.mxu1 %v5204_v33 }
  0x21   :  { %v5187_v37 = vld [vmem:[#allocation2 + $0x180] sm:$0xf]  ;;  %v7483_v39 = vld [vmem:[#allocation2 + $0x18c] sm:$0xf0]  ;;  %v5060_v44 = vor.u32 %v7451_v36, %v5059_v35  ;;  %1690 = vmatpush.bf16.msra.mxu2 %v5332_v34 }
  0x22   :  { %v5315_v40 = vld [vmem:[#allocation2 + $0x280] sm:$0xf]  ;;  %v7515_v41 = vld [vmem:[#allocation2 + $0x28c] sm:$0xf0]  ;;  %v5188_v45 = vor.u32 %v7483_v39, %v5187_v37  ;;  %1703 = vmatpush.bf16.msra.mxu3 %v5460_v38 }
  0x23   :  { %v5443_v42 = vld [vmem:[#allocation2 + $0x380] sm:$0xf]  ;;  %v7547_v43 = vld [vmem:[#allocation2 + $0x38c] sm:$0xf0]  ;;  %v5316_v46 = vor.u32 %v7515_v41, %v5315_v40  ;;  %1665 = vmatpush.bf16.msra.mxu0 %v5060_v44 }
  0x24   :  { %v5043_v47 = vld [vmem:[#allocation2 + $0x60] sm:$0xf]  ;;  %v7447_v48 = vld [vmem:[#allocation2 + $0x6c] sm:$0xf0]  ;;  %v5444_v50 = vor.u32 %v7547_v43, %v5443_v42  ;;  %1678 = vmatpush.bf16.msra.mxu1 %v5188_v45 }
  0x25   :  { %v5171_v49 = vld [vmem:[#allocation2 + $0x160] sm:$0xf]  ;;  %v7479_v51 = vld [vmem:[#allocation2 + $0x16c] sm:$0xf0]  ;;  %v5044_v56 = vor.u32 %v7447_v48, %v5043_v47  ;;  %1691 = vmatpush.bf16.msra.mxu2 %v5316_v46 }
  0x26   :  { %v5299_v52 = vld [vmem:[#allocation2 + $0x260] sm:$0xf]  ;;  %v7511_v53 = vld [vmem:[#allocation2 + $0x26c] sm:$0xf0]  ;;  %v5172_v57 = vor.u32 %v7479_v51, %v5171_v49  ;;  %1704 = vmatpush.bf16.msra.mxu3 %v5444_v50 }
  0x27   :  { %v5427_v54 = vld [vmem:[#allocation2 + $0x360] sm:$0xf]  ;;  %v7543_v55 = vld [vmem:[#allocation2 + $0x36c] sm:$0xf0]  ;;  %v5300_v58 = vor.u32 %v7511_v53, %v5299_v52  ;;  %1666 = vmatpush.bf16.msra.mxu0 %v5044_v56 }
  0x28   :  { %v5027_v59 = vld [vmem:[#allocation2 + $0x40] sm:$0xf]  ;;  %v7443_v60 = vld [vmem:[#allocation2 + $0x4c] sm:$0xf0]  ;;  %v5428_v62 = vor.u32 %v7543_v55, %v5427_v54  ;;  %1679 = vmatpush.bf16.msra.mxu1 %v5172_v57 }
  0x29   :  { %v5155_v61 = vld [vmem:[#allocation2 + $0x140] sm:$0xf]  ;;  %v7475_v63 = vld [vmem:[#allocation2 + $0x14c] sm:$0xf0]  ;;  %v5028_v4 = vor.u32 %v7443_v60, %v5027_v59  ;;  %1692 = vmatpush.bf16.msra.mxu2 %v5300_v58 }
  0x2a   :  { %v5283_v0 = vld [vmem:[#allocation2 + $0x240] sm:$0xf]  ;;  %v7507_v1 = vld [vmem:[#allocation2 + $0x24c] sm:$0xf0]  ;;  %v5156_v5 = vor.u32 %v7475_v63, %v5155_v61  ;;  %1705 = vmatpush.bf16.msra.mxu3 %v5428_v62 }
  0x2b   :  { %v5411_v2 = vld [vmem:[#allocation2 + $0x340] sm:$0xf]  ;;  %v7539_v3 = vld [vmem:[#allocation2 + $0x34c] sm:$0xf0]  ;;  %v5284_v6 = vor.u32 %v7507_v1, %v5283_v0  ;;  %1667 = vmatpush.bf16.msra.mxu0 %v5028_v4 }
  0x2c   :  { %v5011_v7 = vld [vmem:[#allocation2 + $0x20] sm:$0xf]  ;;  %v7439_v8 = vld [vmem:[#allocation2 + $0x2c] sm:$0xf0]  ;;  %v5412_v10 = vor.u32 %v7539_v3, %v5411_v2  ;;  %1680 = vmatpush.bf16.msra.mxu1 %v5156_v5 }
  0x2d   :  { %v5139_v9 = vld [vmem:[#allocation2 + $0x120] sm:$0xf]  ;;  %v7471_v11 = vld [vmem:[#allocation2 + $0x12c] sm:$0xf0]  ;;  %v5012_v16 = vor.u32 %v7439_v8, %v5011_v7  ;;  %1693 = vmatpush.bf16.msra.mxu2 %v5284_v6 }
  0x2e   :  { %v5267_v12 = vld [vmem:[#allocation2 + $0x220] sm:$0xf]  ;;  %v7503_v13 = vld [vmem:[#allocation2 + $0x22c] sm:$0xf0]  ;;  %v5140_v19 = vor.u32 %v7471_v11, %v5139_v9  ;;  %1706 = vmatpush.bf16.msra.mxu3 %v5412_v10  ;;  %v103_v10 = vld [vmem:[%s8519_s0 + $0x18] sm:$0xff] }
  0x2f   :  { %v5395_v14 = vld [vmem:[#allocation2 + $0x320] sm:$0xf]  ;;  %v7535_v15 = vld [vmem:[#allocation2 + $0x32c] sm:$0xf0]  ;;  %v5268_v20 = vor.u32 %v7503_v13, %v5267_v12  ;;  %1668 = vmatpush.bf16.msra.mxu0 %v5012_v16 }
  0x30   :  { %v4995_v17 = vld [vmem:[#allocation2] sm:$0xf]  ;;  %v7435_v18 = vld [vmem:[#allocation2 + $0xc] sm:$0xf0]  ;;  %v5396_v24 = vor.u32 %v7535_v15, %v5395_v14  ;;  %1681 = vmatpush.bf16.msra.mxu1 %v5140_v19  ;;  %v8283_v15 = vpack.c.bf16 %v103_v10, %v103_v10  ;;  %v101_v19 = vld [vmem:[%s8519_s0 + $0x8] sm:$0xff] }
  0x31   :  { %v5123_v21 = vld [vmem:[#allocation2 + $0x100] sm:$0xf]  ;;  %v7467_v22 = vld [vmem:[#allocation2 + $0x10c] sm:$0xf0]  ;;  %v4996_v31 = vor.u32 %v7435_v18, %v4995_v17  ;;  %1694 = vmatpush.bf16.msra.mxu2 %v5268_v20  ;;  %v5237_v10 = vld [vmem:[#allocation2 + $0x1f0] sm:$0xf0] }
  0x32   :  { %v5251_v23 = vld [vmem:[#allocation2 + $0x200] sm:$0xf]  ;;  %v7499_v25 = vld [vmem:[#allocation2 + $0x20c] sm:$0xf0]  ;;  %v5124_v35 = vor.u32 %v7467_v22, %v5123_v21  ;;  %1707 = vmatpush.bf16.msra.mxu3 %v5396_v24 }
  0x33   :  { %v5379_v26 = vld [vmem:[#allocation2 + $0x300] sm:$0xf]  ;;  %v7531_v27 = vld [vmem:[#allocation2 + $0x30c] sm:$0xf0]  ;;  %v5252_v36 = vor.u32 %v7499_v25, %v5251_v23  ;;  %1669 = vmatpush.bf16.msra.mxu0 %v4996_v31  ;;  %v8291_v25 = vpack.c.bf16 %v101_v19, %v101_v19 }
  0x34   :  { %v5619_v28 = vld [vmem:[#allocation2 + $0x4e0] sm:$0xf]  ;;  %v7591_v29 = vld [vmem:[#allocation2 + $0x4ec] sm:$0xf0]  ;;  %v5380_v39 = vor.u32 %v7531_v27, %v5379_v26  ;;  %1682 = vmatpush.bf16.msra.mxu1 %v5124_v35 }
  0x35   :  { %v5747_v30 = vld [vmem:[#allocation2 + $0x5e0] sm:$0xf]  ;;  %v7623_v32 = vld [vmem:[#allocation2 + $0x5ec] sm:$0xf0]  ;;  %v5620_v40 = vor.u32 %v7591_v29, %v5619_v28  ;;  %1695 = vmatpush.bf16.msra.mxu2 %v5252_v36 }
  0x36   :  { %v5875_v33 = vld [vmem:[#allocation2 + $0x6e0] sm:$0xf]  ;;  %v7655_v34 = vld [vmem:[#allocation2 + $0x6ec] sm:$0xf0]  ;;  %v5748_v41 = vor.u32 %v7623_v32, %v5747_v30  ;;  %1708 = vmatpush.bf16.msra.mxu3 %v5380_v39 }
  0x37   :  { %v6003_v37 = vld [vmem:[#allocation2 + $0x7e0] sm:$0xf]  ;;  %v7687_v38 = vld [vmem:[#allocation2 + $0x7ec] sm:$0xf0]  ;;  %v5876_v42 = vor.u32 %v7655_v34, %v5875_v33  ;;  %1714 = vmatpush.bf16.msrb.mxu0 %v5620_v40  ;;  %1683 = vmatmul.bf16.vlgmr.msra.gmra.mxu1 %v8291_v25 }
  0x38   :  { %v5603_v43 = vld [vmem:[#allocation2 + $0x4c0] sm:$0xf]  ;;  %v7587_v44 = vld [vmem:[#allocation2 + $0x4cc] sm:$0xf0]  ;;  %v6004_v46 = vor.u32 %v7687_v38, %v6003_v37  ;;  %1727 = vmatpush.bf16.msrb.mxu1 %v5748_v41 }
  0x39   :  { %v5731_v45 = vld [vmem:[#allocation2 + $0x5c0] sm:$0xf]  ;;  %v7619_v47 = vld [vmem:[#allocation2 + $0x5cc] sm:$0xf0]  ;;  %v5604_v52 = vor.u32 %v7587_v44, %v5603_v43  ;;  %1740 = vmatpush.bf16.msrb.mxu2 %v5876_v42  ;;  %1709 = vmatmul.bf16.vlgmr.msra.gmra.mxu3 %v8283_v15 }
  0x3a   :  { %v5859_v48 = vld [vmem:[#allocation2 + $0x6c0] sm:$0xf]  ;;  %v7651_v49 = vld [vmem:[#allocation2 + $0x6cc] sm:$0xf0]  ;;  %v5732_v54 = vor.u32 %v7619_v47, %v5731_v45  ;;  %1753 = vmatpush.bf16.msrb.mxu3 %v6004_v46 }
  0x3b   :  { %v5987_v50 = vld [vmem:[#allocation2 + $0x7c0] sm:$0xf]  ;;  %v7683_v51 = vld [vmem:[#allocation2 + $0x7cc] sm:$0xf0]  ;;  %v5860_v55 = vor.u32 %v7651_v49, %v5859_v48  ;;  %1715 = vmatpush.bf16.msrb.mxu0 %v5604_v52 }
  0x3c   :  { %v5587_v53 = vld [vmem:[#allocation2 + $0x4a0] sm:$0xf]  ;;  %v7583_v56 = vld [vmem:[#allocation2 + $0x4ac] sm:$0xf0]  ;;  %v5988_v59 = vor.u32 %v7683_v51, %v5987_v50  ;;  %1728 = vmatpush.bf16.msrb.mxu1 %v5732_v54 }
  0x3d   :  { %v5715_v57 = vld [vmem:[#allocation2 + $0x5a0] sm:$0xf]  ;;  %v7615_v58 = vld [vmem:[#allocation2 + $0x5ac] sm:$0xf0]  ;;  %v5588_v0 = vor.u32 %v7583_v56, %v5587_v53  ;;  %1741 = vmatpush.bf16.msrb.mxu2 %v5860_v55 }
  0x3e   :  { %v5843_v60 = vld [vmem:[#allocation2 + $0x6a0] sm:$0xf]  ;;  %v7647_v61 = vld [vmem:[#allocation2 + $0x6ac] sm:$0xf0]  ;;  %v5716_v1 = vor.u32 %v7615_v58, %v5715_v57  ;;  %1754 = vmatpush.bf16.msrb.mxu3 %v5988_v59 }
  0x3f   :  { %v5971_v62 = vld [vmem:[#allocation2 + $0x7a0] sm:$0xf]  ;;  %v7679_v63 = vld [vmem:[#allocation2 + $0x7ac] sm:$0xf0]  ;;  %v5844_v5 = vor.u32 %v7647_v61, %v5843_v60  ;;  %1716 = vmatpush.bf16.msrb.mxu0 %v5588_v0 }
  0x40   :  { %v5571_v2 = vld [vmem:[#allocation2 + $0x480] sm:$0xf]  ;;  %v102_v3 = vld [vmem:[%s8519_s0 + $0x10] sm:$0xff]  ;;  %v5972_v11 = vor.u32 %v7679_v63, %v5971_v62  ;;  %1729 = vmatpush.bf16.msrb.mxu1 %v5716_v1 }
  0x41   :  { %v100_v4 = vld [vmem:[%s8519_s0] sm:$0xff]  ;;  %v7579_v6 = vld [vmem:[#allocation2 + $0x48c] sm:$0xf0]  ;;  %v8276_v8 = vpack.c.bf16 %v102_v3, %v102_v3  ;;  %1742 = vmatpush.bf16.msrb.mxu2 %v5844_v5  ;;  %v5109_v5 = vld [vmem:[#allocation2 + $0xf0] sm:$0xf0] }
  0x42   :  { %v5699_v7 = vld [vmem:[#allocation2 + $0x580] sm:$0xf]  ;;  %v8278_v9 = vpack.c.bf16 %v100_v4, %v100_v4  ;;  %v7611_v12 = vld [vmem:[#allocation2 + $0x58c] sm:$0xf0]  ;;  %v5572_v18 = vor.u32 %v7579_v6, %v5571_v2  ;;  %1755 = vmatpush.bf16.msrb.mxu3 %v5972_v11  ;;  %v7461_v4 = vld [vmem:[#allocation2 + $0xe4] sm:$0xf] }
  0x43   :  { %v5827_v13 = vld [vmem:[#allocation2 + $0x680] sm:$0xf]  ;;  %v7643_v14 = vld [vmem:[#allocation2 + $0x68c] sm:$0xf0]  ;;  %1696 = vmatmul.bf16.vlgmr.msra.gmra.mxu2 %v8276_v8  ;;  %v5700_v20 = vor.u32 %v7611_v12, %v5699_v7  ;;  %v7493_v6 = vld [vmem:[#allocation2 + $0x1e4] sm:$0xf] }
  0x44   :  { %v5955_v16 = vld [vmem:[#allocation2 + $0x780] sm:$0xf]  ;;  %v7675_v17 = vld [vmem:[#allocation2 + $0x78c] sm:$0xf0]  ;;  %1670 = vmatmul.bf16.vlgmr.msra.gmra.mxu0 %v8278_v9  ;;  %v5828_v21 = vor.u32 %v7643_v14, %v5827_v13  ;;  %v7525_v11 = vld [vmem:[#allocation2 + $0x2e4] sm:$0xf] }
  0x45   :  { %v5555_v22 = vld [vmem:[#allocation2 + $0x460] sm:$0xf]  ;;  %v7575_v23 = vld [vmem:[#allocation2 + $0x46c] sm:$0xf0]  ;;  %v5956_v26 = vor.u32 %v7675_v17, %v5955_v16  ;;  %1717 = vmatpush.bf16.msrb.mxu0 %v5572_v18  ;;  %1730 = vmatpush.bf16.msrb.mxu1 %v5700_v20  ;;  %v5365_v12 = vld [vmem:[#allocation2 + $0x2f0] sm:$0xf0]  ;;  %v5112_v20 = vor.u32 %v7461_v4, %v5109_v5 }
  0x46   :  { %v5683_v24 = vld [vmem:[#allocation2 + $0x560] sm:$0xf]  ;;  %v7607_v27 = vld [vmem:[#allocation2 + $0x56c] sm:$0xf0]  ;;  %v5556_v32 = vor.u32 %v7575_v23, %v5555_v22  ;;  %1743 = vmatpush.bf16.msrb.mxu2 %v5828_v21  ;;  %v7557_v16 = vld [vmem:[#allocation2 + $0x3e4] sm:$0xf] }
  0x47   :  { %v5811_v28 = vld [vmem:[#allocation2 + $0x660] sm:$0xf]  ;;  %v7639_v29 = vld [vmem:[#allocation2 + $0x66c] sm:$0xf0]  ;;  %v5684_v33 = vor.u32 %v7607_v27, %v5683_v24  ;;  %1756 = vmatpush.bf16.msrb.mxu3 %v5956_v26  ;;  %v5493_v17 = vld [vmem:[#allocation2 + $0x3f0] sm:$0xf0]  ;;  %v5240_v24 = vor.u32 %v7493_v6, %v5237_v10  ;;  %v5368_v26 = vor.u32 %v7525_v11, %v5365_v12 }
  0x48   :  { %v5939_v30 = vld [vmem:[#allocation2 + $0x760] sm:$0xf]  ;;  %v7671_v31 = vld [vmem:[#allocation2 + $0x76c] sm:$0xf0]  ;;  %v5812_v34 = vor.u32 %v7639_v29, %v5811_v28  ;;  %v7457_v21 = vld [vmem:[#allocation2 + $0xc4] sm:$0xf] }
  0x49   :  { %v5539_v35 = vld [vmem:[#allocation2 + $0x440] sm:$0xf]  ;;  %v7571_v36 = vld [vmem:[#allocation2 + $0x44c] sm:$0xf0]  ;;  %v5940_v38 = vor.u32 %v7671_v31, %v5939_v30  ;;  %1718 = vmatpush.bf16.msrb.mxu0 %v5556_v32  ;;  %1731 = vmatpush.bf16.msrb.mxu1 %v5684_v33  ;;  %v107_v23 = vld [vmem:[%s8519_s0 + $0x38] sm:$0xff]  ;;  %v5496_v30 = vor.u32 %v7557_v16, %v5493_v17 }
  0x4a   :  { %v5667_v37 = vld [vmem:[#allocation2 + $0x540] sm:$0xf]  ;;  %v7603_v39 = vld [vmem:[#allocation2 + $0x54c] sm:$0xf0]  ;;  %v5540_v44 = vor.u32 %v7571_v36, %v5539_v35  ;;  %1744 = vmatpush.bf16.msrb.mxu2 %v5812_v34  ;;  %v5093_v27 = vld [vmem:[#allocation2 + $0xd0] sm:$0xf0] }
  0x4b   :  { %v5795_v40 = vld [vmem:[#allocation2 + $0x640] sm:$0xf]  ;;  %v7635_v41 = vld [vmem:[#allocation2 + $0x64c] sm:$0xf0]  ;;  %v5668_v45 = vor.u32 %v7603_v39, %v5667_v37  ;;  %1757 = vmatpush.bf16.msrb.mxu3 %v5940_v38  ;;  %v7489_v28 = vld [vmem:[#allocation2 + $0x1c4] sm:$0xf]  ;;  %v8310_v38 = vpack.c.bf16 %v107_v23, %v107_v23  ;;  %v5096_v39 = vor.u32 %v7457_v21, %v5093_v27 }
  0x4c   :  { %v5923_v42 = vld [vmem:[#allocation2 + $0x740] sm:$0xf]  ;;  %v7667_v43 = vld [vmem:[#allocation2 + $0x74c] sm:$0xf0]  ;;  %v5796_v46 = vor.u32 %v7635_v41, %v5795_v40  ;;  %v105_v29 = vld [vmem:[%s8519_s0 + $0x28] sm:$0xff] }
  0x4d   :  { %v5523_v47 = vld [vmem:[#allocation2 + $0x420] sm:$0xf]  ;;  %v7567_v48 = vld [vmem:[#allocation2 + $0x42c] sm:$0xf0]  ;;  %v5924_v50 = vor.u32 %v7667_v43, %v5923_v42  ;;  %1719 = vmatpush.bf16.msrb.mxu0 %v5540_v44  ;;  %1732 = vmatpush.bf16.msrb.mxu1 %v5668_v45  ;;  %v5221_v31 = vld [vmem:[#allocation2 + $0x1d0] sm:$0xf0]  ;;  %v8312_v40 = vpack.c.bf16 %v105_v29, %v105_v29 }
  0x4e   :  { %v5651_v49 = vld [vmem:[#allocation2 + $0x520] sm:$0xf]  ;;  %v7599_v51 = vld [vmem:[#allocation2 + $0x52c] sm:$0xf0]  ;;  %v5524_v56 = vor.u32 %v7567_v48, %v5523_v47  ;;  %1745 = vmatpush.bf16.msrb.mxu2 %v5796_v46  ;;  %v7521_v32 = vld [vmem:[#allocation2 + $0x2c4] sm:$0xf]  ;;  %v5224_v41 = vor.u32 %v7489_v28, %v5221_v31 }
  0x4f   :  { %v5779_v52 = vld [vmem:[#allocation2 + $0x620] sm:$0xf]  ;;  %v7631_v53 = vld [vmem:[#allocation2 + $0x62c] sm:$0xf0]  ;;  %v5652_v59 = vor.u32 %v7599_v51, %v5651_v49  ;;  %1758 = vmatpush.bf16.msrb.mxu3 %v5924_v50  ;;  %v5349_v33 = vld [vmem:[#allocation2 + $0x2d0] sm:$0xf0] }
  0x50   :  { %v5907_v54 = vld [vmem:[#allocation2 + $0x720] sm:$0xf]  ;;  %v7663_v55 = vld [vmem:[#allocation2 + $0x72c] sm:$0xf0]  ;;  %v5780_v60 = vor.u32 %v7631_v53, %v5779_v52  ;;  %v7553_v35 = vld [vmem:[#allocation2 + $0x3c4] sm:$0xf]  ;;  %v5352_v42 = vor.u32 %v7521_v32, %v5349_v33 }
  0x51   :  { %v5507_v57 = vld [vmem:[#allocation2 + $0x400] sm:$0xf]  ;;  %v7563_v58 = vld [vmem:[#allocation2 + $0x40c] sm:$0xf0]  ;;  %v5908_v0 = vor.u32 %v7663_v55, %v5907_v54  ;;  %1720 = vmatpush.bf16.msrb.mxu0 %v5524_v56  ;;  %1733 = vmatpush.bf16.msrb.mxu1 %v5652_v59  ;;  %v5477_v36 = vld [vmem:[#allocation2 + $0x3d0] sm:$0xf0] }
  0x52   :  { %v5635_v61 = vld [vmem:[#allocation2 + $0x500] sm:$0xf]  ;;  %v7595_v62 = vld [vmem:[#allocation2 + $0x50c] sm:$0xf0]  ;;  %v5508_v7 = vor.u32 %v7563_v58, %v5507_v57  ;;  %1746 = vmatpush.bf16.msrb.mxu2 %v5780_v60  ;;  %v7453_v43 = vld [vmem:[#allocation2 + $0xa4] sm:$0xf]  ;;  %v5480_v46 = vor.u32 %v7553_v35, %v5477_v36 }
  0x53   :  { %v5763_v63 = vld [vmem:[#allocation2 + $0x600] sm:$0xf]  ;;  %v7627_v1 = vld [vmem:[#allocation2 + $0x60c] sm:$0xf0]  ;;  %v5636_v13 = vor.u32 %v7595_v62, %v5635_v61  ;;  %1759 = vmatpush.bf16.msrb.mxu3 %v5908_v0  ;;  %v5077_v44 = vld [vmem:[#allocation2 + $0xb0] sm:$0xf0] }
  0x54   :  { %v5891_v2 = vld [vmem:[#allocation2 + $0x700] sm:$0xf]  ;;  %v7659_v3 = vld [vmem:[#allocation2 + $0x70c] sm:$0xf0]  ;;  %v5764_v14 = vor.u32 %v7627_v1, %v5763_v63  ;;  %v7485_v45 = vld [vmem:[#allocation2 + $0x1a4] sm:$0xf]  ;;  %v5080_v52 = vor.u32 %v7453_v43, %v5077_v44 }
  0x55   :  { %v106_v18 = vld [vmem:[%s8519_s0 + $0x30] sm:$0xff]  ;;  %v5892_v19 = vor.u32 %v7659_v3, %v5891_v2  ;;  %v104_v22 = vld [vmem:[%s8519_s0 + $0x20] sm:$0xff]  ;;  %1721 = vmatpush.bf16.msrb.mxu0 %v5508_v7  ;;  %1734 = vmatpush.bf16.msrb.mxu1 %v5636_v13 }
  0x56   :  { %v8306_v34 = vpack.c.bf16 %v106_v18, %v106_v18  ;;  %1747 = vmatpush.bf16.msrb.mxu2 %v5764_v14  ;;  %v8308_v37 = vpack.c.bf16 %v104_v22, %v104_v22  ;;  %v5205_v47 = vld [vmem:[#allocation2 + $0x1b0] sm:$0xf0]  ;;  %v7517_v48 = vld [vmem:[#allocation2 + $0x2a4] sm:$0xf] }
  0x57   :  { %1760 = vmatpush.bf16.msrb.mxu3 %v5892_v19  ;;  %v5333_v49 = vld [vmem:[#allocation2 + $0x2b0] sm:$0xf0]  ;;  %v7549_v50 = vld [vmem:[#allocation2 + $0x3a4] sm:$0xf]  ;;  %v5208_v53 = vor.u32 %v7485_v45, %v5205_v47 }
  0x58   :  { %v5461_v51 = vld [vmem:[#allocation2 + $0x3b0] sm:$0xf0]  ;;  %1722 = vmatmul.bf16.vlgmr.msrb.gmra.mxu0 %v8308_v37  ;;  %1735 = vmatmul.bf16.vlgmr.msrb.gmra.mxu1 %v8312_v40  ;;  %v5336_v54 = vor.u32 %v7517_v48, %v5333_v49  ;;  %v7449_v55 = vld [vmem:[#allocation2 + $0x84] sm:$0xf] }
  0x59   :  { %1766 = vmatpush.bf16.msra.mxu0 %v5112_v20  ;;  %1779 = vmatpush.bf16.msra.mxu1 %v5240_v24  ;;  %v5061_v56 = vld [vmem:[#allocation2 + $0x90] sm:$0xf0]  ;;  %v7481_v57 = vld [vmem:[#allocation2 + $0x184] sm:$0xf]  ;;  %v5464_v58 = vor.u32 %v7549_v50, %v5461_v51 }
  0x5a   :  { %1792 = vmatpush.bf16.msra.mxu2 %v5368_v26  ;;  %1761 = vmatmul.bf16.vlgmr.msrb.gmra.mxu3 %v8310_v38  ;;  %v5189_v59 = vld [vmem:[#allocation2 + $0x190] sm:$0xf0]  ;;  %v7513_v60 = vld [vmem:[#allocation2 + $0x284] sm:$0xf]  ;;  %v5064_v0 = vor.u32 %v7449_v55, %v5061_v56 }
  0x5b   :  { %1805 = vmatpush.bf16.msra.mxu3 %v5496_v30  ;;  %1748 = vmatmul.bf16.vlgmr.msrb.gmra.mxu2 %v8306_v34  ;;  %v5317_v61 = vld [vmem:[#allocation2 + $0x290] sm:$0xf0]  ;;  %v7545_v62 = vld [vmem:[#allocation2 + $0x384] sm:$0xf]  ;;  %v5192_v1 = vor.u32 %v7481_v57, %v5189_v59 }
  0x5c   :  { %v5445_v63 = vld [vmem:[#allocation2 + $0x390] sm:$0xf0]  ;;  %v5320_v2 = vor.u32 %v7513_v60, %v5317_v61  ;;  %v7445_v3 = vld [vmem:[#allocation2 + $0x64] sm:$0xf] }
  0x5d   :  { %1767 = vmatpush.bf16.msra.mxu0 %v5096_v39  ;;  %1780 = vmatpush.bf16.msra.mxu1 %v5224_v41  ;;  %v5045_v4 = vld [vmem:[#allocation2 + $0x70] sm:$0xf0]  ;;  %v7477_v5 = vld [vmem:[#allocation2 + $0x164] sm:$0xf]  ;;  %v5448_v6 = vor.u32 %v7545_v62, %v5445_v63 }
  0x5e   :  { %1793 = vmatpush.bf16.msra.mxu2 %v5352_v42  ;;  %v5173_v7 = vld [vmem:[#allocation2 + $0x170] sm:$0xf0]  ;;  %v7509_v10 = vld [vmem:[#allocation2 + $0x264] sm:$0xf]  ;;  %v5048_v14 = vor.u32 %v7445_v3, %v5045_v4 }
  0x5f   :  { %1806 = vmatpush.bf16.msra.mxu3 %v5480_v46  ;;  %v5301_v11 = vld [vmem:[#allocation2 + $0x270] sm:$0xf0]  ;;  %v7541_v12 = vld [vmem:[#allocation2 + $0x364] sm:$0xf]  ;;  %v5176_v16 = vor.u32 %v7477_v5, %v5173_v7 }
  0x60   :  { %v5429_v13 = vld [vmem:[#allocation2 + $0x370] sm:$0xf0]  ;;  %v5304_v17 = vor.u32 %v7509_v10, %v5301_v11  ;;  %v7441_v18 = vld [vmem:[#allocation2 + $0x44] sm:$0xf] }
  0x61   :  { %1768 = vmatpush.bf16.msra.mxu0 %v5080_v52  ;;  %1781 = vmatpush.bf16.msra.mxu1 %v5208_v53  ;;  %v5029_v19 = vld [vmem:[#allocation2 + $0x50] sm:$0xf0]  ;;  %v7473_v20 = vld [vmem:[#allocation2 + $0x144] sm:$0xf]  ;;  %v5432_v21 = vor.u32 %v7541_v12, %v5429_v13 }
  0x62   :  { %1794 = vmatpush.bf16.msra.mxu2 %v5336_v54  ;;  %v5157_v22 = vld [vmem:[#allocation2 + $0x150] sm:$0xf0]  ;;  %v7505_v23 = vld [vmem:[#allocation2 + $0x244] sm:$0xf]  ;;  %v5032_v28 = vor.u32 %v7441_v18, %v5029_v19 }
  0x63   :  { %1807 = vmatpush.bf16.msra.mxu3 %v5464_v58  ;;  %v5285_v24 = vld [vmem:[#allocation2 + $0x250] sm:$0xf0]  ;;  %v7537_v26 = vld [vmem:[#allocation2 + $0x344] sm:$0xf]  ;;  %v5160_v29 = vor.u32 %v7473_v20, %v5157_v22 }
  0x64   :  { %v5413_v27 = vld [vmem:[#allocation2 + $0x350] sm:$0xf0]  ;;  %v5288_v30 = vor.u32 %v7505_v23, %v5285_v24  ;;  %v7437_v31 = vld [vmem:[#allocation2 + $0x24] sm:$0xf] }
  0x65   :  { %1769 = vmatpush.bf16.msra.mxu0 %v5064_v0  ;;  %1782 = vmatpush.bf16.msra.mxu1 %v5192_v1  ;;  %v5013_v32 = vld [vmem:[#allocation2 + $0x30] sm:$0xf0]  ;;  %v7469_v33 = vld [vmem:[#allocation2 + $0x124] sm:$0xf]  ;;  %v5416_v35 = vor.u32 %v7537_v26, %v5413_v27 }
  0x66   :  { %1795 = vmatpush.bf16.msra.mxu2 %v5320_v2  ;;  %v5141_v36 = vld [vmem:[#allocation2 + $0x130] sm:$0xf0]  ;;  %v7501_v39 = vld [vmem:[#allocation2 + $0x224] sm:$0xf]  ;;  %v5016_v44 = vor.u32 %v7437_v31, %v5013_v32 }
  0x67   :  { %1808 = vmatpush.bf16.msra.mxu3 %v5448_v6  ;;  %v5269_v41 = vld [vmem:[#allocation2 + $0x230] sm:$0xf0]  ;;  %v7533_v42 = vld [vmem:[#allocation2 + $0x324] sm:$0xf]  ;;  %v5144_v47 = vor.u32 %v7469_v33, %v5141_v36 }
  0x68   :  { %v5397_v43 = vld [vmem:[#allocation2 + $0x330] sm:$0xf0]  ;;  %v7433_v45 = vld [vmem:[#allocation2 + $0x4] sm:$0xf]  ;;  %v5272_v48 = vor.u32 %v7501_v39, %v5269_v41 }
  0x69   :  { %1770 = vmatpush.bf16.msra.mxu0 %v5048_v14  ;;  %1783 = vmatpush.bf16.msra.mxu1 %v5176_v16  ;;  %v4997_v46 = vld [vmem:[#allocation2 + $0x10] sm:$0xf0]  ;;  %v7465_v49 = vld [vmem:[#allocation2 + $0x104] sm:$0xf]  ;;  %v5400_v52 = vor.u32 %v7533_v42, %v5397_v43 }
  0x6a   :  { %1796 = vmatpush.bf16.msra.mxu2 %v5304_v17  ;;  %v5125_v50 = vld [vmem:[#allocation2 + $0x110] sm:$0xf0]  ;;  %v7497_v51 = vld [vmem:[#allocation2 + $0x204] sm:$0xf]  ;;  %v5000_v59 = vor.u32 %v7433_v45, %v4997_v46 }
  0x6b   :  { %1809 = vmatpush.bf16.msra.mxu3 %v5432_v21  ;;  %v5253_v53 = vld [vmem:[#allocation2 + $0x210] sm:$0xf0]  ;;  %v7529_v54 = vld [vmem:[#allocation2 + $0x304] sm:$0xf]  ;;  %v5128_v63 = vor.u32 %v7465_v49, %v5125_v50 }
  0x6c   :  { %v5381_v55 = vld [vmem:[#allocation2 + $0x310] sm:$0xf0]  ;;  %v7589_v56 = vld [vmem:[#allocation2 + $0x4e4] sm:$0xf]  ;;  %v5256_v0 = vor.u32 %v7497_v51, %v5253_v53 }
  0x6d   :  { %1771 = vmatpush.bf16.msra.mxu0 %v5032_v28  ;;  %1784 = vmatpush.bf16.msra.mxu1 %v5160_v29  ;;  %v5621_v57 = vld [vmem:[#allocation2 + $0x4f0] sm:$0xf0]  ;;  %v7621_v58 = vld [vmem:[#allocation2 + $0x5e4] sm:$0xf]  ;;  %v5384_v3 = vor.u32 %v7529_v54, %v5381_v55 }
  0x6e   :  { %1797 = vmatpush.bf16.msra.mxu2 %v5288_v30  ;;  %v5749_v60 = vld [vmem:[#allocation2 + $0x5f0] sm:$0xf0]  ;;  %v7653_v61 = vld [vmem:[#allocation2 + $0x6e4] sm:$0xf]  ;;  %v5624_v4 = vor.u32 %v7589_v56, %v5621_v57 }
  0x6f   :  { %1810 = vmatpush.bf16.msra.mxu3 %v5416_v35  ;;  %v5877_v62 = vld [vmem:[#allocation2 + $0x6f0] sm:$0xf0]  ;;  %v7685_v1 = vld [vmem:[#allocation2 + $0x7e4] sm:$0xf]  ;;  %v5752_v5 = vor.u32 %v7621_v58, %v5749_v60 }
  0x70   :  { %v6005_v2 = vld [vmem:[#allocation2 + $0x7f0] sm:$0xf0]  ;;  %v5880_v6 = vor.u32 %v7653_v61, %v5877_v62  ;;  %v7585_v7 = vld [vmem:[#allocation2 + $0x4c4] sm:$0xf] }
  0x71   :  { %1772 = vmatpush.bf16.msra.mxu0 %v5016_v44  ;;  %1785 = vmatpush.bf16.msra.mxu1 %v5144_v47  ;;  %v5605_v10 = vld [vmem:[#allocation2 + $0x4d0] sm:$0xf0]  ;;  %v7617_v11 = vld [vmem:[#allocation2 + $0x5c4] sm:$0xf]  ;;  %v6008_v12 = vor.u32 %v7685_v1, %v6005_v2 }
  0x72   :  { %1798 = vmatpush.bf16.msra.mxu2 %v5272_v48  ;;  %v5733_v13 = vld [vmem:[#allocation2 + $0x5d0] sm:$0xf0]  ;;  %v7649_v14 = vld [vmem:[#allocation2 + $0x6c4] sm:$0xf]  ;;  %v5608_v19 = vor.u32 %v7585_v7, %v5605_v10 }
  0x73   :  { %1811 = vmatpush.bf16.msra.mxu3 %v5400_v52  ;;  %v5861_v16 = vld [vmem:[#allocation2 + $0x6d0] sm:$0xf0]  ;;  %v7681_v17 = vld [vmem:[#allocation2 + $0x7c4] sm:$0xf]  ;;  %v5736_v20 = vor.u32 %v7617_v11, %v5733_v13 }
  0x74   :  { %v5989_v18 = vld [vmem:[#allocation2 + $0x7d0] sm:$0xf0]  ;;  %v5864_v21 = vor.u32 %v7649_v14, %v5861_v16  ;;  %v7581_v22 = vld [vmem:[#allocation2 + $0x4a4] sm:$0xf] }
  0x75   :  { %1773 = vmatpush.bf16.msra.mxu0 %v5000_v59  ;;  %1786 = vmatpush.bf16.msra.mxu1 %v5128_v63  ;;  %v5589_v23 = vld [vmem:[#allocation2 + $0x4b0] sm:$0xf0]  ;;  %v7613_v24 = vld [vmem:[#allocation2 + $0x5a4] sm:$0xf]  ;;  %v5992_v26 = vor.u32 %v7681_v17, %v5989_v18 }
  0x76   :  { %1799 = vmatpush.bf16.msra.mxu2 %v5256_v0  ;;  %v5717_v27 = vld [vmem:[#allocation2 + $0x5b0] sm:$0xf0]  ;;  %v7645_v28 = vld [vmem:[#allocation2 + $0x6a4] sm:$0xf]  ;;  %v5592_v32 = vor.u32 %v7581_v22, %v5589_v23 }
  0x77   :  { %1812 = vmatpush.bf16.msra.mxu3 %v5384_v3  ;;  %v5845_v29 = vld [vmem:[#allocation2 + $0x6b0] sm:$0xf0]  ;;  %v7677_v30 = vld [vmem:[#allocation2 + $0x7a4] sm:$0xf]  ;;  %v5720_v33 = vor.u32 %v7613_v24, %v5717_v27 }
  0x78   :  { %v5973_v31 = vld [vmem:[#allocation2 + $0x7b0] sm:$0xf0]  ;;  %1774 = vmatmul.bf16.vlgmr.msra.gmra.mxu0 %v8278_v9  ;;  %1787 = vmatmul.bf16.vlgmr.msra.gmra.mxu1 %v8291_v25  ;;  %v5848_v35 = vor.u32 %v7645_v28, %v5845_v29  ;;  %v7577_v36 = vld [vmem:[#allocation2 + $0x484] sm:$0xf] }
  0x79   :  { %1818 = vmatpush.bf16.msrb.mxu0 %v5624_v4  ;;  %1831 = vmatpush.bf16.msrb.mxu1 %v5752_v5  ;;  %v5573_v39 = vld [vmem:[#allocation2 + $0x490] sm:$0xf0]  ;;  %v7609_v41 = vld [vmem:[#allocation2 + $0x584] sm:$0xf]  ;;  %v5976_v42 = vor.u32 %v7677_v30, %v5973_v31 }
  0x7a   :  { %1844 = vmatpush.bf16.msrb.mxu2 %v5880_v6  ;;  %1813 = vmatmul.bf16.vlgmr.msra.gmra.mxu3 %v8283_v15  ;;  %v5701_v43 = vld [vmem:[#allocation2 + $0x590] sm:$0xf0]  ;;  %v7641_v44 = vld [vmem:[#allocation2 + $0x684] sm:$0xf]  ;;  %v5576_v48 = vor.u32 %v7577_v36, %v5573_v39  ;;  %v5115_v39 = vld [vmem:[#allocation2 + $0xe8] sm:$0xf] }
  0x7b   :  { %1857 = vmatpush.bf16.msrb.mxu3 %v6008_v12  ;;  %1800 = vmatmul.bf16.vlgmr.msra.gmra.mxu2 %v8276_v8  ;;  %v5829_v45 = vld [vmem:[#allocation2 + $0x690] sm:$0xf0]  ;;  %v7673_v46 = vld [vmem:[#allocation2 + $0x784] sm:$0xf]  ;;  %v5704_v49 = vor.u32 %v7609_v41, %v5701_v43  ;;  %v7464_v41 = vld [vmem:[#allocation2 + $0xf4] sm:$0xf0] }
  0x7c   :  { %v5957_v47 = vld [vmem:[#allocation2 + $0x790] sm:$0xf0]  ;;  %v5832_v50 = vor.u32 %v7641_v44, %v5829_v45  ;;  %v7573_v51 = vld [vmem:[#allocation2 + $0x464] sm:$0xf]  ;;  %v7496_v44 = vld [vmem:[#allocation2 + $0x1f4] sm:$0xf0] }
  0x7d   :  { %1819 = vmatpush.bf16.msrb.mxu0 %v5608_v19  ;;  %1832 = vmatpush.bf16.msrb.mxu1 %v5736_v20  ;;  %v5557_v52 = vld [vmem:[#allocation2 + $0x470] sm:$0xf0]  ;;  %v7605_v53 = vld [vmem:[#allocation2 + $0x564] sm:$0xf]  ;;  %v5960_v54 = vor.u32 %v7673_v46, %v5957_v47  ;;  %v5371_v45 = vld [vmem:[#allocation2 + $0x2e8] sm:$0xf] }
  0x7e   :  { %1845 = vmatpush.bf16.msrb.mxu2 %v5864_v21  ;;  %v5685_v55 = vld [vmem:[#allocation2 + $0x570] sm:$0xf0]  ;;  %v7637_v56 = vld [vmem:[#allocation2 + $0x664] sm:$0xf]  ;;  %v5560_v60 = vor.u32 %v7573_v51, %v5557_v52  ;;  %v7528_v46 = vld [vmem:[#allocation2 + $0x2f4] sm:$0xf0]  ;;  %v5116_v52 = vor.u32 %v7464_v41, %v5115_v39 }
  0x7f   :  { %1858 = vmatpush.bf16.msrb.mxu3 %v5992_v26  ;;  %v5813_v57 = vld [vmem:[#allocation2 + $0x670] sm:$0xf0]  ;;  %v7669_v58 = vld [vmem:[#allocation2 + $0x764] sm:$0xf]  ;;  %v5688_v61 = vor.u32 %v7605_v53, %v5685_v55  ;;  %v5099_v55 = vld [vmem:[#allocation2 + $0xc8] sm:$0xf] }
  0x80   :  { %v5941_v59 = vld [vmem:[#allocation2 + $0x770] sm:$0xf0]  ;;  %v5816_v62 = vor.u32 %v7637_v56, %v5813_v57  ;;  %v7569_v63 = vld [vmem:[#allocation2 + $0x444] sm:$0xf]  ;;  %v7460_v56 = vld [vmem:[#allocation2 + $0xd4] sm:$0xf0] }
  0x81   :  { %1820 = vmatpush.bf16.msrb.mxu0 %v5592_v32  ;;  %1833 = vmatpush.bf16.msrb.mxu1 %v5720_v33  ;;  %v5541_v0 = vld [vmem:[#allocation2 + $0x450] sm:$0xf0]  ;;  %v7601_v1 = vld [vmem:[#allocation2 + $0x544] sm:$0xf]  ;;  %v5944_v2 = vor.u32 %v7669_v58, %v5941_v59  ;;  %v5227_v57 = vld [vmem:[#allocation2 + $0x1c8] sm:$0xf] }
  0x82   :  { %1846 = vmatpush.bf16.msrb.mxu2 %v5848_v35  ;;  %v5669_v3 = vld [vmem:[#allocation2 + $0x550] sm:$0xf0]  ;;  %v7633_v4 = vld [vmem:[#allocation2 + $0x644] sm:$0xf]  ;;  %v5544_v10 = vor.u32 %v7569_v63, %v5541_v0  ;;  %v7492_v59 = vld [vmem:[#allocation2 + $0x1d4] sm:$0xf0]  ;;  %v5100_v0 = vor.u32 %v7460_v56, %v5099_v55 }
  0x83   :  { %1859 = vmatpush.bf16.msrb.mxu3 %v5976_v42  ;;  %v5797_v5 = vld [vmem:[#allocation2 + $0x650] sm:$0xf0]  ;;  %v7665_v6 = vld [vmem:[#allocation2 + $0x744] sm:$0xf]  ;;  %v5672_v11 = vor.u32 %v7601_v1, %v5669_v3  ;;  %v5243_v42 = vld [vmem:[#allocation2 + $0x1e8] sm:$0xf]  ;;  %v5228_v1 = vor.u32 %v7492_v59, %v5227_v57 }
  0x84   :  { %v5925_v7 = vld [vmem:[#allocation2 + $0x750] sm:$0xf0]  ;;  %v5800_v12 = vor.u32 %v7633_v4, %v5797_v5  ;;  %v7565_v13 = vld [vmem:[#allocation2 + $0x424] sm:$0xf]  ;;  %v5244_v53 = vor.u32 %v7496_v44, %v5243_v42  ;;  %v7556_v63 = vld [vmem:[#allocation2 + $0x3d4] sm:$0xf0] }
  0x85   :  { %1821 = vmatpush.bf16.msrb.mxu0 %v5576_v48  ;;  %1834 = vmatpush.bf16.msrb.mxu1 %v5704_v49  ;;  %v5525_v14 = vld [vmem:[#allocation2 + $0x430] sm:$0xf0]  ;;  %v7597_v16 = vld [vmem:[#allocation2 + $0x524] sm:$0xf]  ;;  %v5928_v17 = vor.u32 %v7665_v6, %v5925_v7  ;;  %v5499_v49 = vld [vmem:[#allocation2 + $0x3e8] sm:$0xf] }
  0x86   :  { %1847 = vmatpush.bf16.msrb.mxu2 %v5832_v50  ;;  %v5653_v18 = vld [vmem:[#allocation2 + $0x530] sm:$0xf0]  ;;  %v7629_v19 = vld [vmem:[#allocation2 + $0x624] sm:$0xf]  ;;  %v5528_v23 = vor.u32 %v7565_v13, %v5525_v14  ;;  %v7560_v50 = vld [vmem:[#allocation2 + $0x3f4] sm:$0xf0] }
  0x87   :  { %1860 = vmatpush.bf16.msrb.mxu3 %v5960_v54  ;;  %v5781_v20 = vld [vmem:[#allocation2 + $0x630] sm:$0xf0]  ;;  %v7661_v21 = vld [vmem:[#allocation2 + $0x724] sm:$0xf]  ;;  %v5656_v27 = vor.u32 %v7597_v16, %v5653_v18  ;;  %v5372_v54 = vor.u32 %v7528_v46, %v5371_v45  ;;  %v5500_v58 = vor.u32 %v7560_v50, %v5499_v49  ;;  %v5083_v3 = vld [vmem:[#allocation2 + $0xa8] sm:$0xf] }
  0x88   :  { %v5909_v22 = vld [vmem:[#allocation2 + $0x730] sm:$0xf0]  ;;  %v7561_v24 = vld [vmem:[#allocation2 + $0x404] sm:$0xf]  ;;  %v5784_v28 = vor.u32 %v7629_v19, %v5781_v20  ;;  %v7456_v4 = vld [vmem:[#allocation2 + $0xb4] sm:$0xf0] }
  0x89   :  { %1822 = vmatpush.bf16.msrb.mxu0 %v5560_v60  ;;  %1835 = vmatpush.bf16.msrb.mxu1 %v5688_v61  ;;  %v5509_v26 = vld [vmem:[#allocation2 + $0x410] sm:$0xf0]  ;;  %v7593_v29 = vld [vmem:[#allocation2 + $0x504] sm:$0xf]  ;;  %v5912_v32 = vor.u32 %v7661_v21, %v5909_v22  ;;  %v5355_v60 = vld [vmem:[#allocation2 + $0x2c8] sm:$0xf]  ;;  %v5084_v14 = vor.u32 %v7456_v4, %v5083_v3 }
  0x8a   :  { %1848 = vmatpush.bf16.msrb.mxu2 %v5816_v62  ;;  %v5637_v30 = vld [vmem:[#allocation2 + $0x510] sm:$0xf0]  ;;  %v7625_v31 = vld [vmem:[#allocation2 + $0x604] sm:$0xf]  ;;  %v5512_v43 = vor.u32 %v7561_v24, %v5509_v26  ;;  %v7524_v61 = vld [vmem:[#allocation2 + $0x2d4] sm:$0xf0] }
  0x8b   :  { %1861 = vmatpush.bf16.msrb.mxu3 %v5944_v2  ;;  %v5765_v33 = vld [vmem:[#allocation2 + $0x610] sm:$0xf0]  ;;  %v7657_v35 = vld [vmem:[#allocation2 + $0x704] sm:$0xf]  ;;  %v5640_v47 = vor.u32 %v7593_v29, %v5637_v30  ;;  %v5483_v62 = vld [vmem:[#allocation2 + $0x3c8] sm:$0xf]  ;;  %v5356_v2 = vor.u32 %v7524_v61, %v5355_v60 }
  0x8c   :  { %v5893_v36 = vld [vmem:[#allocation2 + $0x710] sm:$0xf0]  ;;  %v5768_v48 = vor.u32 %v7625_v31, %v5765_v33  ;;  %v5211_v5 = vld [vmem:[#allocation2 + $0x1a8] sm:$0xf]  ;;  %v5484_v6 = vor.u32 %v7556_v63, %v5483_v62  ;;  %v7488_v7 = vld [vmem:[#allocation2 + $0x1b4] sm:$0xf0] }
  0x8d   :  { %1823 = vmatpush.bf16.msrb.mxu0 %v5544_v10  ;;  %1836 = vmatpush.bf16.msrb.mxu1 %v5672_v11  ;;  %v5896_v51 = vor.u32 %v7657_v35, %v5893_v36  ;;  %v5339_v10 = vld [vmem:[#allocation2 + $0x2a8] sm:$0xf]  ;;  %v7520_v11 = vld [vmem:[#allocation2 + $0x2b4] sm:$0xf0]  ;;  %v5212_v16 = vor.u32 %v7488_v7, %v5211_v5 }
  0x8e   :  { %1849 = vmatpush.bf16.msrb.mxu2 %v5800_v12  ;;  %v5467_v12 = vld [vmem:[#allocation2 + $0x3a8] sm:$0xf]  ;;  %v7552_v13 = vld [vmem:[#allocation2 + $0x3b4] sm:$0xf0] }
  0x8f   :  { %1862 = vmatpush.bf16.msrb.mxu3 %v5928_v17  ;;  %v5340_v17 = vor.u32 %v7520_v11, %v5339_v10  ;;  %v5067_v18 = vld [vmem:[#allocation2 + $0x88] sm:$0xf]  ;;  %v7452_v19 = vld [vmem:[#allocation2 + $0x94] sm:$0xf0]  ;;  %v5468_v21 = vor.u32 %v7552_v13, %v5467_v12 }
  0x90   :  { %v5195_v20 = vld [vmem:[#allocation2 + $0x188] sm:$0xf]  ;;  %v7484_v22 = vld [vmem:[#allocation2 + $0x194] sm:$0xf0] }
  0x91   :  { %1824 = vmatpush.bf16.msrb.mxu0 %v5528_v23  ;;  %1837 = vmatpush.bf16.msrb.mxu1 %v5656_v27  ;;  %v5323_v23 = vld [vmem:[#allocation2 + $0x288] sm:$0xf]  ;;  %v7516_v24 = vld [vmem:[#allocation2 + $0x294] sm:$0xf0]  ;;  %v5196_v29 = vor.u32 %v7484_v22, %v5195_v20 }
  0x92   :  { %1850 = vmatpush.bf16.msrb.mxu2 %v5784_v28  ;;  %v5451_v26 = vld [vmem:[#allocation2 + $0x388] sm:$0xf]  ;;  %v7548_v27 = vld [vmem:[#allocation2 + $0x394] sm:$0xf0]  ;;  %v5068_v28 = vor.u32 %v7452_v19, %v5067_v18  ;;  %v5324_v30 = vor.u32 %v7516_v24, %v5323_v23 }
  0x93   :  { %1863 = vmatpush.bf16.msrb.mxu3 %v5912_v32  ;;  %v5051_v31 = vld [vmem:[#allocation2 + $0x68] sm:$0xf]  ;;  %v7448_v32 = vld [vmem:[#allocation2 + $0x74] sm:$0xf0]  ;;  %v5452_v35 = vor.u32 %v7548_v27, %v5451_v26 }
  0x94   :  { %v5179_v33 = vld [vmem:[#allocation2 + $0x168] sm:$0xf]  ;;  %v7480_v36 = vld [vmem:[#allocation2 + $0x174] sm:$0xf0]  ;;  %v5052_v44 = vor.u32 %v7448_v32, %v5051_v31 }
  0x95   :  { %1825 = vmatpush.bf16.msrb.mxu0 %v5512_v43  ;;  %1838 = vmatpush.bf16.msrb.mxu1 %v5640_v47  ;;  %v5307_v39 = vld [vmem:[#allocation2 + $0x268] sm:$0xf]  ;;  %v7512_v41 = vld [vmem:[#allocation2 + $0x274] sm:$0xf0]  ;;  %v5180_v45 = vor.u32 %v7480_v36, %v5179_v33 }
  0x96   :  { %1851 = vmatpush.bf16.msrb.mxu2 %v5768_v48  ;;  %v5435_v42 = vld [vmem:[#allocation2 + $0x368] sm:$0xf]  ;;  %v7544_v43 = vld [vmem:[#allocation2 + $0x374] sm:$0xf0]  ;;  %v5308_v46 = vor.u32 %v7512_v41, %v5307_v39 }
  0x97   :  { %1864 = vmatpush.bf16.msrb.mxu3 %v5896_v51  ;;  %v5035_v47 = vld [vmem:[#allocation2 + $0x48] sm:$0xf]  ;;  %v7444_v48 = vld [vmem:[#allocation2 + $0x54] sm:$0xf0]  ;;  %v5436_v50 = vor.u32 %v7544_v43, %v5435_v42 }
  0x98   :  { %1826 = vmatmul.bf16.vlgmr.msrb.gmra.mxu0 %v8308_v37  ;;  %1839 = vmatmul.bf16.vlgmr.msrb.gmra.mxu1 %v8312_v40  ;;  %v5163_v49 = vld [vmem:[#allocation2 + $0x148] sm:$0xf]  ;;  %v7476_v51 = vld [vmem:[#allocation2 + $0x154] sm:$0xf0]  ;;  %v5036_v56 = vor.u32 %v7444_v48, %v5035_v47 }
  0x99   :  { %1870 = vmatpush.bf16.msra.mxu0 %v5116_v52  ;;  %1883 = vmatpush.bf16.msra.mxu1 %v5244_v53  ;;  %v5291_v52 = vld [vmem:[#allocation2 + $0x248] sm:$0xf]  ;;  %v7508_v53 = vld [vmem:[#allocation2 + $0x254] sm:$0xf0]  ;;  %v5164_v57 = vor.u32 %v7476_v51, %v5163_v49 }
  0x9a   :  { %1896 = vmatpush.bf16.msra.mxu2 %v5372_v54  ;;  %1865 = vmatmul.bf16.vlgmr.msrb.gmra.mxu3 %v8310_v38  ;;  %v5419_v54 = vld [vmem:[#allocation2 + $0x348] sm:$0xf]  ;;  %v7540_v55 = vld [vmem:[#allocation2 + $0x354] sm:$0xf0] }
  0x9b   :  { %1909 = vmatpush.bf16.msra.mxu3 %v5500_v58  ;;  %1852 = vmatmul.bf16.vlgmr.msrb.gmra.mxu2 %v8306_v34  ;;  %v5292_v58 = vor.u32 %v7508_v53, %v5291_v52  ;;  %v5019_v59 = vld [vmem:[#allocation2 + $0x28] sm:$0xf]  ;;  %v7440_v60 = vld [vmem:[#allocation2 + $0x34] sm:$0xf0]  ;;  %v5420_v62 = vor.u32 %v7540_v55, %v5419_v54 }
  0x9c   :  { %v5147_v61 = vld [vmem:[#allocation2 + $0x128] sm:$0xf]  ;;  %v7472_v63 = vld [vmem:[#allocation2 + $0x134] sm:$0xf0]  ;;  %v5020_v4 = vor.u32 %v7440_v60, %v5019_v59 }
  0x9d   :  { %1871 = vmatpush.bf16.msra.mxu0 %v5100_v0  ;;  %1884 = vmatpush.bf16.msra.mxu1 %v5228_v1  ;;  %v5275_v0 = vld [vmem:[#allocation2 + $0x228] sm:$0xf]  ;;  %v7504_v1 = vld [vmem:[#allocation2 + $0x234] sm:$0xf0]  ;;  %v5148_v7 = vor.u32 %v7472_v63, %v5147_v61 }
  0x9e   :  { %1897 = vmatpush.bf16.msra.mxu2 %v5356_v2  ;;  %v5403_v2 = vld [vmem:[#allocation2 + $0x328] sm:$0xf]  ;;  %v7536_v3 = vld [vmem:[#allocation2 + $0x334] sm:$0xf0]  ;;  %v5276_v10 = vor.u32 %v7504_v1, %v5275_v0 }
  0x9f   :  { %1910 = vmatpush.bf16.msra.mxu3 %v5484_v6  ;;  %v5003_v5 = vld [vmem:[#allocation2 + $0x8] sm:$0xf]  ;;  %v7436_v6 = vld [vmem:[#allocation2 + $0x14] sm:$0xf0] }
  0xa0   :  { %v5131_v11 = vld [vmem:[#allocation2 + $0x108] sm:$0xf]  ;;  %v7468_v12 = vld [vmem:[#allocation2 + $0x114] sm:$0xf0]  ;;  %v5004_v22 = vor.u32 %v7436_v6, %v5003_v5  ;;  %v8333_v6 = vld [vmem:[%s8522_s3] sm:$0xf] }
  0xa1   :  { %1872 = vmatpush.bf16.msra.mxu0 %v5084_v14  ;;  %1885 = vmatpush.bf16.msra.mxu1 %v5212_v16  ;;  %v5259_v13 = vld [vmem:[#allocation2 + $0x208] sm:$0xf]  ;;  %v5404_v14 = vor.u32 %v7536_v3, %v5403_v2  ;;  %v7500_v16 = vld [vmem:[#allocation2 + $0x214] sm:$0xf0]  ;;  %v5132_v27 = vor.u32 %v7468_v12, %v5131_v11 }
  0xa2   :  { %1898 = vmatpush.bf16.msra.mxu2 %v5340_v17  ;;  %v5387_v17 = vld [vmem:[#allocation2 + $0x308] sm:$0xf]  ;;  %v7532_v18 = vld [vmem:[#allocation2 + $0x314] sm:$0xf0] }
  0xa3   :  { %1911 = vmatpush.bf16.msra.mxu3 %v5468_v21  ;;  %v5627_v19 = vld [vmem:[#allocation2 + $0x4e8] sm:$0xf]  ;;  %v7592_v20 = vld [vmem:[#allocation2 + $0x4f4] sm:$0xf0]  ;;  %v5388_v31 = vor.u32 %v7532_v18, %v5387_v17  ;;  %v374_v18 = vperm.slane %v8333_v6, 0 }
  0xa4   :  { %v5755_v21 = vld [vmem:[#allocation2 + $0x5e8] sm:$0xf]  ;;  %v7624_v23 = vld [vmem:[#allocation2 + $0x5f4] sm:$0xf0]  ;;  %v5628_v32 = vor.u32 %v7592_v20, %v5627_v19 }
  0xa5   :  { %1873 = vmatpush.bf16.msra.mxu0 %v5068_v28  ;;  %1886 = vmatpush.bf16.msra.mxu1 %v5196_v29  ;;  %v5883_v24 = vld [vmem:[#allocation2 + $0x6e8] sm:$0xf]  ;;  %v7656_v26 = vld [vmem:[#allocation2 + $0x6f4] sm:$0xf0]  ;;  %v5260_v28 = vor.u32 %v7500_v16, %v5259_v13  ;;  %v5756_v33 = vor.u32 %v7624_v23, %v5755_v21 }
  0xa6   :  { %1899 = vmatpush.bf16.msra.mxu2 %v5324_v30  ;;  %v6011_v29 = vld [vmem:[#allocation2 + $0x7e8] sm:$0xf]  ;;  %v7688_v30 = vld [vmem:[#allocation2 + $0x7f4] sm:$0xf0] }
  0xa7   :  { %1912 = vmatpush.bf16.msra.mxu3 %v5452_v35  ;;  %v5884_v35 = vor.u32 %v7656_v26, %v5883_v24  ;;  %v5611_v36 = vld [vmem:[#allocation2 + $0x4c8] sm:$0xf]  ;;  %v7588_v39 = vld [vmem:[#allocation2 + $0x4d4] sm:$0xf0]  ;;  %v6012_v42 = vor.u32 %v7688_v30, %v6011_v29 }
  0xa8   :  { %v5739_v41 = vld [vmem:[#allocation2 + $0x5c8] sm:$0xf]  ;;  %v7620_v43 = vld [vmem:[#allocation2 + $0x5d4] sm:$0xf0]  ;;  %v5612_v48 = vor.u32 %v7588_v39, %v5611_v36 }
  0xa9   :  { %1874 = vmatpush.bf16.msra.mxu0 %v5052_v44  ;;  %1887 = vmatpush.bf16.msra.mxu1 %v5180_v45  ;;  %v5867_v44 = vld [vmem:[#allocation2 + $0x6c8] sm:$0xf]  ;;  %v7652_v45 = vld [vmem:[#allocation2 + $0x6d4] sm:$0xf0]  ;;  %v5740_v49 = vor.u32 %v7620_v43, %v5739_v41 }
  0xaa   :  { %1900 = vmatpush.bf16.msra.mxu2 %v5308_v46  ;;  %v5995_v46 = vld [vmem:[#allocation2 + $0x7c8] sm:$0xf]  ;;  %v7684_v47 = vld [vmem:[#allocation2 + $0x7d4] sm:$0xf0] }
  0xab   :  { %1913 = vmatpush.bf16.msra.mxu3 %v5436_v50  ;;  %v5868_v50 = vor.u32 %v7652_v45, %v5867_v44  ;;  %v5595_v51 = vld [vmem:[#allocation2 + $0x4a8] sm:$0xf]  ;;  %v7584_v52 = vld [vmem:[#allocation2 + $0x4b4] sm:$0xf0]  ;;  %v5996_v54 = vor.u32 %v7684_v47, %v5995_v46 }
  0xac   :  { %v5723_v53 = vld [vmem:[#allocation2 + $0x5a8] sm:$0xf]  ;;  %v7616_v55 = vld [vmem:[#allocation2 + $0x5b4] sm:$0xf0]  ;;  %v5596_v60 = vor.u32 %v7584_v52, %v5595_v51 }
  0xad   :  { %1875 = vmatpush.bf16.msra.mxu0 %v5036_v56  ;;  %1888 = vmatpush.bf16.msra.mxu1 %v5164_v57  ;;  %v5851_v56 = vld [vmem:[#allocation2 + $0x6a8] sm:$0xf]  ;;  %v7648_v57 = vld [vmem:[#allocation2 + $0x6b4] sm:$0xf0] }
  0xae   :  { %1901 = vmatpush.bf16.msra.mxu2 %v5292_v58  ;;  %v5979_v58 = vld [vmem:[#allocation2 + $0x7a8] sm:$0xf]  ;;  %v7680_v59 = vld [vmem:[#allocation2 + $0x7b4] sm:$0xf0]  ;;  %v5852_v63 = vor.u32 %v7648_v57, %v5851_v56 }
  0xaf   :  { %1914 = vmatpush.bf16.msra.mxu3 %v5420_v62  ;;  %v5579_v61 = vld [vmem:[#allocation2 + $0x488] sm:$0xf]  ;;  %v5724_v62 = vor.u32 %v7616_v55, %v5723_v53  ;;  %v7580_v0 = vld [vmem:[#allocation2 + $0x494] sm:$0xf0]  ;;  %v5980_v3 = vor.u32 %v7680_v59, %v5979_v58 }
  0xb0   :  { %v5707_v1 = vld [vmem:[#allocation2 + $0x588] sm:$0xf]  ;;  %v7612_v2 = vld [vmem:[#allocation2 + $0x594] sm:$0xf0]  ;;  %v5580_v11 = vor.u32 %v7580_v0, %v5579_v61 }
  0xb1   :  { %1876 = vmatpush.bf16.msra.mxu0 %v5020_v4  ;;  %1889 = vmatpush.bf16.msra.mxu1 %v5148_v7  ;;  %v5835_v4 = vld [vmem:[#allocation2 + $0x688] sm:$0xf]  ;;  %v7644_v5 = vld [vmem:[#allocation2 + $0x694] sm:$0xf0]  ;;  %v5708_v13 = vor.u32 %v7612_v2, %v5707_v1 }
  0xb2   :  { %1902 = vmatpush.bf16.msra.mxu2 %v5276_v10  ;;  %v5963_v7 = vld [vmem:[#allocation2 + $0x788] sm:$0xf]  ;;  %v7676_v10 = vld [vmem:[#allocation2 + $0x794] sm:$0xf0] }
  0xb3   :  { %1915 = vmatpush.bf16.msra.mxu3 %v5404_v14  ;;  %v5563_v12 = vld [vmem:[#allocation2 + $0x468] sm:$0xf]  ;;  %v5836_v14 = vor.u32 %v7644_v5, %v5835_v4  ;;  %v7576_v16 = vld [vmem:[#allocation2 + $0x474] sm:$0xf0]  ;;  %v5964_v19 = vor.u32 %v7676_v10, %v5963_v7 }
  0xb4   :  { %v5691_v17 = vld [vmem:[#allocation2 + $0x568] sm:$0xf]  ;;  %v7608_v20 = vld [vmem:[#allocation2 + $0x574] sm:$0xf0]  ;;  %v5564_v26 = vor.u32 %v7576_v16, %v5563_v12  ;;  %v1684_v45 = vpop.f32.mrf.mxu1  ;;  %v5117_v16 = vld [vmem:[#allocation2 + $0xf8] sm:$0xf0] }
  0xb5   :  { %1877 = vmatpush.bf16.msra.mxu0 %v5004_v22  ;;  %1890 = vmatpush.bf16.msra.mxu1 %v5132_v27  ;;  %v5819_v21 = vld [vmem:[#allocation2 + $0x668] sm:$0xf]  ;;  %v7640_v22 = vld [vmem:[#allocation2 + $0x674] sm:$0xf0] }
  0xb6   :  { %1903 = vmatpush.bf16.msra.mxu2 %v5260_v28  ;;  %v5947_v23 = vld [vmem:[#allocation2 + $0x768] sm:$0xf]  ;;  %v7672_v24 = vld [vmem:[#allocation2 + $0x774] sm:$0xf0]  ;;  %v5692_v28 = vor.u32 %v7608_v20, %v5691_v17  ;;  %v5820_v29 = vor.u32 %v7640_v22, %v5819_v21  ;;  %v7494_v17 = vld [vmem:[#allocation2 + $0x1ec] sm:$0xf] }
  0xb7   :  { %1916 = vmatpush.bf16.msra.mxu3 %v5388_v31  ;;  %v5547_v30 = vld [vmem:[#allocation2 + $0x448] sm:$0xf]  ;;  %v7572_v31 = vld [vmem:[#allocation2 + $0x454] sm:$0xf0]  ;;  %v7526_v20 = vld [vmem:[#allocation2 + $0x2ec] sm:$0xf] }
  0xb8   :  { %1878 = vmatmul.bf16.vlgmr.msra.gmra.mxu0 %v8278_v9  ;;  %1891 = vmatmul.bf16.vlgmr.msra.gmra.mxu1 %v8291_v25  ;;  %v7604_v36 = vld [vmem:[#allocation2 + $0x554] sm:$0xf0]  ;;  %v5803_v39 = vld [vmem:[#allocation2 + $0x648] sm:$0xf]  ;;  %v5548_v44 = vor.u32 %v7572_v31, %v5547_v30  ;;  %v5373_v21 = vld [vmem:[#allocation2 + $0x2f8] sm:$0xf0] }
  0xb9   :  { %1922 = vmatpush.bf16.msrb.mxu0 %v5628_v32  ;;  %1935 = vmatpush.bf16.msrb.mxu1 %v5756_v33  ;;  %v5675_v32 = vld [vmem:[#allocation2 + $0x548] sm:$0xf]  ;;  %v7636_v41 = vld [vmem:[#allocation2 + $0x654] sm:$0xf0] }
  0xba   :  { %1948 = vmatpush.bf16.msrb.mxu2 %v5884_v35  ;;  %1917 = vmatmul.bf16.vlgmr.msra.gmra.mxu3 %v8283_v15  ;;  %v5948_v35 = vor.u32 %v7672_v24, %v5947_v23  ;;  %v7668_v43 = vld [vmem:[#allocation2 + $0x754] sm:$0xf0]  ;;  %v5676_v46 = vor.u32 %v7604_v36, %v5675_v32  ;;  %v5804_v47 = vor.u32 %v7636_v41, %v5803_v39  ;;  %v5915_v57 = vld [vmem:[#allocation2 + $0x728] sm:$0xf]  ;;  %v7490_v36 = vld [vmem:[#allocation2 + $0x1cc] sm:$0xf] }
  0xbb   :  { %1961 = vmatpush.bf16.msrb.mxu3 %v6012_v42  ;;  %1904 = vmatmul.bf16.vlgmr.msra.gmra.mxu2 %v8276_v8  ;;  %v5931_v42 = vld [vmem:[#allocation2 + $0x748] sm:$0xf]  ;;  %v7600_v53 = vld [vmem:[#allocation2 + $0x534] sm:$0xf0]  ;;  %v5376_v32 = vor.u32 %v7526_v20, %v5373_v21 }
  0xbc   :  { %v5932_v52 = vor.u32 %v7668_v43, %v5931_v42  ;;  %v7632_v55 = vld [vmem:[#allocation2 + $0x634] sm:$0xf0]  ;;  %v5771_v5 = vld [vmem:[#allocation2 + $0x608] sm:$0xf]  ;;  %v1686_v22 = vpop.f32.mrf.mxu1  ;;  %v5229_v42 = vld [vmem:[#allocation2 + $0x1d8] sm:$0xf0] }
  0xbd   :  { %1923 = vmatpush.bf16.msrb.mxu0 %v5612_v48  ;;  %1936 = vmatpush.bf16.msrb.mxu1 %v5740_v49  ;;  %v5531_v48 = vld [vmem:[#allocation2 + $0x428] sm:$0xf]  ;;  %v7568_v49 = vld [vmem:[#allocation2 + $0x434] sm:$0xf0]  ;;  %v7522_v43 = vld [vmem:[#allocation2 + $0x2cc] sm:$0xf] }
  0xbe   :  { %1949 = vmatpush.bf16.msrb.mxu2 %v5868_v50  ;;  %v5659_v50 = vld [vmem:[#allocation2 + $0x528] sm:$0xf]  ;;  %v7664_v58 = vld [vmem:[#allocation2 + $0x734] sm:$0xf0]  ;;  %v5532_v61 = vor.u32 %v7568_v49, %v5531_v48  ;;  %v5232_v48 = vor.u32 %v7490_v36, %v5229_v42  ;;  %v5181_v22 = vld [vmem:[#allocation2 + $0x178] sm:$0xf0] }
  0xbf   :  { %1962 = vmatpush.bf16.msrb.mxu3 %v5996_v54  ;;  %v5787_v54 = vld [vmem:[#allocation2 + $0x628] sm:$0xf]  ;;  %v5660_v1 = vor.u32 %v7600_v53, %v5659_v50  ;;  %v7596_v4 = vld [vmem:[#allocation2 + $0x514] sm:$0xf0]  ;;  %v5916_v10 = vor.u32 %v7664_v58, %v5915_v57  ;;  %v7454_v50 = vld [vmem:[#allocation2 + $0xac] sm:$0xf] }
  0xc0   :  { %v5788_v2 = vor.u32 %v7632_v55, %v5787_v54  ;;  %v5899_v12 = vld [vmem:[#allocation2 + $0x708] sm:$0xf]  ;;  %v5213_v54 = vld [vmem:[#allocation2 + $0x1b8] sm:$0xf0]  ;;  %v7518_v55 = vld [vmem:[#allocation2 + $0x2ac] sm:$0xf] }
  0xc1   :  { %1924 = vmatpush.bf16.msrb.mxu0 %v5596_v60  ;;  %1937 = vmatpush.bf16.msrb.mxu1 %v5724_v62  ;;  %v1671_v27 = vpop.f32.mrf.mxu0  ;;  %v1710_v60 = vpop.f32.mrf.mxu3  ;;  %v5515_v62 = vld [vmem:[#allocation2 + $0x408] sm:$0xf]  ;;  %v7550_v57 = vld [vmem:[#allocation2 + $0x3ac] sm:$0xf]  ;;  %v5469_v58 = vld [vmem:[#allocation2 + $0x3b8] sm:$0xf0] }
  0xc2   :  { %1950 = vmatpush.bf16.msrb.mxu2 %v5852_v63  ;;  %v1672_v33 = vadd.f32 %v1671_v27, %v374_v18  ;;  %v7564_v63 = vld [vmem:[#allocation2 + $0x414] sm:$0xf0]  ;;  %v5501_v27 = vld [vmem:[#allocation2 + $0x3f8] sm:$0xf0] }
  0xc3   :  { %1963 = vmatpush.bf16.msrb.mxu3 %v5980_v3  ;;  %v5643_v3 = vld [vmem:[#allocation2 + $0x508] sm:$0xf]  ;;  %v5516_v18 = vor.u32 %v7564_v63, %v5515_v62  ;;  %v7450_v62 = vld [vmem:[#allocation2 + $0x8c] sm:$0xf]  ;;  %v5069_v63 = vld [vmem:[#allocation2 + $0x98] sm:$0xf0] }
  0xc4   :  { %v1685_v51 = vadd.f32 %v1684_v45, %v1672_v33  ;;  %v5644_v23 = vor.u32 %v7596_v4, %v5643_v3  ;;  %v7458_v33 = vld [vmem:[#allocation2 + $0xcc] sm:$0xf]  ;;  %v5325_v4 = vld [vmem:[#allocation2 + $0x298] sm:$0xf0] }
  0xc5   :  { %1925 = vmatpush.bf16.msrb.mxu0 %v5580_v11  ;;  %1938 = vmatpush.bf16.msrb.mxu1 %v5708_v13  ;;  %v7628_v11 = vld [vmem:[#allocation2 + $0x614] sm:$0xf0]  ;;  %v7554_v45 = vld [vmem:[#allocation2 + $0x3cc] sm:$0xf]  ;;  %v5293_v42 = vld [vmem:[#allocation2 + $0x258] sm:$0xf0] }
  0xc6   :  { %1951 = vmatpush.bf16.msrb.mxu2 %v5836_v14  ;;  %v1697_v56 = vpop.f32.mrf.mxu2  ;;  %v7660_v13 = vld [vmem:[#allocation2 + $0x714] sm:$0xf0]  ;;  %v7462_v14 = vld [vmem:[#allocation2 + $0xec] sm:$0xf]  ;;  %v5772_v24 = vor.u32 %v7628_v11, %v5771_v5  ;;  %v5072_v11 = vor.u32 %v7450_v62, %v5069_v63 }
  0xc7   :  { %1964 = vmatpush.bf16.msrb.mxu3 %v5964_v19  ;;  %v1698_v59 = vadd.f32 %v1697_v56, %v1685_v51  ;;  %v5245_v19 = vld [vmem:[#allocation2 + $0x1f8] sm:$0xf0]  ;;  %v7514_v3 = vld [vmem:[#allocation2 + $0x28c] sm:$0xf] }
  0xc8   :  { %v5248_v31 = vor.u32 %v7494_v17, %v5245_v19  ;;  %v5085_v51 = vld [vmem:[#allocation2 + $0xb8] sm:$0xf0]  ;;  %v7546_v5 = vld [vmem:[#allocation2 + $0x38c] sm:$0xf] }
  0xc9   :  { %1926 = vmatpush.bf16.msrb.mxu0 %v5564_v26  ;;  %1939 = vmatpush.bf16.msrb.mxu1 %v5692_v28  ;;  %v1673_v0 = vpop.f32.mrf.mxu0  ;;  %v8336_v7 = vadd.f32 %v1710_v60, %v1698_v59  ;;  %v7558_v26 = vld [vmem:[#allocation2 + $0x3ec] sm:$0xf]  ;;  %v5900_v28 = vor.u32 %v7660_v13, %v5899_v12  ;;  %v1712_v39 = vpop.f32.mrf.mxu3  ;;  %v5341_v56 = vld [vmem:[#allocation2 + $0x2b8] sm:$0xf0]  ;;  %v5088_v59 = vor.u32 %v7454_v50, %v5085_v51 }
  0xca   :  { %1952 = vmatpush.bf16.msrb.mxu2 %v5820_v29  ;;  %v5120_v29 = vor.u32 %v7462_v14, %v5117_v16  ;;  %v5504_v41 = vor.u32 %v7558_v26, %v5501_v27  ;;  %v7482_v0 = vld [vmem:[#allocation2 + $0x18c] sm:$0xf]  ;;  %v5328_v14 = vor.u32 %v7514_v3, %v5325_v4  ;;  %v5053_v17 = vld [vmem:[#allocation2 + $0x78] sm:$0xf0] }
  0xcb   :  { %1965 = vmatpush.bf16.msrb.mxu3 %v5948_v35  ;;  %v5101_v35 = vld [vmem:[#allocation2 + $0xd8] sm:$0xf0]  ;;  %v7446_v16 = vld [vmem:[#allocation2 + $0x6c] sm:$0xf] }
  0xcc   :  { %v7542_v26 = vld [vmem:[#allocation2 + $0x36c] sm:$0xf]  ;;  %v5437_v27 = vld [vmem:[#allocation2 + $0x378] sm:$0xf0] }
  0xcd   :  { %1927 = vmatpush.bf16.msrb.mxu0 %v5548_v44  ;;  %1940 = vmatpush.bf16.msrb.mxu1 %v5676_v46  ;;  %v5357_v44 = vld [vmem:[#allocation2 + $0x2d8] sm:$0xf0]  ;;  %v7434_v63 = vld [vmem:[#allocation2 + $0xc] sm:$0xf] }
  0xce   :  { %1953 = vmatpush.bf16.msrb.mxu2 %v5804_v47  ;;  %v1699_v30 = vpop.f32.mrf.mxu2  ;;  %v5485_v46 = vld [vmem:[#allocation2 + $0x3d8] sm:$0xf0]  ;;  %v5104_v47 = vor.u32 %v7458_v33, %v5101_v35  ;;  %v5360_v49 = vor.u32 %v7522_v43, %v5357_v44  ;;  %v7474_v35 = vld [vmem:[#allocation2 + $0x14c] sm:$0xf] }
  0xcf   :  { %1966 = vmatpush.bf16.msrb.mxu3 %v5932_v52  ;;  %v7486_v52 = vld [vmem:[#allocation2 + $0x1ac] sm:$0xf]  ;;  %v5488_v53 = vor.u32 %v7554_v45, %v5485_v46  ;;  %v5037_v33 = vld [vmem:[#allocation2 + $0x58] sm:$0xf0] }
  0xd0   :  { %v5216_v60 = vor.u32 %v7486_v52, %v5213_v54  ;;  %v5165_v39 = vld [vmem:[#allocation2 + $0x158] sm:$0xf0]  ;;  %v7538_v45 = vld [vmem:[#allocation2 + $0x34c] sm:$0xf] }
  0xd1   :  { %1928 = vmatpush.bf16.msrb.mxu0 %v5532_v61  ;;  %1941 = vmatpush.bf16.msrb.mxu1 %v5660_v1  ;;  %v5344_v61 = vor.u32 %v7518_v55, %v5341_v56  ;;  %v5472_v1 = vor.u32 %v7550_v57, %v5469_v58  ;;  %v5421_v46 = vld [vmem:[#allocation2 + $0x358] sm:$0xf0]  ;;  %v5168_v50 = vor.u32 %v7474_v35, %v5165_v39  ;;  %v7438_v52 = vld [vmem:[#allocation2 + $0x2c] sm:$0xf] }
  0xd2   :  { %1954 = vmatpush.bf16.msrb.mxu2 %v5788_v2  ;;  %v5197_v2 = vld [vmem:[#allocation2 + $0x198] sm:$0xf0]  ;;  %v7470_v54 = vld [vmem:[#allocation2 + $0x12c] sm:$0xf]  ;;  %v5424_v56 = vor.u32 %v7538_v45, %v5421_v46 }
  0xd3   :  { %1967 = vmatpush.bf16.msrb.mxu3 %v5916_v10  ;;  %v5453_v10 = vld [vmem:[#allocation2 + $0x398] sm:$0xf0]  ;;  %v5200_v13 = vor.u32 %v7482_v0, %v5197_v2  ;;  %v7502_v58 = vld [vmem:[#allocation2 + $0x22c] sm:$0xf] }
  0xd4   :  { %v5456_v21 = vor.u32 %v7546_v5, %v5453_v10  ;;  %v5149_v57 = vld [vmem:[#allocation2 + $0x138] sm:$0xf0]  ;;  %v7466_v3 = vld [vmem:[#allocation2 + $0x10c] sm:$0xf] }
  0xd5   :  { %1929 = vmatpush.bf16.msrb.mxu0 %v5516_v18  ;;  %1942 = vmatpush.bf16.msrb.mxu1 %v5644_v23  ;;  %v1723_v12 = vpop.f32.mrf.mxu0  ;;  %v7478_v18 = vld [vmem:[#allocation2 + $0x16c] sm:$0xf]  ;;  %v1736_v20 = vpop.f32.mrf.mxu1  ;;  %v5005_v0 = vld [vmem:[#allocation2 + $0x18] sm:$0xf0] }
  0xd6   :  { %1955 = vmatpush.bf16.msrb.mxu2 %v5772_v24  ;;  %v1724_v19 = vadd.f32 %v1723_v12, %v8336_v7  ;;  %v7510_v23 = vld [vmem:[#allocation2 + $0x26c] sm:$0xf]  ;;  %v5309_v24 = vld [vmem:[#allocation2 + $0x278] sm:$0xf0]  ;;  %v5184_v30 = vor.u32 %v7478_v18, %v5181_v22  ;;  %v5440_v7 = vor.u32 %v7542_v26, %v5437_v27 }
  0xd7   :  { %1968 = vmatpush.bf16.msrb.mxu3 %v5900_v28  ;;  %v5133_v4 = vld [vmem:[#allocation2 + $0x118] sm:$0xf0]  ;;  %v7498_v5 = vld [vmem:[#allocation2 + $0x20c] sm:$0xf] }
  0xd8   :  { %1930 = vmatmul.bf16.vlgmr.msrb.gmra.mxu0 %v8308_v37  ;;  %1943 = vmatmul.bf16.vlgmr.msrb.gmra.mxu1 %v8312_v40  ;;  %v1737_v28 = vadd.f32 %v1736_v20, %v1724_v19  ;;  %v5261_v12 = vld [vmem:[#allocation2 + $0x218] sm:$0xf0]  ;;  %v7622_v19 = vld [vmem:[#allocation2 + $0x5ec] sm:$0xf]  ;;  %v5008_v20 = vor.u32 %v7434_v63, %v5005_v0 }
  0xd9   :  { %1974 = vmatpush.bf16.msra.mxu0 %v5120_v29  ;;  %1987 = vmatpush.bf16.msra.mxu1 %v5248_v31  ;;  %v5056_v29 = vor.u32 %v7446_v16, %v5053_v17  ;;  %v5312_v31 = vor.u32 %v7510_v23, %v5309_v24  ;;  %v7590_v17 = vld [vmem:[#allocation2 + $0x4ec] sm:$0xf]  ;;  %v5629_v18 = vld [vmem:[#allocation2 + $0x4f8] sm:$0xf0]  ;;  %v5136_v24 = vor.u32 %v7466_v3, %v5133_v4 }
  0xda   :  { %2000 = vmatpush.bf16.msra.mxu2 %v5376_v32  ;;  %1969 = vmatmul.bf16.vlgmr.msrb.gmra.mxu3 %v8310_v38  ;;  %v7442_v32 = vld [vmem:[#allocation2 + $0x4c] sm:$0xf]  ;;  %v5885_v23 = vld [vmem:[#allocation2 + $0x6f8] sm:$0xf0]  ;;  %v5264_v26 = vor.u32 %v7498_v5, %v5261_v12 }
  0xdb   :  { %2013 = vmatpush.bf16.msra.mxu3 %v5504_v41  ;;  %1956 = vmatmul.bf16.vlgmr.msrb.gmra.mxu2 %v8306_v34  ;;  %v7506_v41 = vld [vmem:[#allocation2 + $0x24c] sm:$0xf]  ;;  %v5613_v35 = vld [vmem:[#allocation2 + $0x4d8] sm:$0xf0] }
  0xdc   :  { %v5296_v51 = vor.u32 %v7506_v41, %v5293_v42  ;;  %v7654_v22 = vld [vmem:[#allocation2 + $0x6ec] sm:$0xf]  ;;  %v5741_v39 = vld [vmem:[#allocation2 + $0x5d8] sm:$0xf0] }
  0xdd   :  { %1975 = vmatpush.bf16.msra.mxu0 %v5104_v47  ;;  %1988 = vmatpush.bf16.msra.mxu1 %v5232_v48  ;;  %v1762_v44 = vpop.f32.mrf.mxu3  ;;  %v5040_v47 = vor.u32 %v7442_v32, %v5037_v33  ;;  %v1738_v55 = vpop.f32.mrf.mxu1  ;;  %v7686_v27 = vld [vmem:[#allocation2 + $0x7ec] sm:$0xf]  ;;  %v5888_v32 = vor.u32 %v7654_v22, %v5885_v23  ;;  %v5869_v42 = vld [vmem:[#allocation2 + $0x6d8] sm:$0xf0] }
  0xde   :  { %2001 = vmatpush.bf16.msra.mxu2 %v5360_v49  ;;  %v1749_v36 = vpop.f32.mrf.mxu2  ;;  %v1725_v49 = vpop.f32.mrf.mxu0  ;;  %v7586_v33 = vld [vmem:[#allocation2 + $0x4cc] sm:$0xf]  ;;  %v5853_v55 = vld [vmem:[#allocation2 + $0x6b8] sm:$0xf0] }
  0xdf   :  { %2014 = vmatpush.bf16.msra.mxu3 %v5488_v53  ;;  %v1750_v43 = vadd.f32 %v1749_v36, %v1737_v28  ;;  %v5021_v53 = vld [vmem:[#allocation2 + $0x38] sm:$0xf0]  ;;  %v7618_v36 = vld [vmem:[#allocation2 + $0x5cc] sm:$0xf]  ;;  %v5616_v45 = vor.u32 %v7586_v33, %v5613_v35 }
  0xe0   :  { %v5024_v62 = vor.u32 %v7438_v52, %v5021_v53  ;;  %v6013_v28 = vld [vmem:[#allocation2 + $0x7f8] sm:$0xf0]  ;;  %v7650_v41 = vld [vmem:[#allocation2 + $0x6cc] sm:$0xf]  ;;  %v5744_v46 = vor.u32 %v7618_v36, %v5741_v39 }
  0xe1   :  { %1976 = vmatpush.bf16.msra.mxu0 %v5088_v59  ;;  %1989 = vmatpush.bf16.msra.mxu1 %v5216_v60  ;;  %v8343_v48 = vadd.f32 %v1762_v44, %v1750_v43  ;;  %v5277_v59 = vld [vmem:[#allocation2 + $0x238] sm:$0xf0]  ;;  %v7534_v60 = vld [vmem:[#allocation2 + $0x32c] sm:$0xf] }
  0xe2   :  { %2002 = vmatpush.bf16.msra.mxu2 %v5344_v61  ;;  %v5405_v61 = vld [vmem:[#allocation2 + $0x338] sm:$0xf0]  ;;  %v5280_v2 = vor.u32 %v7502_v58, %v5277_v59  ;;  %v7682_v43 = vld [vmem:[#allocation2 + $0x7cc] sm:$0xf] }
  0xe3   :  { %2015 = vmatpush.bf16.msra.mxu3 %v5472_v1  ;;  %v5152_v1 = vor.u32 %v7470_v54, %v5149_v57  ;;  %v5997_v44 = vld [vmem:[#allocation2 + $0x7d8] sm:$0xf0]  ;;  %v7582_v49 = vld [vmem:[#allocation2 + $0x4ac] sm:$0xf] }
  0xe4   :  { %v6000_v52 = vor.u32 %v7682_v43, %v5997_v44  ;;  %v5725_v53 = vld [vmem:[#allocation2 + $0x5b8] sm:$0xf0]  ;;  %v7646_v54 = vld [vmem:[#allocation2 + $0x6ac] sm:$0xf] }
  0xe5   :  { %1977 = vmatpush.bf16.msra.mxu0 %v5072_v11  ;;  %1990 = vmatpush.bf16.msra.mxu1 %v5200_v13  ;;  %v5408_v11 = vor.u32 %v7534_v60, %v5405_v61  ;;  %v7530_v13 = vld [vmem:[#allocation2 + $0x30c] sm:$0xf]  ;;  %v1764_v16 = vpop.f32.mrf.mxu3  ;;  %v5981_v57 = vld [vmem:[#allocation2 + $0x7b8] sm:$0xf0]  ;;  %v5856_v60 = vor.u32 %v7646_v54, %v5853_v55  ;;  %v375_v54 = vperm.slane %v8333_v6, 1 }
  0xe6   :  { %2003 = vmatpush.bf16.msra.mxu2 %v5328_v14  ;;  %v1751_v10 = vpop.f32.mrf.mxu2  ;;  %v5389_v14 = vld [vmem:[#allocation2 + $0x318] sm:$0xf0]  ;;  %v7578_v61 = vld [vmem:[#allocation2 + $0x48c] sm:$0xf]  ;;  %v7704_v6 = vld [vmem:[#allocation4 + $0x74] sm:$0xf0] }
  0xe7   :  { %2016 = vmatpush.bf16.msra.mxu3 %v5456_v21  ;;  %v5757_v21 = vld [vmem:[#allocation2 + $0x5f8] sm:$0xf0]  ;;  %v7674_v3 = vld [vmem:[#allocation2 + $0x78c] sm:$0xf] }
  0xe8   :  { %v5709_v0 = vld [vmem:[#allocation2 + $0x598] sm:$0xf0]  ;;  %v7574_v10 = vld [vmem:[#allocation2 + $0x46c] sm:$0xf] }
  0xe9   :  { %1978 = vmatpush.bf16.msra.mxu0 %v5056_v29  ;;  %1991 = vmatpush.bf16.msra.mxu1 %v5184_v30  ;;  %v5392_v29 = vor.u32 %v7530_v13, %v5389_v14  ;;  %v5632_v30 = vor.u32 %v7590_v17, %v5629_v18  ;;  %v7606_v12 = vld [vmem:[#allocation2 + $0x56c] sm:$0xf]  ;;  %v5693_v16 = vld [vmem:[#allocation2 + $0x578] sm:$0xf0] }
  0xea   :  { %2004 = vmatpush.bf16.msra.mxu2 %v5312_v31  ;;  %v5760_v31 = vor.u32 %v7622_v19, %v5757_v21  ;;  %v7638_v17 = vld [vmem:[#allocation2 + $0x66c] sm:$0xf]  ;;  %v5821_v18 = vld [vmem:[#allocation2 + $0x678] sm:$0xf0]  ;;  %v5696_v22 = vor.u32 %v7606_v12, %v5693_v16 }
  0xeb   :  { %2017 = vmatpush.bf16.msra.mxu3 %v5440_v7  ;;  %v6016_v7 = vor.u32 %v7686_v27, %v6013_v28  ;;  %v7670_v19 = vld [vmem:[#allocation2 + $0x76c] sm:$0xf]  ;;  %v5824_v23 = vor.u32 %v7638_v17, %v5821_v18  ;;  %v5933_v36 = vld [vmem:[#allocation2 + $0x758] sm:$0xf0] }
  0xec   :  { %v7602_v27 = vld [vmem:[#allocation2 + $0x54c] sm:$0xf]  ;;  %v5533_v44 = vld [vmem:[#allocation2 + $0x438] sm:$0xf0] }
  0xed   :  { %1979 = vmatpush.bf16.msra.mxu0 %v5040_v47  ;;  %1992 = vmatpush.bf16.msra.mxu1 %v5168_v50  ;;  %v5872_v47 = vor.u32 %v7650_v41, %v5869_v42  ;;  %v5597_v50 = vld [vmem:[#allocation2 + $0x4b8] sm:$0xf0]  ;;  %v7666_v35 = vld [vmem:[#allocation2 + $0x74c] sm:$0xf] }
  0xee   :  { %2005 = vmatpush.bf16.msra.mxu2 %v5296_v51  ;;  %v7614_v51 = vld [vmem:[#allocation2 + $0x5ac] sm:$0xf]  ;;  %v5600_v58 = vor.u32 %v7582_v49, %v5597_v50  ;;  %v5661_v49 = vld [vmem:[#allocation2 + $0x538] sm:$0xf0] }
  0xef   :  { %2018 = vmatpush.bf16.msra.mxu3 %v5424_v56  ;;  %v7678_v56 = vld [vmem:[#allocation2 + $0x7ac] sm:$0xf]  ;;  %v5728_v59 = vor.u32 %v7614_v51, %v5725_v53  ;;  %v5789_v51 = vld [vmem:[#allocation2 + $0x638] sm:$0xf0] }
  0xf0   :  { %v5984_v63 = vor.u32 %v7678_v56, %v5981_v57  ;;  %v7566_v43 = vld [vmem:[#allocation2 + $0x42c] sm:$0xf]  ;;  %v5917_v53 = vld [vmem:[#allocation2 + $0x738] sm:$0xf0] }
  0xf1   :  { %1980 = vmatpush.bf16.msra.mxu0 %v5024_v62  ;;  %1993 = vmatpush.bf16.msra.mxu1 %v5152_v1  ;;  %v5581_v62 = vld [vmem:[#allocation2 + $0x498] sm:$0xf0]  ;;  %v7642_v1 = vld [vmem:[#allocation2 + $0x68c] sm:$0xf]  ;;  %v5536_v55 = vor.u32 %v7566_v43, %v5533_v44  ;;  %v6043_v43 = vld [vmem:[#allocation4 + $0x30] sm:$0xf] }
  0xf2   :  { %2006 = vmatpush.bf16.msra.mxu2 %v5280_v2  ;;  %v5837_v2 = vld [vmem:[#allocation2 + $0x698] sm:$0xf0]  ;;  %v7630_v50 = vld [vmem:[#allocation2 + $0x62c] sm:$0xf]  ;;  %v6107_v44 = vld [vmem:[#allocation4 + $0xb0] sm:$0xf] }
  0xf3   :  { %2019 = vmatpush.bf16.msra.mxu3 %v5408_v11  ;;  %v5840_v5 = vor.u32 %v7642_v1, %v5837_v2  ;;  %v5565_v11 = vld [vmem:[#allocation2 + $0x478] sm:$0xf0]  ;;  %v7562_v56 = vld [vmem:[#allocation2 + $0x40c] sm:$0xf] }
  0xf4   :  { %v5568_v21 = vor.u32 %v7574_v10, %v5565_v11  ;;  %v7658_v1 = vld [vmem:[#allocation2 + $0x70c] sm:$0xf]  ;;  %v7720_v10 = vld [vmem:[#allocation4 + $0xf4] sm:$0xf0] }
  0xf5   :  { %1981 = vmatpush.bf16.msra.mxu0 %v5008_v20  ;;  %1994 = vmatpush.bf16.msra.mxu1 %v5136_v24  ;;  %v8349_v4 = vpop.f32.mrf.mxu0  ;;  %v8351_v13 = vpop.f32.mrf.mxu1  ;;  %v5949_v20 = vld [vmem:[#allocation2 + $0x778] sm:$0xf0]  ;;  %v7570_v24 = vld [vmem:[#allocation2 + $0x44c] sm:$0xf] }
  0xf6   :  { %2007 = vmatpush.bf16.msra.mxu2 %v5264_v26  ;;  %v5549_v26 = vld [vmem:[#allocation2 + $0x458] sm:$0xf0] }
  0xf7   :  { %2020 = vmatpush.bf16.msra.mxu3 %v5392_v29  ;;  %v5952_v29 = vor.u32 %v7670_v19, %v5949_v20  ;;  %v6067_v19 = vld [vmem:[#allocation4 + $0x60] sm:$0xf]  ;;  %v7702_v20 = vld [vmem:[#allocation4 + $0x64] sm:$0xf0] }
  0xf8   :  { %1982 = vmatmul.bf16.vlgmr.msra.gmra.mxu0 %v8278_v9  ;;  %1995 = vmatmul.bf16.vlgmr.msra.gmra.mxu1 %v8291_v25  ;;  %v5965_v9 = vld [vmem:[#allocation2 + $0x798] sm:$0xf0] }
  0xf9   :  { %2026 = vmatpush.bf16.msrb.mxu0 %v5632_v30  ;;  %2039 = vmatpush.bf16.msrb.mxu1 %v5760_v31  ;;  %v5968_v14 = vor.u32 %v7674_v3, %v5965_v9  ;;  %v5677_v30 = vld [vmem:[#allocation2 + $0x558] sm:$0xf0]  ;;  %v7634_v31 = vld [vmem:[#allocation2 + $0x64c] sm:$0xf]  ;;  %v6075_v9 = vld [vmem:[#allocation4 + $0x70] sm:$0xf] }
  0xfa   :  { %2052 = vmatpush.bf16.msrb.mxu2 %v5888_v32  ;;  %2021 = vmatmul.bf16.vlgmr.msra.gmra.mxu3 %v8283_v15  ;;  %v5584_v15 = vor.u32 %v7578_v61, %v5581_v62  ;;  %v5805_v32 = vld [vmem:[#allocation2 + $0x658] sm:$0xf0]  ;;  %v5680_v41 = vor.u32 %v7602_v27, %v5677_v30  ;;  %v6076_v16 = vor.u32 %v7704_v6, %v6075_v9  ;;  %v7700_v27 = vld [vmem:[#allocation4 + $0x54] sm:$0xf0]  ;;  %v6091_v9 = vld [vmem:[#allocation4 + $0x90] sm:$0xf] }
  0xfb   :  { %2065 = vmatpush.bf16.msrb.mxu3 %v6016_v7  ;;  %2008 = vmatmul.bf16.vlgmr.msra.gmra.mxu2 %v8276_v8  ;;  %v7610_v8 = vld [vmem:[#allocation2 + $0x58c] sm:$0xf]  ;;  %v5552_v7 = vor.u32 %v7570_v24, %v5549_v26  ;;  %v5808_v42 = vor.u32 %v7634_v31, %v5805_v32  ;;  %v5645_v61 = vld [vmem:[#allocation2 + $0x518] sm:$0xf0]  ;;  %v6059_v26 = vld [vmem:[#allocation4 + $0x50] sm:$0xf] }
  0xfc   :  { %v5712_v25 = vor.u32 %v7610_v8, %v5709_v0  ;;  %v5773_v0 = vld [vmem:[#allocation2 + $0x618] sm:$0xf0]  ;;  %v6060_v30 = vor.u32 %v7700_v27, %v6059_v26  ;;  %v7719_v26 = vld [vmem:[#allocation4 + $0xf4] sm:$0xf] }
  0xfd   :  { %2027 = vmatpush.bf16.msrb.mxu0 %v5616_v45  ;;  %2040 = vmatpush.bf16.msrb.mxu1 %v5744_v46  ;;  %v8355_v33 = vpop.f32.mrf.mxu3  ;;  %v1777_v39 = vpop.f32.mrf.mxu0  ;;  %v7598_v45 = vld [vmem:[#allocation2 + $0x52c] sm:$0xf]  ;;  %v5901_v3 = vld [vmem:[#allocation2 + $0x718] sm:$0xf0] }
  0xfe   :  { %2053 = vmatpush.bf16.msrb.mxu2 %v5872_v47  ;;  %v8353_v28 = vpop.f32.mrf.mxu2  ;;  %v1790_v46 = vpop.f32.mrf.mxu1  ;;  %v5936_v47 = vor.u32 %v7666_v35, %v5933_v36  ;;  %v5664_v57 = vor.u32 %v7598_v45, %v5661_v49  ;;  %v7698_v35 = vld [vmem:[#allocation4 + $0x44] sm:$0xf0]  ;;  %v6115_v36 = vld [vmem:[#allocation4 + $0xc0] sm:$0xf]  ;;  %v7736_v39 = vld [vmem:[#allocation4 + $0x174] sm:$0xf0] }
  0xff   :  { %2066 = vmatpush.bf16.msrb.mxu3 %v6000_v52  ;;  %v7662_v52 = vld [vmem:[#allocation2 + $0x72c] sm:$0xf]  ;;  %v7734_v49 = vld [vmem:[#allocation4 + $0x164] sm:$0xf0]  ;;  %v6141_v27 = vld [vmem:[#allocation4 + $0xf8] sm:$0xf0] }
 0x100   :  { %v5920_v8 = vor.u32 %v7662_v52, %v5917_v53 }
 0x101   :  { %2028 = vmatpush.bf16.msrb.mxu0 %v5600_v58  ;;  %2041 = vmatpush.bf16.msrb.mxu1 %v5728_v59  ;;  %v5792_v58 = vor.u32 %v7630_v50, %v5789_v51  ;;  %v5517_v59 = vld [vmem:[#allocation2 + $0x418] sm:$0xf0] }
 0x102   :  { %2054 = vmatpush.bf16.msrb.mxu2 %v5856_v60  ;;  %v7594_v60 = vld [vmem:[#allocation2 + $0x50c] sm:$0xf] }
 0x103   :  { %2067 = vmatpush.bf16.msrb.mxu3 %v5984_v63  ;;  %v7626_v63 = vld [vmem:[#allocation2 + $0x60c] sm:$0xf]  ;;  %v5648_v11 = vor.u32 %v7594_v60, %v5645_v61  ;;  %v6187_v60 = vld [vmem:[#allocation4 + $0x150] sm:$0xf]  ;;  %v7732_v61 = vld [vmem:[#allocation4 + $0x154] sm:$0xf0] }
 0x104   :  { %v5776_v12 = vor.u32 %v7626_v63, %v5773_v0 }
 0x105   :  { %2029 = vmatpush.bf16.msrb.mxu0 %v5584_v15  ;;  %2042 = vmatpush.bf16.msrb.mxu1 %v5712_v25  ;;  %v1816_v2 = vpop.f32.mrf.mxu3  ;;  %v1776_v15 = vadd.f32 %v8349_v4, %v375_v54  ;;  %v5520_v25 = vor.u32 %v7562_v56, %v5517_v59  ;;  %v6068_v4 = vor.u32 %v7702_v20, %v6067_v19  ;;  %v6035_v54 = vld [vmem:[#allocation4 + $0x20] sm:$0xf]  ;;  %v7706_v19 = vld [vmem:[#allocation4 + $0x84] sm:$0xf0]  ;;  %v7703_v20 = vld [vmem:[#allocation4 + $0x74] sm:$0xf] }
 0x106   :  { %2055 = vmatpush.bf16.msrb.mxu2 %v5840_v5  ;;  %v1803_v62 = vpop.f32.mrf.mxu2  ;;  %v6139_v5 = vld [vmem:[#allocation4 + $0xf0] sm:$0xf]  ;;  %v6099_v56 = vld [vmem:[#allocation4 + $0xa0] sm:$0xf] }
 0x107   :  { %2068 = vmatpush.bf16.msrb.mxu3 %v5968_v14  ;;  %v5904_v14 = vor.u32 %v7658_v1, %v5901_v3  ;;  %v6140_v17 = vor.u32 %v7720_v10, %v6139_v5  ;;  %v1789_v18 = vadd.f32 %v8351_v13, %v1776_v15  ;;  %v6123_v13 = vld [vmem:[#allocation4 + $0xd0] sm:$0xf]  ;;  %v6188_v62 = vor.u32 %v7732_v61, %v6187_v60  ;;  %v7692_v3 = vld [vmem:[#allocation4 + $0x14] sm:$0xf0]  ;;  %v7730_v5 = vld [vmem:[#allocation4 + $0x144] sm:$0xf0] }
 0x108   :  { %v6027_v2 = vld [vmem:[#allocation4 + $0x10] sm:$0xf]  ;;  %v7708_v15 = vld [vmem:[#allocation4 + $0x94] sm:$0xf0]  ;;  %v7713_v60 = vld [vmem:[#allocation4 + $0xc4] sm:$0xf] }
 0x109   :  { %2030 = vmatpush.bf16.msrb.mxu0 %v5568_v21  ;;  %2043 = vmatpush.bf16.msrb.mxu1 %v5696_v22  ;;  %v6131_v21 = vld [vmem:[#allocation4 + $0xe0] sm:$0xf]  ;;  %v7718_v22 = vld [vmem:[#allocation4 + $0xe4] sm:$0xf0]  ;;  %v1802_v24 = vadd.f32 %v8353_v28, %v1789_v18  ;;  %v6117_v61 = vld [vmem:[#allocation4 + $0xc8] sm:$0xf0] }
 0x10a   :  { %2056 = vmatpush.bf16.msrb.mxu2 %v5824_v23  ;;  %v6132_v23 = vor.u32 %v7718_v22, %v6131_v21  ;;  %v7714_v28 = vld [vmem:[#allocation4 + $0xc4] sm:$0xf0]  ;;  %v6083_v18 = vld [vmem:[#allocation4 + $0x80] sm:$0xf]  ;;  %v6077_v22 = vld [vmem:[#allocation4 + $0x78] sm:$0xf0] }
 0x10b   :  { %2069 = vmatpush.bf16.msrb.mxu3 %v5952_v29  ;;  %v7716_v29 = vld [vmem:[#allocation4 + $0xd4] sm:$0xf0]  ;;  %v1815_v31 = vadd.f32 %v8355_v33, %v1802_v24 }
 0x10c   :  { %v6124_v32 = vor.u32 %v7716_v29, %v6123_v13  ;;  %v7712_v33 = vld [vmem:[#allocation4 + $0xb4] sm:$0xf0] }
 0x10d   :  { %2031 = vmatpush.bf16.msrb.mxu0 %v5552_v7  ;;  %2044 = vmatpush.bf16.msrb.mxu1 %v5680_v41  ;;  %v6203_v7 = vld [vmem:[#allocation4 + $0x170] sm:$0xf]  ;;  %v6108_v53 = vor.u32 %v7712_v33, %v6107_v44  ;;  %v7728_v24 = vld [vmem:[#allocation4 + $0x134] sm:$0xf0]  ;;  %v6061_v33 = vld [vmem:[#allocation4 + $0x58] sm:$0xf0] }
 0x10e   :  { %2057 = vmatpush.bf16.msrb.mxu2 %v5808_v42  ;;  %v6204_v41 = vor.u32 %v7736_v39, %v6203_v7  ;;  %v6116_v42 = vor.u32 %v7714_v28, %v6115_v36  ;;  %v6144_v36 = vor.u32 %v7719_v26, %v6141_v27  ;;  %v6069_v28 = vld [vmem:[#allocation4 + $0x68] sm:$0xf0]  ;;  %v6163_v7 = vld [vmem:[#allocation4 + $0x120] sm:$0xf]  ;;  %v7726_v39 = vld [vmem:[#allocation4 + $0x124] sm:$0xf0] }
 0x10f   :  { %2070 = vmatpush.bf16.msrb.mxu3 %v5936_v47  ;;  %v6195_v47 = vld [vmem:[#allocation4 + $0x160] sm:$0xf]  ;;  %v7724_v44 = vld [vmem:[#allocation4 + $0x114] sm:$0xf0]  ;;  %v6029_v26 = vld [vmem:[#allocation4 + $0x18] sm:$0xf0] }
 0x110   :  { %v6196_v50 = vor.u32 %v7734_v49, %v6195_v47  ;;  %v7715_v47 = vld [vmem:[#allocation4 + $0xd4] sm:$0xf] }
 0x111   :  { %2032 = vmatpush.bf16.msrb.mxu0 %v5536_v55  ;;  %2045 = vmatpush.bf16.msrb.mxu1 %v5664_v57  ;;  %v7694_v55 = vld [vmem:[#allocation4 + $0x24] sm:$0xf0]  ;;  %v7707_v27 = vld [vmem:[#allocation4 + $0x94] sm:$0xf] }
 0x112   :  { %2058 = vmatpush.bf16.msrb.mxu2 %v5792_v58  ;;  %v7710_v58 = vld [vmem:[#allocation4 + $0xa4] sm:$0xf0] }
 0x113   :  { %2071 = vmatpush.bf16.msrb.mxu3 %v5920_v8  ;;  %v6036_v8 = vor.u32 %v7694_v55, %v6035_v54  ;;  %v6100_v1 = vor.u32 %v7710_v58, %v6099_v56  ;;  %v6205_v54 = vld [vmem:[#allocation4 + $0x178] sm:$0xf0]  ;;  %v6053_v58 = vld [vmem:[#allocation4 + $0x48] sm:$0xf0] }
 0x115   :  { %2033 = vmatpush.bf16.msrb.mxu0 %v5520_v25  ;;  %2046 = vmatpush.bf16.msrb.mxu1 %v5648_v11  ;;  %v1840_v46 = vpop.f32.mrf.mxu1  ;;  %v6179_v25 = vld [vmem:[#allocation4 + $0x140] sm:$0xf] }
 0x116   :  { %2059 = vmatpush.bf16.msrb.mxu2 %v5776_v12  ;;  %v6180_v10 = vor.u32 %v7730_v5, %v6179_v25  ;;  %v6028_v12 = vor.u32 %v7692_v3, %v6027_v2  ;;  %v7711_v2 = vld [vmem:[#allocation4 + $0xb4] sm:$0xf]  ;;  %v6197_v25 = vld [vmem:[#allocation4 + $0x168] sm:$0xf0] }
 0x117   :  { %2072 = vmatpush.bf16.msrb.mxu3 %v5904_v14  ;;  %v6019_v14 = vld [vmem:[#allocation4] sm:$0xf] }
 0x118   :  { %2034 = vmatmul.bf16.vlgmr.msrb.gmra.mxu0 %v8308_v37  ;;  %2047 = vmatmul.bf16.vlgmr.msrb.gmra.mxu1 %v8312_v40  ;;  %v6051_v37 = vld [vmem:[#allocation4 + $0x40] sm:$0xf] }
 0x119   :  { %2476 = vmatpush.bf16.msra.mxu0 %v6076_v16  ;;  %2489 = vmatpush.bf16.msra.mxu1 %v6140_v17  ;;  %v6052_v40 = vor.u32 %v7698_v35, %v6051_v37  ;;  %v7690_v16 = vld [vmem:[#allocation4 + $0x4] sm:$0xf0]  ;;  %v6092_v17 = vor.u32 %v7708_v15, %v6091_v9  ;;  %v6080_v37 = vor.u32 %v7703_v20, %v6077_v22  ;;  %v7701_v35 = vld [vmem:[#allocation4 + $0x64] sm:$0xf]  ;;  %v6109_v9 = vld [vmem:[#allocation4 + $0xb8] sm:$0xf0] }
 0x11a   :  { %2060 = vmatmul.bf16.vlgmr.msrb.gmra.mxu2 %v8306_v34  ;;  %2073 = vmatmul.bf16.vlgmr.msrb.gmra.mxu3 %v8310_v38  ;;  %v1827_v34 = vpop.f32.mrf.mxu0  ;;  %v7696_v38 = vld [vmem:[#allocation4 + $0x34] sm:$0xf0]  ;;  %v7733_v15 = vld [vmem:[#allocation4 + $0x164] sm:$0xf]  ;;  %v6189_v20 = vld [vmem:[#allocation4 + $0x158] sm:$0xf0] }
 0x11b   :  { %v1828_v45 = vadd.f32 %v1827_v34, %v1815_v31  ;;  %2502 = vmatpush.bf16.msra.mxu2 %v6204_v41  ;;  %v6044_v51 = vor.u32 %v7696_v38, %v6043_v43  ;;  %v2078_v31 = vmax.f32 %v8343_v48, 0.0  ;;  %v7717_v41 = vld [vmem:[#allocation4 + $0xe4] sm:$0xf]  ;;  %v6164_v34 = vor.u32 %v7726_v39, %v6163_v7  ;;  %v6155_v38 = vld [vmem:[#allocation4 + $0x110] sm:$0xf] }
 0x11c   :  { %v6072_v48 = vor.u32 %v7701_v35, %v6069_v28  ;;  %v6156_v49 = vor.u32 %v7724_v44, %v6155_v38  ;;  %v6200_v5 = vor.u32 %v7733_v15, %v6197_v25  ;;  %v7689_v7 = vld [vmem:[#allocation4 + $0x4] sm:$0xf]  ;;  %v6085_v38 = vld [vmem:[#allocation4 + $0x88] sm:$0xf0] }
 0x11d   :  { %2477 = vmatpush.bf16.msra.mxu0 %v6068_v4  ;;  %2490 = vmatpush.bf16.msra.mxu1 %v6132_v23  ;;  %v1841_v52 = vadd.f32 %v1840_v46, %v1828_v45  ;;  %v1866_v59 = vpop.f32.mrf.mxu3  ;;  %v1842_v6 = vpop.f32.mrf.mxu1  ;;  %v6171_v23 = vld [vmem:[#allocation4 + $0x130] sm:$0xf]  ;;  %v8369_v43 = vpack.c.bf16 %v2078_v31, %v2078_v31  ;;  %v7699_v46 = vld [vmem:[#allocation4 + $0x54] sm:$0xf]  ;;  %v7729_v31 = vld [vmem:[#allocation4 + $0x144] sm:$0xf] }
 0x11e   :  { %v1853_v57 = vpop.f32.mrf.mxu2  ;;  %v6172_v13 = vor.u32 %v7728_v24, %v6171_v23  ;;  %v6064_v55 = vor.u32 %v7699_v46, %v6061_v33  ;;  %v7691_v24 = vld [vmem:[#allocation4 + $0x14] sm:$0xf]  ;;  %v7725_v33 = vld [vmem:[#allocation4 + $0x124] sm:$0xf] }
 0x11f   :  { %2503 = vmatpush.bf16.msra.mxu2 %v6196_v50  ;;  %v1854_v63 = vadd.f32 %v1853_v57, %v1841_v52  ;;  %v6125_v50 = vld [vmem:[#allocation4 + $0xd8] sm:$0xf0]  ;;  %v7722_v52 = vld [vmem:[#allocation4 + $0x104] sm:$0xf0]  ;;  %v7697_v57 = vld [vmem:[#allocation4 + $0x44] sm:$0xf]  ;;  %v6032_v35 = vor.u32 %v7691_v24, %v6029_v26 }
 0x120   :  { %v6128_v56 = vor.u32 %v7715_v47, %v6125_v50  ;;  %v6165_v47 = vld [vmem:[#allocation4 + $0x128] sm:$0xf0]  ;;  %v7742_v24 = vld [vmem:[#allocation4 + $0x1a4] sm:$0xf0] }
 0x121   :  { %2478 = vmatpush.bf16.msra.mxu0 %v6060_v30  ;;  %2491 = vmatpush.bf16.msra.mxu1 %v6124_v32  ;;  %v1867_v11 = vadd.f32 %v1866_v59, %v1854_v63  ;;  %v6020_v30 = vor.u32 %v7690_v16, %v6019_v14  ;;  %v6084_v32 = vor.u32 %v7706_v19, %v6083_v18  ;;  %v6037_v14 = vld [vmem:[#allocation4 + $0x28] sm:$0xf0]  ;;  %v7709_v16 = vld [vmem:[#allocation4 + $0xa4] sm:$0xf]  ;;  %v7731_v19 = vld [vmem:[#allocation4 + $0x154] sm:$0xf] }
 0x122   :  { %v1829_v0 = vpop.f32.mrf.mxu0  ;;  %v6120_v63 = vor.u32 %v7713_v60, %v6117_v61  ;;  %v6192_v22 = vor.u32 %v7731_v19, %v6189_v20  ;;  %v7721_v60 = vld [vmem:[#allocation4 + $0x104] sm:$0xf]  ;;  %v6149_v61 = vld [vmem:[#allocation4 + $0x108] sm:$0xf0] }
 0x123   :  { %2504 = vmatpush.bf16.msra.mxu2 %v6188_v62  ;;  %v2079_v29 = vmax.f32 %v1867_v11, 0.0  ;;  %v7695_v0 = vld [vmem:[#allocation4 + $0x34] sm:$0xf]  ;;  %v6112_v11 = vor.u32 %v7711_v2, %v6109_v9  ;;  %v7748_v9 = vld [vmem:[#allocation4 + $0x1d4] sm:$0xf0] }
 0x125   :  { %2479 = vmatpush.bf16.msra.mxu0 %v6052_v40  ;;  %2492 = vmatpush.bf16.msra.mxu1 %v6116_v42  ;;  %v1868_v4 = vpop.f32.mrf.mxu3  ;;  %v6133_v40 = vld [vmem:[#allocation4 + $0xe8] sm:$0xf0]  ;;  %v8367_v42 = vpack.c.bf16 %v2079_v29, %v2079_v29  ;;  %v6093_v29 = vld [vmem:[#allocation4 + $0x98] sm:$0xf0] }
 0x126   :  { %v1855_v21 = vpop.f32.mrf.mxu2  ;;  %v6136_v45 = vor.u32 %v7717_v41, %v6133_v40  ;;  %v6096_v39 = vor.u32 %v7707_v27, %v6093_v29  ;;  %v6021_v41 = vld [vmem:[#allocation4 + $0x8] sm:$0xf0]  ;;  %v7727_v40 = vld [vmem:[#allocation4 + $0x134] sm:$0xf] }
 0x127   :  { %2505 = vmatpush.bf16.msra.mxu2 %v6180_v10 }
 0x129   :  { %2480 = vmatpush.bf16.msra.mxu0 %v6044_v51  ;;  %2493 = vmatpush.bf16.msra.mxu1 %v6108_v53  ;;  %v6147_v51 = vld [vmem:[#allocation4 + $0x100] sm:$0xf]  ;;  %v7735_v53 = vld [vmem:[#allocation4 + $0x174] sm:$0xf] }
 0x12a   :  { %v6148_v59 = vor.u32 %v7722_v52, %v6147_v51  ;;  %v6208_v62 = vor.u32 %v7735_v53, %v6205_v54  ;;  %v6024_v51 = vor.u32 %v7689_v7, %v6021_v41  ;;  %v7752_v52 = vld [vmem:[#allocation4 + $0x1f4] sm:$0xf0]  ;;  %v7751_v7 = vld [vmem:[#allocation4 + $0x1f4] sm:$0xf] }
 0x12b   :  { %2506 = vmatpush.bf16.msra.mxu2 %v6172_v13 }
 0x12d   :  { %2481 = vmatpush.bf16.msra.mxu0 %v6036_v8  ;;  %2494 = vmatpush.bf16.msra.mxu1 %v6100_v1  ;;  %v6056_v8 = vor.u32 %v7697_v57, %v6053_v58  ;;  %v6045_v1 = vld [vmem:[#allocation4 + $0x38] sm:$0xf0] }
 0x12e   :  { %v6048_v10 = vor.u32 %v7695_v0, %v6045_v1  ;;  %v6157_v57 = vld [vmem:[#allocation4 + $0x118] sm:$0xf0]  ;;  %v6259_v0 = vld [vmem:[#allocation4 + $0x1e0] sm:$0xf]  ;;  %v7750_v1 = vld [vmem:[#allocation4 + $0x1e4] sm:$0xf0] }
 0x12f   :  { %2507 = vmatpush.bf16.msra.mxu2 %v6164_v34  ;;  %v6173_v34 = vld [vmem:[#allocation4 + $0x138] sm:$0xf0]  ;;  %v6260_v2 = vor.u32 %v7750_v1, %v6259_v0 }
 0x130   :  { %v6221_v0 = vld [vmem:[#allocation4 + $0x198] sm:$0xf0] }
 0x131   :  { %2482 = vmatpush.bf16.msra.mxu0 %v6028_v12  ;;  %2495 = vmatpush.bf16.msra.mxu1 %v6092_v17  ;;  %v7693_v12 = vld [vmem:[#allocation4 + $0x24] sm:$0xf]  ;;  %v6101_v17 = vld [vmem:[#allocation4 + $0xa8] sm:$0xf0] }
 0x132   :  { %v6040_v4 = vor.u32 %v7693_v12, %v6037_v14  ;;  %v6104_v23 = vor.u32 %v7709_v16, %v6101_v17  ;;  %v6235_v17 = vld [vmem:[#allocation4 + $0x1b0] sm:$0xf] }
 0x133   :  { %2508 = vmatpush.bf16.msra.mxu2 %v6156_v49  ;;  %v6267_v49 = vld [vmem:[#allocation4 + $0x1f0] sm:$0xf] }
 0x134   :  { %v6268_v54 = vor.u32 %v7752_v52, %v6267_v49 }
 0x135   :  { %2483 = vmatpush.bf16.msra.mxu0 %v6020_v30  ;;  %2496 = vmatpush.bf16.msra.mxu1 %v6084_v32  ;;  %v1879_v3 = vpop.f32.mrf.mxu0  ;;  %v8373_v6 = vpop.f32.mrf.mxu1  ;;  %v6181_v32 = vld [vmem:[#allocation4 + $0x148] sm:$0xf0] }
 0x136   :  { %2515 = vmatpush.bf16.msra.mxu3 %v6268_v54 }
 0x137   :  { %2509 = vmatpush.bf16.msra.mxu2 %v6148_v59 }
 0x138   :  { %2484 = vmatmul.bf16.vlgmr.msra.gmra.mxu0 %v8369_v43  ;;  %2497 = vmatmul.bf16.vlgmr.msra.gmra.mxu1 %v8367_v42 }
 0x139   :  { %2528 = vmatpush.bf16.msrb.mxu0 %v6080_v37  ;;  %2541 = vmatpush.bf16.msrb.mxu1 %v6144_v36  ;;  %v6184_v37 = vor.u32 %v7729_v31, %v6181_v32  ;;  %v8378_v36 = vld [vmem:[%s8522_s3] sm:$0xf]  ;;  %v7740_v31 = vld [vmem:[#allocation4 + $0x194] sm:$0xf0] }
 0x13a   :  { %v376_v28 = vperm.slane %v8378_v36, 2  ;;  %2516 = vmatpush.bf16.msra.mxu3 %v6260_v2 }
 0x13b   :  { %2554 = vmatpush.bf16.msrb.mxu2 %v6208_v62 }
 0x13c   :  { %v1880_v50 = vadd.f32 %v1879_v3, %v376_v28  ;;  %v6251_v3 = vld [vmem:[#allocation4 + $0x1d0] sm:$0xf] }
 0x13d   :  { %2529 = vmatpush.bf16.msrb.mxu0 %v6072_v48  ;;  %2542 = vmatpush.bf16.msrb.mxu1 %v6136_v45  ;;  %v1918_v21 = vpop.f32.mrf.mxu3  ;;  %v1881_v13 = vpop.f32.mrf.mxu0  ;;  %v7705_v48 = vld [vmem:[#allocation4 + $0x84] sm:$0xf]  ;;  %v6176_v45 = vor.u32 %v7727_v40, %v6173_v34  ;;  %v6261_v34 = vld [vmem:[#allocation4 + $0x1e8] sm:$0xf0] }
 0x13e   :  { %v1905_v18 = vpop.f32.mrf.mxu2  ;;  %v1894_v30 = vpop.f32.mrf.mxu1  ;;  %v6088_v53 = vor.u32 %v7705_v48, %v6085_v38  ;;  %v1893_v58 = vadd.f32 %v8373_v6, %v1880_v50  ;;  %v7749_v40 = vld [vmem:[#allocation4 + $0x1e4] sm:$0xf] }
 0x13f   :  { %2555 = vmatpush.bf16.msrb.mxu2 %v6200_v5  ;;  %v6252_v5 = vor.u32 %v7748_v9, %v6251_v3  ;;  %v6219_v30 = vld [vmem:[#allocation4 + $0x190] sm:$0xf]  ;;  %v6264_v38 = vor.u32 %v7749_v40, %v6261_v34  ;;  %v7745_v50 = vld [vmem:[#allocation4 + $0x1c4] sm:$0xf]  ;;  %v6213_v9 = vld [vmem:[#allocation4 + $0x188] sm:$0xf0] }
 0x140   :  { %v1906_v62 = vadd.f32 %v1905_v18, %v1893_v58  ;;  %v7744_v18 = vld [vmem:[#allocation4 + $0x1b4] sm:$0xf0]  ;;  %v6220_v32 = vor.u32 %v7740_v31, %v6219_v30  ;;  %v7737_v3 = vld [vmem:[#allocation4 + $0x184] sm:$0xf] }
 0x141   :  { %2530 = vmatpush.bf16.msrb.mxu0 %v6064_v55  ;;  %2543 = vmatpush.bf16.msrb.mxu1 %v6128_v56  ;;  %v6168_v55 = vor.u32 %v7725_v33, %v6165_v47  ;;  %v7723_v56 = vld [vmem:[#allocation4 + $0x114] sm:$0xf] }
 0x142   :  { %v6160_v59 = vor.u32 %v7723_v56, %v6157_v57  ;;  %2517 = vmatpush.bf16.msra.mxu3 %v6252_v5  ;;  %v6237_v56 = vld [vmem:[#allocation4 + $0x1b8] sm:$0xf0]  ;;  %v377_v57 = vperm.slane %v8378_v36, 3 }
 0x143   :  { %2556 = vmatpush.bf16.msrb.mxu2 %v6192_v22  ;;  %v6236_v22 = vor.u32 %v7744_v18, %v6235_v17 }
 0x145   :  { %2531 = vmatpush.bf16.msrb.mxu0 %v6056_v8  ;;  %2544 = vmatpush.bf16.msrb.mxu1 %v6120_v63  ;;  %v1920_v46 = vpop.f32.mrf.mxu3  ;;  %v6152_v8 = vor.u32 %v7721_v60, %v6149_v61  ;;  %v1919_v63 = vadd.f32 %v1918_v21, %v1906_v62  ;;  %v6229_v60 = vld [vmem:[#allocation4 + $0x1a8] sm:$0xf0] }
 0x146   :  { %v1907_v44 = vpop.f32.mrf.mxu2  ;;  %v6253_v46 = vld [vmem:[#allocation4 + $0x1d8] sm:$0xf0] }
 0x147   :  { %2557 = vmatpush.bf16.msrb.mxu2 %v6184_v37  ;;  %v6211_v37 = vld [vmem:[#allocation4 + $0x180] sm:$0xf] }
 0x149   :  { %2532 = vmatpush.bf16.msrb.mxu0 %v6048_v10  ;;  %2545 = vmatpush.bf16.msrb.mxu1 %v6112_v11  ;;  %v6243_v10 = vld [vmem:[#allocation4 + $0x1c0] sm:$0xf]  ;;  %v7746_v11 = vld [vmem:[#allocation4 + $0x1c4] sm:$0xf0] }
 0x14b   :  { %2558 = vmatpush.bf16.msrb.mxu2 %v6176_v45  ;;  %v7747_v45 = vld [vmem:[#allocation4 + $0x1d4] sm:$0xf] }
 0x14c   :  { %v6256_v33 = vor.u32 %v7747_v45, %v6253_v46  ;;  %v7781_v45 = vld [vmem:[#allocation6 + $0xe4] sm:$0xf] }
 0x14d   :  { %2533 = vmatpush.bf16.msrb.mxu0 %v6040_v4  ;;  %2546 = vmatpush.bf16.msrb.mxu1 %v6104_v23  ;;  %v6227_v23 = vld [vmem:[#allocation4 + $0x1a0] sm:$0xf] }
 0x14e   :  { %v6228_v13 = vor.u32 %v7742_v24, %v6227_v23 }
 0x14f   :  { %2559 = vmatpush.bf16.msrb.mxu2 %v6168_v55  ;;  %v7743_v55 = vld [vmem:[#allocation4 + $0x1b4] sm:$0xf] }
 0x150   :  { %v6240_v58 = vor.u32 %v7743_v55, %v6237_v56  ;;  %v6371_v55 = vld [vmem:[#allocation6 + $0xc0] sm:$0xf]  ;;  %v7779_v56 = vld [vmem:[#allocation6 + $0xcc] sm:$0xf0] }
 0x151   :  { %2534 = vmatpush.bf16.msrb.mxu0 %v6032_v35  ;;  %2547 = vmatpush.bf16.msrb.mxu1 %v6096_v39  ;;  %v7738_v35 = vld [vmem:[#allocation4 + $0x184] sm:$0xf0]  ;;  %v6269_v39 = vld [vmem:[#allocation4 + $0x1f8] sm:$0xf0] }
 0x152   :  { %v6212_v28 = vor.u32 %v7738_v35, %v6211_v37  ;;  %v6272_v41 = vor.u32 %v7751_v7, %v6269_v39 }
 0x153   :  { %2560 = vmatpush.bf16.msrb.mxu2 %v6160_v59  ;;  %v7741_v59 = vld [vmem:[#allocation4 + $0x1a4] sm:$0xf] }
 0x155   :  { %2535 = vmatpush.bf16.msrb.mxu0 %v6024_v51  ;;  %2548 = vmatpush.bf16.msrb.mxu1 %v6088_v53  ;;  %v1931_v6 = vpop.f32.mrf.mxu0  ;;  %v1944_v25 = vpop.f32.mrf.mxu1  ;;  %v6245_v51 = vld [vmem:[#allocation4 + $0x1c8] sm:$0xf0] }
 0x156   :  { %v1932_v15 = vadd.f32 %v1931_v6, %v1919_v63  ;;  %v6248_v53 = vor.u32 %v7745_v50, %v6245_v51  ;;  %v7739_v63 = vld [vmem:[#allocation4 + $0x194] sm:$0xf] }
 0x157   :  { %2561 = vmatpush.bf16.msrb.mxu2 %v6152_v8  ;;  %v6232_v8 = vor.u32 %v7741_v59, %v6229_v60  ;;  %v6224_v2 = vor.u32 %v7739_v63, %v6221_v0  ;;  %v6373_v59 = vld [vmem:[#allocation6 + $0xd0] sm:$0xf0]  ;;  %v6379_v60 = vld [vmem:[#allocation6 + $0xc8] sm:$0xf]  ;;  %v7778_v63 = vld [vmem:[#allocation6 + $0xcc] sm:$0xf] }
 0x158   :  { %2536 = vmatmul.bf16.vlgmr.msrb.gmra.mxu0 %v8369_v43  ;;  %2549 = vmatmul.bf16.vlgmr.msrb.gmra.mxu1 %v8367_v42  ;;  %v1945_v43 = vadd.f32 %v1944_v25, %v1932_v15  ;;  %v6244_v42 = vor.u32 %v7746_v11, %v6243_v10  ;;  %v6216_v15 = vor.u32 %v7737_v3, %v6213_v9  ;;  %v6381_v0 = vld [vmem:[#allocation6 + $0xd8] sm:$0xf0]  ;;  %v7775_v3 = vld [vmem:[#allocation6 + $0xac] sm:$0xf0]  ;;  %v7773_v9 = vld [vmem:[#allocation6 + $0xa4] sm:$0xf] }
 0x15a   :  { %2518 = vmatpush.bf16.msra.mxu3 %v6244_v42 }
 0x15d   :  { %v1970_v16 = vpop.f32.mrf.mxu3  ;;  %v1933_v20 = vpop.f32.mrf.mxu0 }
 0x15e   :  { %v1957_v12 = vpop.f32.mrf.mxu2  ;;  %v1946_v21 = vpop.f32.mrf.mxu1  ;;  %2519 = vmatpush.bf16.msra.mxu3 %v6236_v22 }
 0x15f   :  { %v1958_v14 = vadd.f32 %v1957_v12, %v1945_v43 }
 0x161   :  { %v1971_v19 = vadd.f32 %v1970_v16, %v1958_v14 }
 0x162   :  { %2520 = vmatpush.bf16.msra.mxu3 %v6228_v13 }
 0x163   :  { %v2080_v4 = vmax.f32 %v1971_v19, 0.0 }
 0x165   :  { %v2084_v26 = vpack.c.bf16 %v2080_v4, %v2080_v4  ;;  %v1972_v29 = vpop.f32.mrf.mxu3  ;;  %v2150_v4 = vld [vmem:[%s8524_s5] sm:$0x3] }
 0x166   :  { %v1959_v27 = vpop.f32.mrf.mxu2  ;;  %2521 = vmatpush.bf16.msra.mxu3 %v6220_v32  ;;  %v2152_v23 = vperm.slane %v2150_v4, 0  ;;  %v2153_v31 = vperm.slane %v2150_v4, 1  ;;  %v7770_v4 = vld [vmem:[#allocation6 + $0x8c] sm:$0xf] }
 0x167   :  { %2510 = vmatmul.bf16.vlgmr.msra.gmra.mxu2 %v2084_v26 }
 0x16a   :  { %2522 = vmatpush.bf16.msra.mxu3 %v6212_v28 }
 0x16e   :  { %2567 = vmatpush.bf16.msrb.mxu3 %v6272_v41 }
 0x172   :  { %2568 = vmatpush.bf16.msrb.mxu3 %v6264_v38  ;;  %v6387_v38 = vld [vmem:[#allocation6 + $0xe0] sm:$0xf] }
 0x175   :  { %v1983_v48 = vpop.f32.mrf.mxu0  ;;  %v1996_v44 = vpop.f32.mrf.mxu1 }
 0x176   :  { %2569 = vmatpush.bf16.msrb.mxu3 %v6256_v33  ;;  %v1984_v1 = vadd.f32 %v1983_v48, %v377_v57  ;;  %v6389_v33 = vld [vmem:[#allocation6 + $0xf0] sm:$0xf0]  ;;  %v7777_v57 = vld [vmem:[#allocation6 + $0xc4] sm:$0xf] }
 0x177   :  { %2562 = vmatmul.bf16.vlgmr.msrb.gmra.mxu2 %v2084_v26  ;;  %v6392_v50 = vor.u32 %v7781_v45, %v6389_v33  ;;  %v6309_v33 = vld [vmem:[#allocation6 + $0x50] sm:$0xf0] }
 0x178   :  { %v1997_v6 = vadd.f32 %v1996_v44, %v1984_v1  ;;  %v7783_v44 = vld [vmem:[#allocation6 + $0xec] sm:$0xf0]  ;;  %v6355_v1 = vld [vmem:[#allocation6 + $0xa0] sm:$0xf] }
 0x179   :  { %v6388_v46 = vor.u32 %v7783_v44, %v6387_v38  ;;  %2805 = vmatpush.bf16.msra.mxu1 %v6392_v50  ;;  %v6307_v38 = vld [vmem:[#allocation6 + $0x40] sm:$0xf]  ;;  %v7763_v44 = vld [vmem:[#allocation6 + $0x4c] sm:$0xf0]  ;;  %v7764_v50 = vld [vmem:[#allocation6 + $0x54] sm:$0xf0] }
 0x17a   :  { %2570 = vmatpush.bf16.msrb.mxu3 %v6248_v53  ;;  %v6397_v53 = vld [vmem:[#allocation6 + $0xf8] sm:$0xf0]  ;;  %v6308_v45 = vor.u32 %v7763_v44, %v6307_v38  ;;  %v7107_v38 = vld [vmem:[#allocation7 + $0x580] sm:$0xf] }
 0x17b   :  { %2792 = vmatpush.bf16.msra.mxu0 %v6388_v46  ;;  %v7761_v46 = vld [vmem:[#allocation6 + $0x44] sm:$0xf]  ;;  %v7965_v44 = vld [vmem:[#allocation7 + $0x59c] sm:$0xf0] }
 0x17d   :  { %v2022_v49 = vpop.f32.mrf.mxu3  ;;  %v1985_v52 = vpop.f32.mrf.mxu0 }
 0x17e   :  { %v2009_v47 = vpop.f32.mrf.mxu2  ;;  %v1998_v54 = vpop.f32.mrf.mxu1  ;;  %2571 = vmatpush.bf16.msrb.mxu3 %v6240_v58  ;;  %v7782_v52 = vld [vmem:[#allocation6 + $0xec] sm:$0xf]  ;;  %v6372_v58 = vor.u32 %v7779_v56, %v6371_v55  ;;  %v6291_v55 = vld [vmem:[#allocation6 + $0x20] sm:$0xf]  ;;  %v7759_v56 = vld [vmem:[#allocation6 + $0x2c] sm:$0xf0] }
 0x17f   :  { %v2010_v25 = vadd.f32 %v2009_v47, %v1997_v6  ;;  %v6395_v47 = vld [vmem:[#allocation6 + $0xe8] sm:$0xf]  ;;  %v6400_v54 = vor.u32 %v7782_v52, %v6397_v53  ;;  %v6357_v6 = vld [vmem:[#allocation6 + $0xb0] sm:$0xf0]  ;;  %v6317_v52 = vld [vmem:[#allocation6 + $0x58] sm:$0xf0] }
 0x180   :  { %2793 = vmatpush.bf16.msra.mxu0 %v6372_v58  ;;  %v6292_v58 = vor.u32 %v7759_v56, %v6291_v55  ;;  %v7331_v55 = vld [vmem:[#allocation7 + $0x740] sm:$0xf] }
 0x181   :  { %v2023_v36 = vadd.f32 %v2022_v49, %v2010_v25  ;;  %v7784_v49 = vld [vmem:[#allocation6 + $0xf4] sm:$0xf0]  ;;  %v6360_v25 = vor.u32 %v7773_v9, %v6357_v6  ;;  %v7753_v9 = vld [vmem:[#allocation6 + $0x4] sm:$0xf]  ;;  %v6787_v56 = vld [vmem:[#allocation7 + $0x300] sm:$0xf] }
 0x182   :  { %2572 = vmatpush.bf16.msrb.mxu3 %v6232_v8  ;;  %v6396_v51 = vor.u32 %v7784_v49, %v6395_v47  ;;  %v6315_v47 = vld [vmem:[#allocation6 + $0x48] sm:$0xf]  ;;  %v6312_v49 = vor.u32 %v7761_v46, %v6309_v33  ;;  %v7363_v46 = vld [vmem:[#allocation7 + $0x780] sm:$0xf] }
 0x183   :  { %v6316_v53 = vor.u32 %v7764_v50, %v6315_v47  ;;  %v8029_v33 = vld [vmem:[#allocation7 + $0x79c] sm:$0xf0] }
 0x184   :  { %2818 = vmatpush.bf16.msra.mxu2 %v6396_v51  ;;  %v7762_v51 = vld [vmem:[#allocation6 + $0x4c] sm:$0xf]  ;;  %v6531_v50 = vld [vmem:[#allocation7 + $0x100] sm:$0xf] }
 0x185   :  { %v2024_v62 = vpop.f32.mrf.mxu3 }
 0x186   :  { %v2011_v61 = vpop.f32.mrf.mxu2  ;;  %2573 = vmatpush.bf16.msrb.mxu3 %v6224_v2  ;;  %v6376_v62 = vor.u32 %v7777_v57, %v6373_v59  ;;  %v6384_v2 = vor.u32 %v7778_v63, %v6381_v0  ;;  %v7757_v57 = vld [vmem:[#allocation6 + $0x24] sm:$0xf]  ;;  %v6293_v59 = vld [vmem:[#allocation6 + $0x30] sm:$0xf0]  ;;  %v7758_v63 = vld [vmem:[#allocation6 + $0x2c] sm:$0xf] }
 0x187   :  { %v7780_v61 = vld [vmem:[#allocation6 + $0xd4] sm:$0xf0]  ;;  %v6301_v0 = vld [vmem:[#allocation6 + $0x38] sm:$0xf0] }
 0x188   :  { %v6380_v8 = vor.u32 %v7780_v61, %v6379_v60  ;;  %2806 = vmatpush.bf16.msra.mxu1 %v6376_v62  ;;  %v6299_v60 = vld [vmem:[#allocation6 + $0x28] sm:$0xf]  ;;  %v7760_v61 = vld [vmem:[#allocation6 + $0x34] sm:$0xf0]  ;;  %v6296_v62 = vor.u32 %v7757_v57, %v6293_v59  ;;  %v7885_v57 = vld [vmem:[#allocation7 + $0x31c] sm:$0xf0] }
 0x18a   :  { %2574 = vmatpush.bf16.msrb.mxu3 %v6216_v15  ;;  %2819 = vmatpush.bf16.msra.mxu2 %v6380_v8  ;;  %v6356_v15 = vor.u32 %v7775_v3, %v6355_v1  ;;  %v6300_v8 = vor.u32 %v7760_v61, %v6299_v60  ;;  %v6304_v1 = vor.u32 %v7758_v63, %v6301_v0  ;;  %v7755_v3 = vld [vmem:[#allocation6 + $0xc] sm:$0xf0]  ;;  %v7949_v0 = vld [vmem:[#allocation7 + $0x51c] sm:$0xf0] }
 0x18c   :  { %2794 = vmatpush.bf16.msra.mxu0 %v6356_v15  ;;  %2807 = vmatpush.bf16.msra.mxu1 %v6360_v25  ;;  %v6277_v25 = vld [vmem:[#allocation6 + $0x10] sm:$0xf0] }
 0x195   :  { %v2035_v5 = vpop.f32.mrf.mxu0  ;;  %v2048_v43 = vpop.f32.mrf.mxu1 }
 0x196   :  { %v2036_v10 = vadd.f32 %v2035_v5, %v2023_v36  ;;  %v6363_v36 = vld [vmem:[#allocation6 + $0xa8] sm:$0xf]  ;;  %v7776_v5 = vld [vmem:[#allocation6 + $0xb4] sm:$0xf0] }
 0x198   :  { %v2049_v11 = vadd.f32 %v2048_v43, %v2036_v10  ;;  %v7774_v43 = vld [vmem:[#allocation6 + $0xac] sm:$0xf]  ;;  %v6364_v10 = vor.u32 %v7776_v5, %v6363_v36  ;;  %v6283_v36 = vld [vmem:[#allocation6 + $0x8] sm:$0xf]  ;;  %v7756_v5 = vld [vmem:[#allocation6 + $0x14] sm:$0xf0] }
 0x19a   :  { %2820 = vmatpush.bf16.msra.mxu2 %v6364_v10  ;;  %v6280_v10 = vor.u32 %v7753_v9, %v6277_v25  ;;  %v6788_v9 = vor.u32 %v7885_v57, %v6787_v56  ;;  %v6755_v25 = vld [vmem:[#allocation7 + $0x2c0] sm:$0xf]  ;;  %v6885_v56 = vld [vmem:[#allocation7 + $0x3e0] sm:$0xf0] }
 0x19d   :  { %v2061_v12 = vpop.f32.mrf.mxu2  ;;  %v2074_v14 = vpop.f32.mrf.mxu3 }
 0x19e   :  { %v2062_v42 = vadd.f32 %v2061_v12, %v2049_v11  ;;  %v2037_v16 = vpop.f32.mrf.mxu0  ;;  %v2050_v17 = vpop.f32.mrf.mxu1  ;;  %v6365_v11 = vld [vmem:[#allocation6 + $0xb8] sm:$0xf0] }
 0x19f   :  { %v6368_v12 = vor.u32 %v7774_v43, %v6365_v11  ;;  %v7769_v16 = vld [vmem:[#allocation6 + $0x84] sm:$0xf]  ;;  %v6284_v11 = vor.u32 %v7756_v5, %v6283_v36  ;;  %v7877_v36 = vld [vmem:[#allocation7 + $0x2dc] sm:$0xf0] }
 0x1a0   :  { %v2075_v18 = vadd.f32 %v2074_v14, %v2062_v42  ;;  %v6339_v42 = vld [vmem:[#allocation6 + $0x80] sm:$0xf]  ;;  %v7771_v14 = vld [vmem:[#allocation6 + $0x8c] sm:$0xf0] }
 0x1a1   :  { %v6340_v17 = vor.u32 %v7771_v14, %v6339_v42  ;;  %v6285_v42 = vld [vmem:[#allocation6 + $0x18] sm:$0xf0] }
 0x1a2   :  { %v2081_v19 = vmax.f32 %v2075_v18, 0.0  ;;  %v6341_v18 = vld [vmem:[#allocation6 + $0x90] sm:$0xf0] }
 0x1a3   :  { %2795 = vmatpush.bf16.msra.mxu0 %v6340_v17  ;;  %v6883_v17 = vld [vmem:[#allocation7 + $0x3c0] sm:$0xf] }
 0x1a4   :  { %v2085_v20 = vpack.c.bf16 %v2081_v19, %v2081_v19  ;;  %v6347_v19 = vld [vmem:[#allocation6 + $0x88] sm:$0xf] }
 0x1a5   :  { %v2063_v21 = vpop.f32.mrf.mxu2  ;;  %v2076_v22 = vpop.f32.mrf.mxu3 }
 0x1a6   :  { %2523 = vmatmul.bf16.vlgmr.msra.gmra.mxu3 %v2085_v20  ;;  %v6344_v21 = vor.u32 %v7769_v16, %v6341_v18 }
 0x1a7   :  { %2831 = vmatpush.bf16.msra.mxu3 %v6400_v54  ;;  %v6320_v54 = vor.u32 %v7762_v51, %v6317_v52  ;;  %v7821_v51 = vld [vmem:[#allocation7 + $0x11c] sm:$0xf0] }
 0x1a8   :  { %2808 = vmatpush.bf16.msra.mxu1 %v6344_v21  ;;  %v7837_v21 = vld [vmem:[#allocation7 + $0x19c] sm:$0xf0]  ;;  %v6532_v63 = vor.u32 %v7821_v51, %v6531_v50 }
 0x1a9   :  { %v6659_v51 = vld [vmem:[#allocation7 + $0x200] sm:$0xf] }
 0x1ab   :  { %2832 = vmatpush.bf16.msra.mxu3 %v6384_v2  ;;  %v6275_v2 = vld [vmem:[#allocation6] sm:$0xf] }
 0x1ac   :  { %v6276_v15 = vor.u32 %v7755_v3, %v6275_v2  ;;  %v8013_v2 = vld [vmem:[#allocation7 + $0x71c] sm:$0xf0] }
 0x1af   :  { %2833 = vmatpush.bf16.msra.mxu3 %v6368_v12  ;;  %v7754_v12 = vld [vmem:[#allocation6 + $0xc] sm:$0xf] }
 0x1b0   :  { %v6288_v16 = vor.u32 %v7754_v12, %v6285_v42  ;;  %v7267_v12 = vld [vmem:[#allocation7 + $0x6c0] sm:$0xf] }
 0x1b1   :  { %v8005_v42 = vld [vmem:[#allocation7 + $0x6dc] sm:$0xf0] }
 0x1b5   :  { %v2485_v24 = vpop.f32.mrf.mxu0  ;;  %v2498_v27 = vpop.f32.mrf.mxu1 }
 0x1b6   :  { %v2486_v26 = vadd.f32 %v2485_v24, %v2152_v23  ;;  %2575 = vmatmul.bf16.vlgmr.msrb.gmra.mxu3 %v2085_v20  ;;  %v7772_v20 = vld [vmem:[#allocation6 + $0x94] sm:$0xf0]  ;;  %v6349_v23 = vld [vmem:[#allocation6 + $0x98] sm:$0xf0] }
 0x1b7   :  { %v6348_v22 = vor.u32 %v7772_v20, %v6347_v19  ;;  %v6352_v24 = vor.u32 %v7770_v4, %v6349_v23  ;;  %v7909_v19 = vld [vmem:[#allocation7 + $0x3dc] sm:$0xf0] }
 0x1b8   :  { %v8388_v13 = vadd.f32 %v2498_v27, %v2486_v26  ;;  %v6323_v26 = vld [vmem:[#allocation6 + $0x60] sm:$0xf]  ;;  %v7767_v27 = vld [vmem:[#allocation6 + $0x6c] sm:$0xf0] }
 0x1b9   :  { %2821 = vmatpush.bf16.msra.mxu2 %v6348_v22  ;;  %2834 = vmatpush.bf16.msra.mxu3 %v6352_v24  ;;  %v6595_v20 = vld [vmem:[#allocation7 + $0x180] sm:$0xf]  ;;  %v6884_v22 = vor.u32 %v7909_v19, %v6883_v17 }
 0x1ba   :  { %v6851_v4 = vld [vmem:[#allocation7 + $0x380] sm:$0xf] }
 0x1bb   :  { %v7901_v23 = vld [vmem:[#allocation7 + $0x39c] sm:$0xf0] }
 0x1bc   :  { %v7139_v24 = vld [vmem:[#allocation7 + $0x5c0] sm:$0xf] }
 0x1bd   :  { %v2487_v29 = vpop.f32.mrf.mxu0  ;;  %v2500_v30 = vpop.f32.mrf.mxu1  ;;  %v7805_v17 = vld [vmem:[#allocation7 + $0x9c] sm:$0xf0] }
 0x1be   :  { %v7765_v29 = vld [vmem:[#allocation6 + $0x64] sm:$0xf]  ;;  %v6324_v30 = vor.u32 %v7767_v27, %v6323_v26  ;;  %v6596_v27 = vor.u32 %v7837_v21, %v6595_v20  ;;  %v7869_v19 = vld [vmem:[#allocation7 + $0x29c] sm:$0xf0]  ;;  %v7268_v21 = vor.u32 %v8005_v42, %v7267_v12 }
 0x1bf   :  { %v7961_v12 = vld [vmem:[#allocation7 + $0x584] sm:$0xf] }
 0x1c0   :  { %2796 = vmatpush.bf16.msra.mxu0 %v6324_v30  ;;  %v7395_v30 = vld [vmem:[#allocation7 + $0x7c0] sm:$0xf]  ;;  %v7109_v42 = vld [vmem:[#allocation7 + $0x5a0] sm:$0xf0] }
 0x1c4   :  { %2797 = vmatpush.bf16.msra.mxu0 %v6308_v45  ;;  %v7108_v45 = vor.u32 %v7965_v44, %v7107_v38  ;;  %v7925_v38 = vld [vmem:[#allocation7 + $0x45c] sm:$0xf0] }
 0x1c5   :  { %v7203_v44 = vld [vmem:[#allocation7 + $0x640] sm:$0xf] }
 0x1c8   :  { %2798 = vmatpush.bf16.msra.mxu0 %v6292_v58  ;;  %v8021_v58 = vld [vmem:[#allocation7 + $0x75c] sm:$0xf0] }
 0x1c9   :  { %v7332_v61 = vor.u32 %v8021_v58, %v7331_v55  ;;  %v7905_v55 = vld [vmem:[#allocation7 + $0x3c4] sm:$0xf] }
 0x1cc   :  { %2799 = vmatpush.bf16.msra.mxu0 %v6276_v15  ;;  %v7813_v15 = vld [vmem:[#allocation7 + $0xdc] sm:$0xf0] }
 0x1d5   :  { %v2537_v32 = vpop.f32.mrf.mxu0  ;;  %v2550_v35 = vpop.f32.mrf.mxu1 }
 0x1d6   :  { %v2538_v37 = vadd.f32 %v2537_v32, %v2153_v31  ;;  %v6325_v31 = vld [vmem:[#allocation6 + $0x70] sm:$0xf0]  ;;  %v6331_v32 = vld [vmem:[#allocation6 + $0x68] sm:$0xf] }
 0x1d8   :  { %v8390_v28 = vadd.f32 %v2550_v35, %v2538_v37  ;;  %v7768_v37 = vld [vmem:[#allocation6 + $0x74] sm:$0xf0]  ;;  %v6328_v35 = vor.u32 %v7765_v29, %v6325_v31  ;;  %v7973_v29 = vld [vmem:[#allocation7 + $0x5dc] sm:$0xf0] }
 0x1d9   :  { %v8037_v31 = vld [vmem:[#allocation7 + $0x7dc] sm:$0xf0] }
 0x1da   :  { %2809 = vmatpush.bf16.msra.mxu1 %v6328_v35  ;;  %v7396_v35 = vor.u32 %v8037_v31, %v7395_v30  ;;  %v6435_v30 = vld [vmem:[#allocation7 + $0x40] sm:$0xf] }
 0x1db   :  { %v7797_v31 = vld [vmem:[#allocation7 + $0x5c] sm:$0xf0] }
 0x1dd   :  { %v2539_v7 = vpop.f32.mrf.mxu0  ;;  %v2552_v39 = vpop.f32.mrf.mxu1 }
 0x1de   :  { %v6332_v7 = vor.u32 %v7768_v37, %v6331_v32  ;;  %v7766_v39 = vld [vmem:[#allocation6 + $0x6c] sm:$0xf]  ;;  %2810 = vmatpush.bf16.msra.mxu1 %v6312_v49  ;;  %v6852_v32 = vor.u32 %v7901_v23, %v6851_v4  ;;  %v7140_v37 = vor.u32 %v7973_v29, %v7139_v24  ;;  %v7364_v49 = vor.u32 %v8029_v33, %v7363_v46  ;;  %v7933_v24 = vld [vmem:[#allocation7 + $0x49c] sm:$0xf0] }
 0x1e0   :  { %2822 = vmatpush.bf16.msra.mxu2 %v6332_v7  ;;  %v6563_v7 = vld [vmem:[#allocation7 + $0x140] sm:$0xf] }
 0x1e2   :  { %2811 = vmatpush.bf16.msra.mxu1 %v6296_v62  ;;  %v7043_v62 = vld [vmem:[#allocation7 + $0x500] sm:$0xf] }
 0x1e4   :  { %2823 = vmatpush.bf16.msra.mxu2 %v6316_v53  ;;  %v7075_v53 = vld [vmem:[#allocation7 + $0x540] sm:$0xf] }
 0x1e6   :  { %2812 = vmatpush.bf16.msra.mxu1 %v6280_v10 }
 0x1e8   :  { %2824 = vmatpush.bf16.msra.mxu2 %v6300_v8 }
 0x1ea   :  { %v8392_v41 = vpop.f32.mrf.mxu2  ;;  %4419 = vmatpush.bf16.msrb.mxu1 %v6884_v22  ;;  %v6979_v22 = vld [vmem:[#allocation7 + $0x480] sm:$0xf] }
 0x1eb   :  { %v2512_v6 = vadd.f32 %v8392_v41, %v8388_v13  ;;  %v6627_v13 = vld [vmem:[#allocation7 + $0x1c0] sm:$0xf] }
 0x1ec   :  { %2825 = vmatpush.bf16.msra.mxu2 %v6284_v11  ;;  %v7845_v41 = vld [vmem:[#allocation7 + $0x1dc] sm:$0xf0] }
 0x1ed   :  { %v6628_v18 = vor.u32 %v7845_v41, %v6627_v13  ;;  %v7941_v11 = vld [vmem:[#allocation7 + $0x4dc] sm:$0xf0]  ;;  %v6756_v13 = vor.u32 %v7877_v36, %v6755_v25  ;;  %v6888_v25 = vor.u32 %v7905_v55, %v6885_v56  ;;  %v6597_v36 = vld [vmem:[#allocation7 + $0x1a0] sm:$0xf0] }
 0x1ee   :  { %4420 = vmatpush.bf16.msrb.mxu1 %v6852_v32  ;;  %v6467_v41 = vld [vmem:[#allocation7 + $0x80] sm:$0xf]  ;;  %v7801_v55 = vld [vmem:[#allocation7 + $0x84] sm:$0xf] }
 0x1ef   :  { %4406 = vmatpush.bf16.msrb.mxu0 %v6628_v18  ;;  %v6723_v18 = vld [vmem:[#allocation7 + $0x280] sm:$0xf]  ;;  %v6468_v23 = vor.u32 %v7805_v17, %v6467_v41  ;;  %v6469_v56 = vld [vmem:[#allocation7 + $0xa0] sm:$0xf0] }
 0x1f0   :  { %4432 = vmatpush.bf16.msrb.mxu2 %v7140_v37  ;;  %v6724_v29 = vor.u32 %v7869_v19, %v6723_v18  ;;  %v6691_v32 = vld [vmem:[#allocation7 + $0x240] sm:$0xf]  ;;  %v7825_v18 = vld [vmem:[#allocation7 + $0x144] sm:$0xf] }
 0x1f1   :  { %v7861_v37 = vld [vmem:[#allocation7 + $0x25c] sm:$0xf0]  ;;  %v6565_v19 = vld [vmem:[#allocation7 + $0x160] sm:$0xf0] }
 0x1f2   :  { %v2513_v40 = vpop.f32.mrf.mxu2  ;;  %v6692_v33 = vor.u32 %v7861_v37, %v6691_v32  ;;  %v6533_v32 = vld [vmem:[#allocation7 + $0x120] sm:$0xf0] }
 0x1f3   :  { %v6333_v40 = vld [vmem:[#allocation6 + $0x78] sm:$0xf0]  ;;  %4407 = vmatpush.bf16.msrb.mxu0 %v6596_v27  ;;  %v7997_v27 = vld [vmem:[#allocation7 + $0x69c] sm:$0xf0]  ;;  %v7881_v37 = vld [vmem:[#allocation7 + $0x304] sm:$0xf] }
 0x1f4   :  { %4433 = vmatpush.bf16.msrb.mxu2 %v7108_v45  ;;  %v7989_v45 = vld [vmem:[#allocation7 + $0x65c] sm:$0xf0] }
 0x1f5   :  { %v7204_v58 = vor.u32 %v7989_v45, %v7203_v44  ;;  %v7301_v44 = vld [vmem:[#allocation7 + $0x720] sm:$0xf0] }
 0x1fa   :  { %v8394_v34 = vpop.f32.mrf.mxu2 }
 0x1fb   :  { %v2564_v59 = vadd.f32 %v8394_v34, %v8390_v28  ;;  %v7044_v28 = vor.u32 %v7949_v0, %v7043_v62  ;;  %v7171_v62 = vld [vmem:[#allocation7 + $0x600] sm:$0xf]  ;;  %v7141_v0 = vld [vmem:[#allocation7 + $0x5e0] sm:$0xf0] }
 0x202   :  { %v2565_v48 = vpop.f32.mrf.mxu2 }
 0x203   :  { %v6336_v48 = vor.u32 %v7766_v39, %v6333_v40  ;;  %v7829_v39 = vld [vmem:[#allocation7 + $0x15c] sm:$0xf0] }
 0x204   :  { %v6819_v40 = vld [vmem:[#allocation7 + $0x340] sm:$0xf]  ;;  %v6564_v47 = vor.u32 %v7829_v39, %v6563_v7  ;;  %v6980_v7 = vor.u32 %v7933_v24, %v6979_v22  ;;  %v7112_v22 = vor.u32 %v7961_v12, %v7109_v42  ;;  %v7077_v24 = vld [vmem:[#allocation7 + $0x560] sm:$0xf0] }
 0x205   :  { %2835 = vmatpush.bf16.msra.mxu3 %v6336_v48  ;;  %v7893_v48 = vld [vmem:[#allocation7 + $0x35c] sm:$0xf0]  ;;  %v7849_v12 = vld [vmem:[#allocation7 + $0x204] sm:$0xf] }
 0x206   :  { %v6820_v52 = vor.u32 %v7893_v48, %v6819_v40  ;;  %4408 = vmatpush.bf16.msrb.mxu0 %v6564_v47  ;;  %v6947_v40 = vld [vmem:[#allocation7 + $0x440] sm:$0xf]  ;;  %v6436_v48 = vor.u32 %v7797_v31, %v6435_v30  ;;  %v7817_v31 = vld [vmem:[#allocation7 + $0x104] sm:$0xf] }
 0x207   :  { %v6403_v47 = vld [vmem:[#allocation7] sm:$0xf]  ;;  %v6948_v57 = vor.u32 %v7925_v38, %v6947_v40  ;;  %v7945_v40 = vld [vmem:[#allocation7 + $0x504] sm:$0xf]  ;;  %v6536_v45 = vor.u32 %v7817_v31, %v6533_v32 }
 0x208   :  { %4421 = vmatpush.bf16.msrb.mxu1 %v6820_v52  ;;  %v7853_v52 = vld [vmem:[#allocation7 + $0x21c] sm:$0xf0]  ;;  %v8009_v38 = vld [vmem:[#allocation7 + $0x704] sm:$0xf] }
 0x209   :  { %2836 = vmatpush.bf16.msra.mxu3 %v6320_v54  ;;  %v7957_v54 = vld [vmem:[#allocation7 + $0x55c] sm:$0xf0] }
 0x20a   :  { %v7076_v60 = vor.u32 %v7957_v54, %v7075_v53  ;;  %4409 = vmatpush.bf16.msrb.mxu0 %v6532_v63  ;;  %v7841_v53 = vld [vmem:[#allocation7 + $0x1c4] sm:$0xf] }
 0x20b   :  { %v6629_v54 = vld [vmem:[#allocation7 + $0x1e0] sm:$0xf0] }
 0x20c   :  { %4434 = vmatpush.bf16.msrb.mxu2 %v7076_v60  ;;  %4422 = vmatpush.bf16.msrb.mxu1 %v6788_v9  ;;  %v6915_v60 = vld [vmem:[#allocation7 + $0x400] sm:$0xf]  ;;  %v7969_v63 = vld [vmem:[#allocation7 + $0x5c4] sm:$0xf] }
 0x20d   :  { %2837 = vmatpush.bf16.msra.mxu3 %v6304_v1  ;;  %v7299_v1 = vld [vmem:[#allocation7 + $0x700] sm:$0xf]  ;;  %v8033_v9 = vld [vmem:[#allocation7 + $0x7c4] sm:$0xf] }
 0x20e   :  { %v7300_v34 = vor.u32 %v8013_v2, %v7299_v1 }
 0x210   :  { %4435 = vmatpush.bf16.msrb.mxu2 %v7044_v28  ;;  %4423 = vmatpush.bf16.msrb.mxu1 %v6756_v13  ;;  %v6853_v28 = vld [vmem:[#allocation7 + $0x3a0] sm:$0xf0] }
 0x211   :  { %2838 = vmatpush.bf16.msra.mxu3 %v6288_v16  ;;  %v7365_v13 = vld [vmem:[#allocation7 + $0x7a0] sm:$0xf0] }
 0x214   :  { %4424 = vmatpush.bf16.msrb.mxu1 %v6724_v29  ;;  %v6568_v29 = vor.u32 %v7825_v18, %v6565_v19  ;;  %v7985_v19 = vld [vmem:[#allocation7 + $0x644] sm:$0xf] }
 0x215   :  { %4445 = vmatpush.bf16.msrb.mxu3 %v7396_v35  ;;  %v2583_v35 = vld [vmem:[%s8520_s1] sm:$0xff] }
 0x218   :  { %4425 = vmatpush.bf16.msrb.mxu1 %v6692_v33  ;;  %v7809_v33 = vld [vmem:[#allocation7 + $0xc4] sm:$0xf] }
 0x219   :  { %4446 = vmatpush.bf16.msrb.mxu3 %v7364_v49  ;;  %v7789_v49 = vld [vmem:[#allocation7 + $0x1c] sm:$0xf0] }
 0x21a   :  { %v6404_v2 = vor.u32 %v7789_v49, %v6403_v47  ;;  %v6501_v47 = vld [vmem:[#allocation7 + $0xe0] sm:$0xf0] }
 0x21b   :  { %v7873_v49 = vld [vmem:[#allocation7 + $0x2c4] sm:$0xf] }
 0x21d   :  { %4447 = vmatpush.bf16.msrb.mxu3 %v7332_v61  ;;  %v7917_v61 = vld [vmem:[#allocation7 + $0x41c] sm:$0xf0] }
 0x221   :  { %4448 = vmatpush.bf16.msrb.mxu3 %v7300_v34  ;;  %v6916_v34 = vor.u32 %v7917_v61, %v6915_v60  ;;  %v7937_v61 = vld [vmem:[#allocation7 + $0x4c4] sm:$0xf] }
 0x225   :  { %4449 = vmatpush.bf16.msrb.mxu3 %v7268_v21  ;;  %v6821_v21 = vld [vmem:[#allocation7 + $0x360] sm:$0xf0] }
 0x229   :  { %v2524_v43 = vpop.f32.mrf.mxu3 }
 0x22a   :  { %v8398_v14 = vadd.f32 %v2524_v43, %v2512_v6  ;;  %v6499_v6 = vld [vmem:[#allocation7 + $0xc0] sm:$0xf] }
 0x22b   :  { %v7011_v43 = vld [vmem:[#allocation7 + $0x4c0] sm:$0xf]  ;;  %v6500_v10 = vor.u32 %v7813_v15, %v6499_v6  ;;  %v7397_v6 = vld [vmem:[#allocation7 + $0x7e0] sm:$0xf0]  ;;  %v6632_v15 = vor.u32 %v7841_v53, %v6629_v54  ;;  %v6504_v53 = vor.u32 %v7809_v33, %v6501_v47 }
 0x22c   :  { %2586 = vst [vmem:[%s8530_s11] sm:$0xff] %v8398_v14  ;;  %v7012_v20 = vor.u32 %v7941_v11, %v7011_v43  ;;  %v7400_v11 = vor.u32 %v8033_v9, %v7397_v6  ;;  %v7857_v6 = vld [vmem:[#allocation7 + $0x244] sm:$0xf] }
 0x22d   :  { %4410 = vmatpush.bf16.msrb.mxu0 %v6500_v10  ;;  %v7144_v10 = vor.u32 %v7969_v63, %v7141_v0  ;;  %v7269_v0 = vld [vmem:[#allocation7 + $0x6e0] sm:$0xf0] }
 0x22e   :  { %4436 = vmatpush.bf16.msrb.mxu2 %v7012_v20  ;;  %v7889_v20 = vld [vmem:[#allocation7 + $0x344] sm:$0xf] }
 0x22f   :  { %v6824_v30 = vor.u32 %v7889_v20, %v6821_v21  ;;  %v7205_v20 = vld [vmem:[#allocation7 + $0x660] sm:$0xf0] }
 0x230   :  { %v7208_v21 = vor.u32 %v7985_v19, %v7205_v20 }
 0x231   :  { %v2526_v26 = vpop.f32.mrf.mxu3  ;;  %4411 = vmatpush.bf16.msrb.mxu0 %v6468_v23  ;;  %v7953_v23 = vld [vmem:[#allocation7 + $0x544] sm:$0xf] }
 0x232   :  { %v7235_v26 = vld [vmem:[#allocation7 + $0x680] sm:$0xf]  ;;  %4437 = vmatpush.bf16.msrb.mxu2 %v6980_v7  ;;  %v7080_v7 = vor.u32 %v7953_v23, %v7077_v24  ;;  %v7977_v24 = vld [vmem:[#allocation7 + $0x604] sm:$0xf] }
 0x233   :  { %v7236_v39 = vor.u32 %v7997_v27, %v7235_v26  ;;  %v8017_v26 = vld [vmem:[#allocation7 + $0x744] sm:$0xf] }
 0x234   :  { %v7333_v27 = vld [vmem:[#allocation7 + $0x760] sm:$0xf0] }
 0x235   :  { %4450 = vmatpush.bf16.msrb.mxu3 %v7236_v39  ;;  %4412 = vmatpush.bf16.msrb.mxu0 %v6436_v48  ;;  %v7336_v39 = vor.u32 %v8017_v26, %v7333_v27  ;;  %v7045_v48 = vld [vmem:[#allocation7 + $0x520] sm:$0xf0] }
 0x236   :  { %4438 = vmatpush.bf16.msrb.mxu2 %v6948_v57  ;;  %v7865_v57 = vld [vmem:[#allocation7 + $0x284] sm:$0xf] }
 0x237   :  { %v7173_v26 = vld [vmem:[#allocation7 + $0x620] sm:$0xf0] }
 0x238   :  { %v7176_v27 = vor.u32 %v7977_v24, %v7173_v26  ;;  %v7958_v26 = vld [vmem:[#allocation7 + $0x564] sm:$0xf0] }
 0x239   :  { %v2576_v8 = vpop.f32.mrf.mxu3  ;;  %4451 = vmatpush.bf16.msrb.mxu3 %v7204_v58  ;;  %4413 = vmatpush.bf16.msrb.mxu0 %v6404_v2  ;;  %v6725_v58 = vld [vmem:[#allocation7 + $0x2a0] sm:$0xf0] }
 0x23a   :  { %v2577_v3 = vadd.f32 %v2576_v8, %v2564_v59  ;;  %v7981_v8 = vld [vmem:[#allocation7 + $0x61c] sm:$0xf0]  ;;  %4439 = vmatpush.bf16.msrb.mxu2 %v6916_v34  ;;  %v6728_v60 = vor.u32 %v7865_v57, %v6725_v58  ;;  %v7793_v2 = vld [vmem:[#allocation7 + $0x44] sm:$0xf] }
 0x23b   :  { %v7172_v43 = vor.u32 %v7981_v8, %v7171_v62  ;;  %v7013_v62 = vld [vmem:[#allocation7 + $0x4e0] sm:$0xf0] }
 0x23c   :  { %v2580_v5 = vmul.f32 0.5, %v2577_v3  ;;  %2587 = vst [vmem:[%s8530_s11 + $0x8] sm:$0xff] %v2577_v3  ;;  %v6660_v3 = vor.u32 %v7853_v52, %v6659_v51  ;;  %v7048_v51 = vor.u32 %v7945_v40, %v7045_v48  ;;  %v7304_v52 = vor.u32 %v8009_v38, %v7301_v44  ;;  %v8001_v8 = vld [vmem:[#allocation7 + $0x6c4] sm:$0xf]  ;;  %v7846_v40 = vld [vmem:[#allocation7 + $0x1e4] sm:$0xf0] }
 0x23d   :  { %4452 = vmatpush.bf16.msrb.mxu3 %v7172_v43  ;;  %v7016_v63 = vor.u32 %v7937_v61, %v7013_v62  ;;  %v7237_v34 = vld [vmem:[#allocation7 + $0x6a0] sm:$0xf0]  ;;  %v6891_v48 = vld [vmem:[#allocation7 + $0x3c8] sm:$0xf] }
 0x23e   :  { %v2581_v16 = vmul.f32 1.442695, %v2580_v5  ;;  %v7897_v5 = vld [vmem:[#allocation7 + $0x384] sm:$0xf]  ;;  %4426 = vmatpush.bf16.msrb.mxu1 %v6660_v3  ;;  %v7910_v38 = vld [vmem:[#allocation7 + $0x3e4] sm:$0xf0] }
 0x23f   :  { %v6856_v17 = vor.u32 %v7897_v5, %v6853_v28  ;;  %v6437_v3 = vld [vmem:[#allocation7 + $0x60] sm:$0xf0]  ;;  %v7403_v61 = vld [vmem:[#allocation7 + $0x7c8] sm:$0xf] }
 0x240   :  { %8051 = vpow2.f32 %v2581_v16  ;;  %v8025_v16 = vld [vmem:[#allocation7 + $0x784] sm:$0xf]  ;;  %v6440_v9 = vor.u32 %v7793_v2, %v6437_v3  ;;  %v8038_v2 = vld [vmem:[#allocation7 + $0x7e4] sm:$0xf0] }
 0x241   :  { %v2578_v4 = vpop.f32.mrf.mxu3  ;;  %v7993_v5 = vld [vmem:[#allocation7 + $0x684] sm:$0xf]  ;;  %v6571_v3 = vld [vmem:[#allocation7 + $0x148] sm:$0xf] }
 0x242   :  { %v7368_v4 = vor.u32 %v8025_v16, %v7365_v13  ;;  %v7240_v43 = vor.u32 %v7993_v5, %v7237_v34  ;;  %v6661_v16 = vld [vmem:[#allocation7 + $0x220] sm:$0xf0]  ;;  %v7404_v5 = vor.u32 %v8038_v2, %v7403_v61  ;;  %v7115_v34 = vld [vmem:[#allocation7 + $0x588] sm:$0xf] }
 0x243   :  { %v6664_v13 = vor.u32 %v7849_v12, %v6661_v16  ;;  %v8030_v16 = vld [vmem:[#allocation7 + $0x7a4] sm:$0xf0] }
 0x244   :  { %v7798_v61 = vld [vmem:[#allocation7 + $0x64] sm:$0xf0] }
 0x245   :  { %v7934_v2 = vld [vmem:[#allocation7 + $0x4a4] sm:$0xf0] }
 0x246   :  { %v8052_v46 = vpop.eup %8051 }
 0x247   :  { %v2584_v50 = vmul.f32 %v8052_v46, %v2583_v35  ;;  %v6789_v35 = vld [vmem:[#allocation7 + $0x320] sm:$0xf0] }
 0x248   :  { %v6792_v46 = vor.u32 %v7881_v37, %v6789_v35  ;;  %v6635_v35 = vld [vmem:[#allocation7 + $0x1c8] sm:$0xf] }
 0x249   :  { %v2585_v59 = vadd.f32 %v2584_v50, %v8398_v14  ;;  %v7833_v14 = vld [vmem:[#allocation7 + $0x184] sm:$0xf]  ;;  %v6636_v47 = vor.u32 %v7846_v40, %v6635_v35  ;;  %v7950_v40 = vld [vmem:[#allocation7 + $0x524] sm:$0xf0] }
 0x24a   :  { %v6600_v41 = vor.u32 %v7833_v14, %v6597_v36  ;;  %v6757_v50 = vld [vmem:[#allocation7 + $0x2e0] sm:$0xf0] }
 0x24b   :  { %2588 = vst [vmem:[%s8530_s11 + $0x10] sm:$0xff] %v2585_v59  ;;  %v2589_v1 = vpack.c.bf16 %v2585_v59, %v2585_v59  ;;  %v6760_v54 = vor.u32 %v7873_v49, %v6757_v50  ;;  %v6472_v59 = vor.u32 %v7801_v55, %v6469_v56  ;;  %v7929_v14 = vld [vmem:[#allocation7 + $0x484] sm:$0xf]  ;;  %v6892_v49 = vor.u32 %v7910_v38, %v6891_v48  ;;  %v6603_v50 = vld [vmem:[#allocation7 + $0x188] sm:$0xf] }
 0x24c   :  { %v6981_v36 = vld [vmem:[#allocation7 + $0x4a0] sm:$0xf0]  ;;  %v7902_v55 = vld [vmem:[#allocation7 + $0x3a4] sm:$0xf0] }
 0x24d   :  { %2800 = vmatmul.bf16.vlgmr.msra.gmra.mxu0 %v2589_v1  ;;  %2813 = vmatmul.bf16.vlgmr.msra.gmra.mxu1 %v2589_v1  ;;  %v6984_v28 = vor.u32 %v7929_v14, %v6981_v36  ;;  %v7307_v48 = vld [vmem:[#allocation7 + $0x708] sm:$0xf] }
 0x24e   :  { %2826 = vmatmul.bf16.vlgmr.msra.gmra.mxu2 %v2589_v1  ;;  %2839 = vmatmul.bf16.vlgmr.msra.gmra.mxu3 %v2589_v1  ;;  %v7272_v1 = vor.u32 %v8001_v8, %v7269_v0  ;;  %v8014_v38 = vld [vmem:[#allocation7 + $0x724] sm:$0xf0] }
 0x24f   :  { %4458 = vmatpush.bf16.msra.mxu0 %v6632_v15  ;;  %4471 = vmatpush.bf16.msra.mxu1 %v6888_v25  ;;  %v6693_v15 = vld [vmem:[#allocation7 + $0x260] sm:$0xf0] }
 0x250   :  { %4484 = vmatpush.bf16.msra.mxu2 %v7144_v10  ;;  %4497 = vmatpush.bf16.msra.mxu3 %v7400_v11  ;;  %v6696_v25 = vor.u32 %v7857_v6, %v6693_v15  ;;  %v7785_v10 = vld [vmem:[#allocation7 + $0x4] sm:$0xf]  ;;  %v6827_v6 = vld [vmem:[#allocation7 + $0x348] sm:$0xf] }
 0x251   :  { %v6405_v11 = vld [vmem:[#allocation7 + $0x20] sm:$0xf0]  ;;  %v7894_v15 = vld [vmem:[#allocation7 + $0x364] sm:$0xf0] }
 0x252   :  { %v6408_v42 = vor.u32 %v7785_v10, %v6405_v11  ;;  %v6828_v12 = vor.u32 %v7894_v15, %v6827_v6 }
 0x253   :  { %4459 = vmatpush.bf16.msra.mxu0 %v6600_v41  ;;  %4472 = vmatpush.bf16.msra.mxu1 %v6856_v17  ;;  %v7921_v41 = vld [vmem:[#allocation7 + $0x444] sm:$0xf] }
 0x254   :  { %4485 = vmatpush.bf16.msra.mxu2 %v7112_v22  ;;  %4498 = vmatpush.bf16.msra.mxu3 %v7368_v4  ;;  %v6949_v17 = vld [vmem:[#allocation7 + $0x460] sm:$0xf0] }
 0x255   :  { %v6952_v18 = vor.u32 %v7921_v41, %v6949_v17  ;;  %v7913_v22 = vld [vmem:[#allocation7 + $0x404] sm:$0xf]  ;;  %v7822_v41 = vld [vmem:[#allocation7 + $0x124] sm:$0xf0] }
 0x256   :  { %v6917_v4 = vld [vmem:[#allocation7 + $0x420] sm:$0xf0]  ;;  %v6795_v17 = vld [vmem:[#allocation7 + $0x308] sm:$0xf] }
 0x257   :  { %4460 = vmatpush.bf16.msra.mxu0 %v6568_v29  ;;  %4473 = vmatpush.bf16.msra.mxu1 %v6824_v30  ;;  %v6920_v23 = vor.u32 %v7913_v22, %v6917_v4  ;;  %v2622_v29 = vld [vmem:[%s8526_s7] sm:$0xf]  ;;  %v7083_v4 = vld [vmem:[#allocation7 + $0x548] sm:$0xf] }
 0x258   :  { %4486 = vmatpush.bf16.msra.mxu2 %v7080_v7  ;;  %4499 = vmatpush.bf16.msra.mxu3 %v7336_v39  ;;  %v2624_v30 = vperm.slane %v2622_v29, 0  ;;  %v2625_v31 = vperm.slane %v2622_v29, 1  ;;  %v2627_v33 = vperm.slane %v2622_v29, 3  ;;  %v7084_v35 = vor.u32 %v7958_v26, %v7083_v4  ;;  %v7834_v4 = vld [vmem:[#allocation7 + $0x18c] sm:$0xf] }
 0x25b   :  { %4461 = vmatpush.bf16.msra.mxu0 %v6536_v45  ;;  %4474 = vmatpush.bf16.msra.mxu1 %v6792_v46  ;;  %v2626_v46 = vperm.slane %v2622_v29, 2  ;;  %v8022_v29 = vld [vmem:[#allocation7 + $0x764] sm:$0xf0] }
 0x25c   :  { %4487 = vmatpush.bf16.msra.mxu2 %v7048_v51  ;;  %4500 = vmatpush.bf16.msra.mxu3 %v7304_v52  ;;  %v7838_v51 = vld [vmem:[#allocation7 + $0x1a4] sm:$0xf0] }
 0x25d   :  { %v6604_v58 = vor.u32 %v7838_v51, %v6603_v50  ;;  %v7308_v51 = vor.u32 %v8014_v38, %v7307_v48 }
 0x25f   :  { %4462 = vmatpush.bf16.msra.mxu0 %v6504_v53  ;;  %4475 = vmatpush.bf16.msra.mxu1 %v6760_v54  ;;  %v6859_v54 = vld [vmem:[#allocation7 + $0x388] sm:$0xf] }
 0x260   :  { %4488 = vmatpush.bf16.msra.mxu2 %v7016_v63  ;;  %4501 = vmatpush.bf16.msra.mxu3 %v7272_v1  ;;  %v6860_v1 = vor.u32 %v7902_v55, %v6859_v54  ;;  %v7019_v54 = vld [vmem:[#allocation7 + $0x4c8] sm:$0xf] }
 0x261   :  { %v7942_v55 = vld [vmem:[#allocation7 + $0x4e4] sm:$0xf0] }
 0x263   :  { %4463 = vmatpush.bf16.msra.mxu0 %v6472_v59  ;;  %4476 = vmatpush.bf16.msra.mxu1 %v6728_v60  ;;  %v7147_v59 = vld [vmem:[#allocation7 + $0x5c8] sm:$0xf] }
 0x264   :  { %4489 = vmatpush.bf16.msra.mxu2 %v6984_v28  ;;  %4502 = vmatpush.bf16.msra.mxu3 %v7240_v43  ;;  %v7974_v60 = vld [vmem:[#allocation7 + $0x5e4] sm:$0xf0] }
 0x265   :  { %v7148_v36 = vor.u32 %v7974_v60, %v7147_v59  ;;  %v7966_v43 = vld [vmem:[#allocation7 + $0x5a4] sm:$0xf0] }
 0x266   :  { %v6443_v60 = vld [vmem:[#allocation7 + $0x48] sm:$0xf] }
 0x267   :  { %4464 = vmatpush.bf16.msra.mxu0 %v6440_v9  ;;  %4477 = vmatpush.bf16.msra.mxu1 %v6696_v25  ;;  %v7830_v9 = vld [vmem:[#allocation7 + $0x164] sm:$0xf0]  ;;  %v6444_v6 = vor.u32 %v7798_v61, %v6443_v60  ;;  %v7818_v60 = vld [vmem:[#allocation7 + $0x10c] sm:$0xf] }
 0x268   :  { %4490 = vmatpush.bf16.msra.mxu2 %v6952_v18  ;;  %4503 = vmatpush.bf16.msra.mxu3 %v7208_v21  ;;  %v6572_v28 = vor.u32 %v7830_v9, %v6571_v3  ;;  %v7886_v18 = vld [vmem:[#allocation7 + $0x324] sm:$0xf0]  ;;  %v7116_v21 = vor.u32 %v7966_v43, %v7115_v34  ;;  %v6637_v34 = vld [vmem:[#allocation7 + $0x1e8] sm:$0xf0] }
 0x269   :  { %v6796_v24 = vor.u32 %v7886_v18, %v6795_v17  ;;  %v7243_v3 = vld [vmem:[#allocation7 + $0x688] sm:$0xf]  ;;  %v6541_v61 = vld [vmem:[#allocation7 + $0x128] sm:$0xf0] }
 0x26a   :  { %v7998_v9 = vld [vmem:[#allocation7 + $0x6a4] sm:$0xf0] }
 0x26b   :  { %4465 = vmatpush.bf16.msra.mxu0 %v6408_v42  ;;  %4478 = vmatpush.bf16.msra.mxu1 %v6664_v13  ;;  %v7371_v42 = vld [vmem:[#allocation7 + $0x788] sm:$0xf] }
 0x26c   :  { %4491 = vmatpush.bf16.msra.mxu2 %v6920_v23  ;;  %4504 = vmatpush.bf16.msra.mxu3 %v7176_v27  ;;  %v6539_v13 = vld [vmem:[#allocation7 + $0x108] sm:$0xf]  ;;  %v7372_v22 = vor.u32 %v8030_v16, %v7371_v42  ;;  %v7906_v42 = vld [vmem:[#allocation7 + $0x3cc] sm:$0xf] }
 0x26d   :  { %v6540_v23 = vor.u32 %v7822_v41, %v6539_v13  ;;  %v7339_v27 = vld [vmem:[#allocation7 + $0x748] sm:$0xf]  ;;  %v6893_v16 = vld [vmem:[#allocation7 + $0x3e8] sm:$0xf0] }
 0x26e   :  { %v6955_v13 = vld [vmem:[#allocation7 + $0x448] sm:$0xf] }
 0x26f   :  { %v7926_v41 = vld [vmem:[#allocation7 + $0x464] sm:$0xf0] }
 0x270   :  { %v7211_v17 = vld [vmem:[#allocation7 + $0x648] sm:$0xf]  ;;  %v6956_v26 = vor.u32 %v7926_v41, %v6955_v13 }
 0x271   :  { %v7990_v18 = vld [vmem:[#allocation7 + $0x664] sm:$0xf0] }
 0x2ca   :  { %v2801_v32 = vpop.f32.mrf.mxu0  ;;  %v2814_v37 = vpop.f32.mrf.mxu1 }
 0x2cb   :  { %v2802_v7 = vadd.f32 %v2801_v32, %v2624_v30  ;;  %v2815_v39 = vadd.f32 %v2814_v37, %v2625_v31  ;;  %v6507_v30 = vld [vmem:[#allocation7 + $0xc8] sm:$0xf] }
 0x2cc   :  { %v7814_v31 = vld [vmem:[#allocation7 + $0xe4] sm:$0xf0] }
 0x2cd   :  { %v2844_v44 = vmax.f32 %v2802_v7, 0.0  ;;  %v2845_v45 = vmax.f32 %v2815_v39, 0.0  ;;  %v6763_v32 = vld [vmem:[#allocation7 + $0x2c8] sm:$0xf]  ;;  %v7340_v7 = vor.u32 %v8022_v29, %v7339_v27  ;;  %v7212_v27 = vor.u32 %v7990_v18, %v7211_v17  ;;  %v6861_v29 = vld [vmem:[#allocation7 + $0x3a8] sm:$0xf0] }
 0x2ce   :  { %v7878_v37 = vld [vmem:[#allocation7 + $0x2e4] sm:$0xf0]  ;;  %v7802_v17 = vld [vmem:[#allocation7 + $0x8c] sm:$0xf] }
 0x2cf   :  { %v8419_v52 = vpack.c.bf16 %v2844_v44, %v2844_v44  ;;  %v8421_v53 = vpack.c.bf16 %v2845_v45, %v2845_v45  ;;  %v7051_v39 = vld [vmem:[#allocation7 + $0x508] sm:$0xf]  ;;  %v6508_v44 = vor.u32 %v7814_v31, %v6507_v30  ;;  %v6764_v45 = vor.u32 %v7878_v37, %v6763_v32  ;;  %v6477_v18 = vld [vmem:[#allocation7 + $0xa8] sm:$0xf0] }
 0x2d0   :  { %v7052_v50 = vor.u32 %v7950_v40, %v7051_v39  ;;  %v6923_v30 = vld [vmem:[#allocation7 + $0x408] sm:$0xf]  ;;  %v8034_v39 = vld [vmem:[#allocation7 + $0x7cc] sm:$0xf] }
 0x2d1   :  { %v2827_v56 = vpop.f32.mrf.mxu2  ;;  %v2840_v57 = vpop.f32.mrf.mxu3  ;;  %4414 = vmatmul.bf16.vlgmr.msrb.gmra.mxu0 %v8419_v52  ;;  %4427 = vmatmul.bf16.vlgmr.msrb.gmra.mxu1 %v8421_v53  ;;  %v7918_v31 = vld [vmem:[#allocation7 + $0x424] sm:$0xf0]  ;;  %v7405_v40 = vld [vmem:[#allocation7 + $0x7e8] sm:$0xf0] }
 0x2d2   :  { %v2828_v62 = vadd.f32 %v2827_v56, %v2626_v46  ;;  %v2841_v8 = vadd.f32 %v2840_v57, %v2627_v33  ;;  %4510 = vmatpush.bf16.msrb.mxu0 %v6636_v47  ;;  %4523 = vmatpush.bf16.msrb.mxu1 %v6892_v49  ;;  %v2803_v63 = vpop.f32.mrf.mxu0  ;;  %v2816_v0 = vpop.f32.mrf.mxu1  ;;  %v6475_v46 = vld [vmem:[#allocation7 + $0x88] sm:$0xf] }
 0x2d3   :  { %v7806_v33 = vld [vmem:[#allocation7 + $0xa4] sm:$0xf0]  ;;  %v7020_v63 = vor.u32 %v7942_v55, %v7019_v54  ;;  %v7962_v54 = vld [vmem:[#allocation7 + $0x58c] sm:$0xf] }
 0x2d4   :  { %v2846_v25 = vmax.f32 %v2828_v62, 0.0  ;;  %v2847_v14 = vmax.f32 %v2841_v8, 0.0  ;;  %v6731_v47 = vld [vmem:[#allocation7 + $0x288] sm:$0xf]  ;;  %v7117_v55 = vld [vmem:[#allocation7 + $0x5a8] sm:$0xf0] }
 0x2d5   :  { %v7870_v49 = vld [vmem:[#allocation7 + $0x2a4] sm:$0xf0] }
 0x2d6   :  { %v8425_v10 = vpack.c.bf16 %v2846_v25, %v2846_v25  ;;  %v8427_v11 = vpack.c.bf16 %v2847_v14, %v2847_v14  ;;  %4511 = vmatpush.bf16.msrb.mxu0 %v6604_v58  ;;  %4524 = vmatpush.bf16.msrb.mxu1 %v6860_v1  ;;  %v7275_v56 = vld [vmem:[#allocation7 + $0x6c8] sm:$0xf]  ;;  %v6476_v58 = vor.u32 %v7806_v33, %v6475_v46  ;;  %v6573_v33 = vld [vmem:[#allocation7 + $0x168] sm:$0xf0] }
 0x2d7   :  { %v8006_v57 = vld [vmem:[#allocation7 + $0x6e4] sm:$0xf0]  ;;  %v6732_v59 = vor.u32 %v7870_v49, %v6731_v47  ;;  %v7890_v47 = vld [vmem:[#allocation7 + $0x34c] sm:$0xf] }
 0x2d8   :  { %4440 = vmatmul.bf16.vlgmr.msrb.gmra.mxu2 %v8425_v10  ;;  %4453 = vmatmul.bf16.vlgmr.msrb.gmra.mxu3 %v8427_v11  ;;  %v6699_v62 = vld [vmem:[#allocation7 + $0x248] sm:$0xf]  ;;  %v7276_v0 = vor.u32 %v8006_v57, %v7275_v56  ;;  %v6829_v49 = vld [vmem:[#allocation7 + $0x368] sm:$0xf0] }
 0x2d9   :  { %4536 = vmatpush.bf16.msrb.mxu2 %v7148_v36  ;;  %4549 = vmatpush.bf16.msrb.mxu3 %v7404_v5  ;;  %v2829_v19 = vpop.f32.mrf.mxu2  ;;  %v2842_v20 = vpop.f32.mrf.mxu3  ;;  %v7862_v8 = vld [vmem:[#allocation7 + $0x264] sm:$0xf0]  ;;  %v8026_v56 = vld [vmem:[#allocation7 + $0x78c] sm:$0xf] }
 0x2da   :  { %4512 = vmatpush.bf16.msrb.mxu0 %v6572_v28  ;;  %4525 = vmatpush.bf16.msrb.mxu1 %v6828_v12  ;;  %v6987_v1 = vld [vmem:[#allocation7 + $0x488] sm:$0xf]  ;;  %v6700_v15 = vor.u32 %v7862_v8, %v6699_v62  ;;  %v7842_v28 = vld [vmem:[#allocation7 + $0x1cc] sm:$0xf]  ;;  %v7244_v12 = vor.u32 %v7998_v9, %v7243_v3 }
 0x2db   :  { %v6411_v25 = vld [vmem:[#allocation7 + $0x8] sm:$0xf]  ;;  %v6988_v43 = vor.u32 %v7934_v2, %v6987_v1  ;;  %v7373_v57 = vld [vmem:[#allocation7 + $0x7a8] sm:$0xf0] }
 0x2dc   :  { %v7790_v14 = vld [vmem:[#allocation7 + $0x24] sm:$0xf0]  ;;  %v7882_v62 = vld [vmem:[#allocation7 + $0x30c] sm:$0xf] }
 0x2dd   :  { %4537 = vmatpush.bf16.msrb.mxu2 %v7116_v21  ;;  %4550 = vmatpush.bf16.msrb.mxu3 %v7372_v22  ;;  %v6667_v36 = vld [vmem:[#allocation7 + $0x208] sm:$0xf]  ;;  %v6412_v19 = vor.u32 %v7790_v14, %v6411_v25  ;;  %v6640_v21 = vor.u32 %v7842_v28, %v6637_v34  ;;  %v6896_v22 = vor.u32 %v7906_v42, %v6893_v16  ;;  %v6797_v8 = vld [vmem:[#allocation7 + $0x328] sm:$0xf0] }
 0x2de   :  { %4513 = vmatpush.bf16.msrb.mxu0 %v6540_v23  ;;  %4526 = vmatpush.bf16.msrb.mxu1 %v6796_v24  ;;  %v7854_v5 = vld [vmem:[#allocation7 + $0x224] sm:$0xf0]  ;;  %v6605_v23 = vld [vmem:[#allocation7 + $0x1a8] sm:$0xf0] }
 0x2df   :  { %v6668_v20 = vor.u32 %v7854_v5, %v6667_v36  ;;  %v7898_v24 = vld [vmem:[#allocation7 + $0x38c] sm:$0xf]  ;;  %v7179_v32 = vld [vmem:[#allocation7 + $0x608] sm:$0xf]  ;;  %v6608_v48 = vor.u32 %v7834_v4, %v6605_v23 }
 0x2e0   :  { %v7982_v37 = vld [vmem:[#allocation7 + $0x624] sm:$0xf0]  ;;  %v6864_v38 = vor.u32 %v7898_v24, %v6861_v29  ;;  %v7954_v1 = vld [vmem:[#allocation7 + $0x54c] sm:$0xf] }
 0x2e1   :  { %4538 = vmatpush.bf16.msrb.mxu2 %v7084_v35  ;;  %4551 = vmatpush.bf16.msrb.mxu3 %v7340_v7  ;;  %v7970_v35 = vld [vmem:[#allocation7 + $0x5cc] sm:$0xf]  ;;  %v7180_v46 = vor.u32 %v7982_v37, %v7179_v32 }
 0x2e2   :  { %4466 = vmatmul.bf16.vlgmr.msra.gmra.mxu0 %v8419_v52  ;;  %4479 = vmatmul.bf16.vlgmr.msra.gmra.mxu1 %v8421_v53  ;;  %v7149_v7 = vld [vmem:[#allocation7 + $0x5e8] sm:$0xf0] }
 0x2e3   :  { %4514 = vmatpush.bf16.msrb.mxu0 %v6508_v44  ;;  %4527 = vmatpush.bf16.msrb.mxu1 %v6764_v45  ;;  %v7826_v44 = vld [vmem:[#allocation7 + $0x14c] sm:$0xf]  ;;  %v6924_v45 = vor.u32 %v7918_v31, %v6923_v30 }
 0x2e4   :  { %v7085_v2 = vld [vmem:[#allocation7 + $0x568] sm:$0xf0] }
 0x2e5   :  { %4539 = vmatpush.bf16.msrb.mxu2 %v7052_v50  ;;  %4552 = vmatpush.bf16.msrb.mxu3 %v7308_v51  ;;  %v7152_v50 = vor.u32 %v7970_v35, %v7149_v7  ;;  %v7408_v51 = vor.u32 %v8034_v39, %v7405_v40  ;;  %v8018_v3 = vld [vmem:[#allocation7 + $0x74c] sm:$0xf]  ;;  %v7088_v28 = vor.u32 %v7954_v1, %v7085_v2  ;;  %v6611_v1 = vld [vmem:[#allocation7 + $0x190] sm:$0xf] }
 0x2e6   :  { %v7341_v9 = vld [vmem:[#allocation7 + $0x768] sm:$0xf0]  ;;  %v7839_v2 = vld [vmem:[#allocation7 + $0x1ac] sm:$0xf0] }
 0x2e7   :  { %4515 = vmatpush.bf16.msrb.mxu0 %v6476_v58  ;;  %4528 = vmatpush.bf16.msrb.mxu1 %v6732_v59  ;;  %v6576_v58 = vor.u32 %v7826_v44, %v6573_v33  ;;  %v6832_v59 = vor.u32 %v7890_v47, %v6829_v49  ;;  %v7810_v25 = vld [vmem:[#allocation7 + $0xcc] sm:$0xf]  ;;  %v7344_v34 = vor.u32 %v8018_v3, %v7341_v9  ;;  %v6867_v3 = vld [vmem:[#allocation7 + $0x390] sm:$0xf] }
 0x2e8   :  { %4492 = vmatmul.bf16.vlgmr.msra.gmra.mxu2 %v8425_v10  ;;  %4505 = vmatmul.bf16.vlgmr.msra.gmra.mxu3 %v8427_v11  ;;  %v6509_v14 = vld [vmem:[#allocation7 + $0xe8] sm:$0xf0] }
 0x2e9   :  { %4540 = vmatpush.bf16.msrb.mxu2 %v7020_v63  ;;  %4553 = vmatpush.bf16.msrb.mxu3 %v7276_v0  ;;  %v7120_v63 = vor.u32 %v7962_v54, %v7117_v55  ;;  %v7376_v0 = vor.u32 %v8026_v56, %v7373_v57  ;;  %v7874_v36 = vld [vmem:[#allocation7 + $0x2cc] sm:$0xf]  ;;  %v6512_v13 = vor.u32 %v7810_v25, %v6509_v14  ;;  %v6899_v56 = vld [vmem:[#allocation7 + $0x3d0] sm:$0xf] }
 0x2ea   :  { %v6765_v5 = vld [vmem:[#allocation7 + $0x2e8] sm:$0xf0]  ;;  %v7911_v57 = vld [vmem:[#allocation7 + $0x3ec] sm:$0xf0] }
 0x2eb   :  { %4516 = vmatpush.bf16.msrb.mxu0 %v6444_v6  ;;  %4529 = vmatpush.bf16.msrb.mxu1 %v6700_v15  ;;  %v6544_v6 = vor.u32 %v7818_v60, %v6541_v61  ;;  %v6800_v15 = vor.u32 %v7882_v62, %v6797_v8  ;;  %v8010_v42 = vld [vmem:[#allocation7 + $0x70c] sm:$0xf]  ;;  %v6768_v41 = vor.u32 %v7874_v36, %v6765_v5 }
 0x2ec   :  { %v7309_v16 = vld [vmem:[#allocation7 + $0x728] sm:$0xf0] }
 0x2ed   :  { %4541 = vmatpush.bf16.msrb.mxu2 %v6988_v43  ;;  %4554 = vmatpush.bf16.msrb.mxu3 %v7244_v12  ;;  %v7946_v43 = vld [vmem:[#allocation7 + $0x50c] sm:$0xf] }
 0x2ee   :  { %v7053_v12 = vld [vmem:[#allocation7 + $0x528] sm:$0xf0] }
 0x2ef   :  { %4517 = vmatpush.bf16.msrb.mxu0 %v6412_v19  ;;  %4530 = vmatpush.bf16.msrb.mxu1 %v6668_v20  ;;  %v7866_v19 = vld [vmem:[#allocation7 + $0x28c] sm:$0xf] }
 0x2f0   :  { %v6733_v20 = vld [vmem:[#allocation7 + $0x2a8] sm:$0xf0] }
 0x2f1   :  { %4542 = vmatpush.bf16.msrb.mxu2 %v6956_v26  ;;  %4555 = vmatpush.bf16.msrb.mxu3 %v7212_v27  ;;  %v7938_v4 = vld [vmem:[#allocation7 + $0x4cc] sm:$0xf]  ;;  %v6480_v27 = vor.u32 %v7802_v17, %v6477_v18  ;;  %v6736_v29 = vor.u32 %v7866_v19, %v6733_v20  ;;  %v6579_v17 = vld [vmem:[#allocation7 + $0x150] sm:$0xf] }
 0x2f2   :  { %4518 = vmatmul.bf16.vlgmr.msrb.gmra.mxu0 %v8419_v52  ;;  %4531 = vmatmul.bf16.vlgmr.msrb.gmra.mxu1 %v8421_v53  ;;  %v7021_v23 = vld [vmem:[#allocation7 + $0x4e8] sm:$0xf0]  ;;  %v7831_v18 = vld [vmem:[#allocation7 + $0x16c] sm:$0xf0] }
 0x2f3   :  { %4562 = vmatpush.bf16.msra.mxu0 %v6640_v21  ;;  %4575 = vmatpush.bf16.msra.mxu1 %v6896_v22  ;;  %v7056_v21 = vor.u32 %v7946_v43, %v7053_v12  ;;  %v7312_v22 = vor.u32 %v8010_v42, %v7309_v16  ;;  %v8002_v24 = vld [vmem:[#allocation7 + $0x6cc] sm:$0xf]  ;;  %v7024_v35 = vor.u32 %v7938_v4, %v7021_v23  ;;  %v7411_v43 = vld [vmem:[#allocation7 + $0x7d0] sm:$0xf] }
 0x2f4   :  { %v7277_v26 = vld [vmem:[#allocation7 + $0x6e8] sm:$0xf0]  ;;  %v8039_v12 = vld [vmem:[#allocation7 + $0x7ec] sm:$0xf0]  ;;  %v6612_v42 = vor.u32 %v7839_v2, %v6611_v1 }
 0x2f5   :  { %4543 = vmatpush.bf16.msrb.mxu2 %v6924_v45  ;;  %4556 = vmatpush.bf16.msrb.mxu3 %v7180_v46  ;;  %v7794_v30 = vld [vmem:[#allocation7 + $0x4c] sm:$0xf]  ;;  %v7280_v7 = vor.u32 %v8002_v24, %v7277_v26  ;;  %v7412_v20 = vor.u32 %v8039_v12, %v7411_v43  ;;  %v7123_v4 = vld [vmem:[#allocation7 + $0x590] sm:$0xf] }
 0x2f6   :  { %v6445_v31 = vld [vmem:[#allocation7 + $0x68] sm:$0xf0]  ;;  %v7967_v23 = vld [vmem:[#allocation7 + $0x5ac] sm:$0xf0] }
 0x2f7   :  { %4563 = vmatpush.bf16.msra.mxu0 %v6608_v48  ;;  %4576 = vmatpush.bf16.msra.mxu1 %v6864_v38  ;;  %v7858_v32 = vld [vmem:[#allocation7 + $0x24c] sm:$0xf]  ;;  %v6448_v44 = vor.u32 %v7794_v30, %v6445_v31  ;;  %v7379_v24 = vld [vmem:[#allocation7 + $0x790] sm:$0xf] }
 0x2f8   :  { %4544 = vmatmul.bf16.vlgmr.msrb.gmra.mxu2 %v8425_v10  ;;  %4557 = vmatmul.bf16.vlgmr.msrb.gmra.mxu3 %v8427_v11  ;;  %v6701_v37 = vld [vmem:[#allocation7 + $0x268] sm:$0xf0]  ;;  %v8031_v26 = vld [vmem:[#allocation7 + $0x7ac] sm:$0xf0] }
 0x2f9   :  { %4588 = vmatpush.bf16.msra.mxu2 %v7152_v50  ;;  %4601 = vmatpush.bf16.msra.mxu3 %v7408_v51  ;;  %v7930_v39 = vld [vmem:[#allocation7 + $0x48c] sm:$0xf]  ;;  %v6704_v45 = vor.u32 %v7858_v32, %v6701_v37  ;;  %v6643_v50 = vld [vmem:[#allocation7 + $0x1d0] sm:$0xf]  ;;  %v7124_v32 = vor.u32 %v7967_v23, %v7123_v4  ;;  %v7380_v37 = vor.u32 %v8031_v26, %v7379_v24  ;;  %v7843_v4 = vld [vmem:[#allocation7 + $0x1d4] sm:$0xf] }
 0x2fa   :  { %v6989_v40 = vld [vmem:[#allocation7 + $0x4a8] sm:$0xf0]  ;;  %v7847_v51 = vld [vmem:[#allocation7 + $0x1ec] sm:$0xf0]  ;;  %v6645_v23 = vld [vmem:[#allocation7 + $0x1f0] sm:$0xf0] }
 0x2fb   :  { %4564 = vmatpush.bf16.msra.mxu0 %v6576_v58  ;;  %4577 = vmatpush.bf16.msra.mxu1 %v6832_v59  ;;  %v7994_v48 = vld [vmem:[#allocation7 + $0x68c] sm:$0xf]  ;;  %v6992_v54 = vor.u32 %v7930_v39, %v6989_v40  ;;  %v6547_v30 = vld [vmem:[#allocation7 + $0x110] sm:$0xf]  ;;  %v7907_v24 = vld [vmem:[#allocation7 + $0x3d4] sm:$0xf] }
 0x2fc   :  { %v7245_v38 = vld [vmem:[#allocation7 + $0x6a8] sm:$0xf0]  ;;  %v7823_v31 = vld [vmem:[#allocation7 + $0x12c] sm:$0xf0]  ;;  %v6901_v26 = vld [vmem:[#allocation7 + $0x3f0] sm:$0xf0] }
 0x2fd   :  { %4589 = vmatpush.bf16.msra.mxu2 %v7120_v63  ;;  %4602 = vmatpush.bf16.msra.mxu3 %v7376_v0  ;;  %v7786_v46 = vld [vmem:[#allocation7 + $0xc] sm:$0xf]  ;;  %v7248_v55 = vor.u32 %v7994_v48, %v7245_v38  ;;  %v6644_v63 = vor.u32 %v7847_v51, %v6643_v50  ;;  %v6900_v0 = vor.u32 %v7911_v57, %v6899_v56  ;;  %v7091_v39 = vld [vmem:[#allocation7 + $0x550] sm:$0xf] }
 0x2fe   :  { %v6413_v33 = vld [vmem:[#allocation7 + $0x28] sm:$0xf0]  ;;  %v7959_v40 = vld [vmem:[#allocation7 + $0x56c] sm:$0xf0] }
 0x2ff   :  { %4565 = vmatpush.bf16.msra.mxu0 %v6544_v6  ;;  %4578 = vmatpush.bf16.msra.mxu1 %v6800_v15  ;;  %v7850_v47 = vld [vmem:[#allocation7 + $0x20c] sm:$0xf]  ;;  %v6416_v62 = vor.u32 %v7786_v46, %v6413_v33  ;;  %v7903_v15 = vld [vmem:[#allocation7 + $0x3ac] sm:$0xf0] }
 0x300   :  { %v6669_v49 = vld [vmem:[#allocation7 + $0x228] sm:$0xf0]  ;;  %v6868_v16 = vor.u32 %v7903_v15, %v6867_v3  ;;  %v7347_v48 = vld [vmem:[#allocation7 + $0x750] sm:$0xf] }
 0x301   :  { %4590 = vmatpush.bf16.msra.mxu2 %v7088_v28  ;;  %4603 = vmatpush.bf16.msra.mxu3 %v7344_v34  ;;  %v7922_v58 = vld [vmem:[#allocation7 + $0x44c] sm:$0xf]  ;;  %v6672_v8 = vor.u32 %v7850_v47, %v6669_v49  ;;  %v7155_v28 = vld [vmem:[#allocation7 + $0x5d0] sm:$0xf]  ;;  %v7092_v47 = vor.u32 %v7959_v40, %v7091_v39  ;;  %v7835_v39 = vld [vmem:[#allocation7 + $0x194] sm:$0xf] }
 0x302   :  { %v6957_v59 = vld [vmem:[#allocation7 + $0x468] sm:$0xf0]  ;;  %v7975_v34 = vld [vmem:[#allocation7 + $0x5ec] sm:$0xf0]  ;;  %v6613_v40 = vld [vmem:[#allocation7 + $0x1b0] sm:$0xf0] }
 0x303   :  { %4566 = vmatpush.bf16.msra.mxu0 %v6512_v13  ;;  %4579 = vmatpush.bf16.msra.mxu1 %v6768_v41  ;;  %v7986_v60 = vld [vmem:[#allocation7 + $0x64c] sm:$0xf]  ;;  %v6960_v9 = vor.u32 %v7922_v58, %v6957_v59  ;;  %v7156_v19 = vor.u32 %v7975_v34, %v7155_v28  ;;  %v8023_v38 = vld [vmem:[#allocation7 + $0x76c] sm:$0xf0] }
 0x304   :  { %v7213_v61 = vld [vmem:[#allocation7 + $0x668] sm:$0xf0]  ;;  %v6515_v46 = vld [vmem:[#allocation7 + $0xd0] sm:$0xf]  ;;  %v7348_v49 = vor.u32 %v8023_v38, %v7347_v48  ;;  %v7899_v48 = vld [vmem:[#allocation7 + $0x394] sm:$0xf] }
 0x305   :  { %4591 = vmatpush.bf16.msra.mxu2 %v7056_v21  ;;  %4604 = vmatpush.bf16.msra.mxu3 %v7312_v22  ;;  %v7216_v6 = vor.u32 %v7986_v60, %v7213_v61  ;;  %v7914_v25 = vld [vmem:[#allocation7 + $0x40c] sm:$0xf]  ;;  %v6835_v21 = vld [vmem:[#allocation7 + $0x350] sm:$0xf] }
 0x306   :  { %v6925_v14 = vld [vmem:[#allocation7 + $0x428] sm:$0xf0]  ;;  %v7895_v22 = vld [vmem:[#allocation7 + $0x36c] sm:$0xf0] }
 0x307   :  { %4567 = vmatpush.bf16.msra.mxu0 %v6480_v27  ;;  %4580 = vmatpush.bf16.msra.mxu1 %v6736_v29  ;;  %v7978_v36 = vld [vmem:[#allocation7 + $0x60c] sm:$0xf]  ;;  %v6928_v13 = vor.u32 %v7914_v25, %v6925_v14  ;;  %v6580_v27 = vor.u32 %v7831_v18, %v6579_v17  ;;  %v6836_v29 = vor.u32 %v7895_v22, %v6835_v21  ;;  %v7815_v33 = vld [vmem:[#allocation7 + $0xec] sm:$0xf0] }
 0x308   :  { %v7181_v5 = vld [vmem:[#allocation7 + $0x628] sm:$0xf0]  ;;  %v6771_v50 = vld [vmem:[#allocation7 + $0x2d0] sm:$0xf]  ;;  %v6516_v58 = vor.u32 %v7815_v33, %v6515_v46 }
 0x309   :  { %4592 = vmatpush.bf16.msra.mxu2 %v7024_v35  ;;  %4605 = vmatpush.bf16.msra.mxu3 %v7280_v7  ;;  %v7184_v41 = vor.u32 %v7978_v36, %v7181_v5  ;;  %v6803_v35 = vld [vmem:[#allocation7 + $0x310] sm:$0xf] }
 0x30a   :  { %v7887_v7 = vld [vmem:[#allocation7 + $0x32c] sm:$0xf0] }
 0x30b   :  { %4568 = vmatpush.bf16.msra.mxu0 %v6448_v44  ;;  %4581 = vmatpush.bf16.msra.mxu1 %v6704_v45  ;;  %v6548_v44 = vor.u32 %v7823_v31, %v6547_v30  ;;  %v6804_v45 = vor.u32 %v7887_v7, %v6803_v35  ;;  %v7879_v51 = vld [vmem:[#allocation7 + $0x2ec] sm:$0xf0]  ;;  %v6648_v35 = vor.u32 %v7843_v4, %v6645_v23  ;;  %v7947_v4 = vld [vmem:[#allocation7 + $0x514] sm:$0xf] }
 0x30c   :  { %v7315_v56 = vld [vmem:[#allocation7 + $0x710] sm:$0xf]  ;;  %v6772_v59 = vor.u32 %v7879_v51, %v6771_v50  ;;  %v6904_v7 = vor.u32 %v7907_v24, %v6901_v26  ;;  %v7971_v50 = vld [vmem:[#allocation7 + $0x5d4] sm:$0xf] }
 0x30d   :  { %4593 = vmatpush.bf16.msra.mxu2 %v6992_v54  ;;  %4606 = vmatpush.bf16.msra.mxu3 %v7248_v55  ;;  %v7059_v54 = vld [vmem:[#allocation7 + $0x510] sm:$0xf]  ;;  %v7157_v51 = vld [vmem:[#allocation7 + $0x5f0] sm:$0xf0] }
 0x30e   :  { %v7951_v55 = vld [vmem:[#allocation7 + $0x52c] sm:$0xf0]  ;;  %v7061_v23 = vld [vmem:[#allocation7 + $0x530] sm:$0xf0] }
 0x30f   :  { %4569 = vmatpush.bf16.msra.mxu0 %v6416_v62  ;;  %4582 = vmatpush.bf16.msra.mxu1 %v6672_v8  ;;  %v8015_v57 = vld [vmem:[#allocation7 + $0x72c] sm:$0xf0]  ;;  %v7060_v62 = vor.u32 %v7951_v55, %v7059_v54  ;;  %v8035_v54 = vld [vmem:[#allocation7 + $0x7d4] sm:$0xf] }
 0x310   :  { %v6483_v60 = vld [vmem:[#allocation7 + $0x90] sm:$0xf]  ;;  %v7316_v8 = vor.u32 %v8015_v57, %v7315_v56  ;;  %v7413_v55 = vld [vmem:[#allocation7 + $0x7f0] sm:$0xf0]  ;;  %v6616_v56 = vor.u32 %v7835_v39, %v6613_v40 }
 0x311   :  { %4594 = vmatpush.bf16.msra.mxu2 %v6960_v9  ;;  %4607 = vmatpush.bf16.msra.mxu3 %v7216_v6  ;;  %v7807_v61 = vld [vmem:[#allocation7 + $0xac] sm:$0xf0]  ;;  %v8011_v24 = vld [vmem:[#allocation7 + $0x714] sm:$0xf] }
 0x312   :  { %4570 = vmatmul.bf16.vlgmr.msra.gmra.mxu0 %v8419_v52  ;;  %4583 = vmatmul.bf16.vlgmr.msra.gmra.mxu1 %v8421_v53  ;;  %v7027_v1 = vld [vmem:[#allocation7 + $0x4d0] sm:$0xf]  ;;  %v6484_v6 = vor.u32 %v7807_v61, %v6483_v60  ;;  %v7827_v60 = vld [vmem:[#allocation7 + $0x154] sm:$0xf] }
 0x313   :  { %4614 = vmatpush.bf16.msrb.mxu0 %v6644_v63  ;;  %4627 = vmatpush.bf16.msrb.mxu1 %v6900_v0  ;;  %v6739_v63 = vld [vmem:[#allocation7 + $0x290] sm:$0xf]  ;;  %v6581_v61 = vld [vmem:[#allocation7 + $0x170] sm:$0xf0] }
 0x314   :  { %v7871_v0 = vld [vmem:[#allocation7 + $0x2ac] sm:$0xf0]  ;;  %v7317_v26 = vld [vmem:[#allocation7 + $0x730] sm:$0xf0] }
 0x315   :  { %4595 = vmatpush.bf16.msra.mxu2 %v6928_v13  ;;  %4608 = vmatpush.bf16.msra.mxu3 %v7184_v41  ;;  %v7943_v2 = vld [vmem:[#allocation7 + $0x4ec] sm:$0xf0]  ;;  %v6740_v15 = vor.u32 %v7871_v0, %v6739_v63  ;;  %v7891_v63 = vld [vmem:[#allocation7 + $0x354] sm:$0xf] }
 0x316   :  { %v7283_v3 = vld [vmem:[#allocation7 + $0x6d0] sm:$0xf]  ;;  %v7028_v36 = vor.u32 %v7943_v2, %v7027_v1  ;;  %v6837_v0 = vld [vmem:[#allocation7 + $0x370] sm:$0xf0] }
 0x317   :  { %4615 = vmatpush.bf16.msrb.mxu0 %v6612_v42  ;;  %4628 = vmatpush.bf16.msrb.mxu1 %v6868_v16  ;;  %v8007_v9 = vld [vmem:[#allocation7 + $0x6ec] sm:$0xf0]  ;;  %v7963_v1 = vld [vmem:[#allocation7 + $0x594] sm:$0xf] }
 0x318   :  { %4596 = vmatmul.bf16.vlgmr.msra.gmra.mxu2 %v8425_v10  ;;  %4609 = vmatmul.bf16.vlgmr.msra.gmra.mxu3 %v8427_v11  ;;  %v6451_v25 = vld [vmem:[#allocation7 + $0x50] sm:$0xf]  ;;  %v7284_v5 = vor.u32 %v8007_v9, %v7283_v3  ;;  %v7125_v2 = vld [vmem:[#allocation7 + $0x5b0] sm:$0xf0] }
 0x319   :  { %4640 = vmatpush.bf16.msrb.mxu2 %v7156_v19  ;;  %4653 = vmatpush.bf16.msrb.mxu3 %v7412_v20  ;;  %v7799_v14 = vld [vmem:[#allocation7 + $0x6c] sm:$0xf0]  ;;  %v8027_v3 = vld [vmem:[#allocation7 + $0x794] sm:$0xf] }
 0x31a   :  { %v6707_v28 = vld [vmem:[#allocation7 + $0x250] sm:$0xf]  ;;  %v6452_v13 = vor.u32 %v7799_v14, %v6451_v25  ;;  %v7381_v9 = vld [vmem:[#allocation7 + $0x7b0] sm:$0xf0] }
 0x31b   :  { %4616 = vmatpush.bf16.msrb.mxu0 %v6580_v27  ;;  %4629 = vmatpush.bf16.msrb.mxu1 %v6836_v29  ;;  %v7863_v34 = vld [vmem:[#allocation7 + $0x26c] sm:$0xf0]  ;;  %v7819_v25 = vld [vmem:[#allocation7 + $0x114] sm:$0xf] }
 0x31c   :  { %v6995_v43 = vld [vmem:[#allocation7 + $0x490] sm:$0xf]  ;;  %v6708_v41 = vor.u32 %v7863_v34, %v6707_v28  ;;  %v6549_v14 = vld [vmem:[#allocation7 + $0x130] sm:$0xf0] }
 0x31d   :  { %4641 = vmatpush.bf16.msrb.mxu2 %v7124_v32  ;;  %4654 = vmatpush.bf16.msrb.mxu3 %v7380_v37  ;;  %v7935_v12 = vld [vmem:[#allocation7 + $0x4ac] sm:$0xf0]  ;;  %v7883_v28 = vld [vmem:[#allocation7 + $0x314] sm:$0xf] }
 0x31e   :  { %v7251_v42 = vld [vmem:[#allocation7 + $0x690] sm:$0xf]  ;;  %v6996_v20 = vor.u32 %v7935_v12, %v6995_v43  ;;  %v6805_v34 = vld [vmem:[#allocation7 + $0x330] sm:$0xf0] }
 0x31f   :  { %4617 = vmatpush.bf16.msrb.mxu0 %v6548_v44  ;;  %4630 = vmatpush.bf16.msrb.mxu1 %v6804_v45  ;;  %v7999_v16 = vld [vmem:[#allocation7 + $0x6ac] sm:$0xf0]  ;;  %v6869_v45 = vld [vmem:[#allocation7 + $0x3b0] sm:$0xf0] }
 0x320   :  { %v6419_v17 = vld [vmem:[#allocation7 + $0x10] sm:$0xf]  ;;  %v7252_v21 = vor.u32 %v7999_v16, %v7251_v42  ;;  %v6872_v57 = vor.u32 %v7899_v48, %v6869_v45  ;;  %v7955_v43 = vld [vmem:[#allocation7 + $0x554] sm:$0xf] }
 0x321   :  { %4642 = vmatpush.bf16.msrb.mxu2 %v7092_v47  ;;  %4655 = vmatpush.bf16.msrb.mxu3 %v7348_v49  ;;  %v7791_v18 = vld [vmem:[#allocation7 + $0x2c] sm:$0xf0]  ;;  %v7093_v12 = vld [vmem:[#allocation7 + $0x570] sm:$0xf0] }
 0x322   :  { %v6675_v19 = vld [vmem:[#allocation7 + $0x210] sm:$0xf]  ;;  %v6420_v32 = vor.u32 %v7791_v18, %v6419_v17  ;;  %v8019_v42 = vld [vmem:[#allocation7 + $0x754] sm:$0xf] }
 0x323   :  { %4618 = vmatpush.bf16.msrb.mxu0 %v6516_v58  ;;  %4631 = vmatpush.bf16.msrb.mxu1 %v6772_v59  ;;  %v7855_v22 = vld [vmem:[#allocation7 + $0x22c] sm:$0xf0]  ;;  %v7349_v16 = vld [vmem:[#allocation7 + $0x770] sm:$0xf0] }
 0x324   :  { %v6963_v27 = vld [vmem:[#allocation7 + $0x450] sm:$0xf]  ;;  %v6676_v37 = vor.u32 %v7855_v22, %v6675_v19  ;;  %v7811_v17 = vld [vmem:[#allocation7 + $0xd4] sm:$0xf]  ;;  %v7096_v19 = vor.u32 %v7955_v43, %v7093_v12  ;;  %v6619_v43 = vld [vmem:[#allocation7 + $0x198] sm:$0xf] }
 0x325   :  { %4643 = vmatpush.bf16.msrb.mxu2 %v7060_v62  ;;  %4656 = vmatpush.bf16.msrb.mxu3 %v7316_v8  ;;  %v7927_v29 = vld [vmem:[#allocation7 + $0x46c] sm:$0xf0]  ;;  %v7160_v62 = vor.u32 %v7971_v50, %v7157_v51  ;;  %v7416_v8 = vor.u32 %v8035_v54, %v7413_v55  ;;  %v6517_v18 = vld [vmem:[#allocation7 + $0xf0] sm:$0xf0]  ;;  %v7840_v12 = vld [vmem:[#allocation7 + $0x1b4] sm:$0xf0] }
 0x326   :  { %v7219_v30 = vld [vmem:[#allocation7 + $0x650] sm:$0xf]  ;;  %v6964_v38 = vor.u32 %v7927_v29, %v6963_v27  ;;  %v6773_v22 = vld [vmem:[#allocation7 + $0x2f0] sm:$0xf0]  ;;  %v6520_v27 = vor.u32 %v7811_v17, %v6517_v18 }
 0x327   :  { %4619 = vmatpush.bf16.msrb.mxu0 %v6484_v6  ;;  %4632 = vmatpush.bf16.msrb.mxu1 %v6740_v15  ;;  %v7991_v31 = vld [vmem:[#allocation7 + $0x66c] sm:$0xf0]  ;;  %v6584_v6 = vor.u32 %v7827_v60, %v6581_v61  ;;  %v6840_v15 = vor.u32 %v7891_v63, %v6837_v0  ;;  %v7939_v39 = vld [vmem:[#allocation7 + $0x4d4] sm:$0xf] }
 0x328   :  { %v7220_v44 = vor.u32 %v7991_v31, %v7219_v30  ;;  %v6931_v46 = vld [vmem:[#allocation7 + $0x410] sm:$0xf]  ;;  %v7803_v30 = vld [vmem:[#allocation7 + $0x94] sm:$0xf] }
 0x329   :  { %4644 = vmatpush.bf16.msrb.mxu2 %v7028_v36  ;;  %4657 = vmatpush.bf16.msrb.mxu3 %v7284_v5  ;;  %v7919_v33 = vld [vmem:[#allocation7 + $0x42c] sm:$0xf0]  ;;  %v7128_v36 = vor.u32 %v7963_v1, %v7125_v2  ;;  %v7384_v5 = vor.u32 %v8027_v3, %v7381_v9  ;;  %v6485_v31 = vld [vmem:[#allocation7 + $0xb0] sm:$0xf0]  ;;  %v6651_v1 = vld [vmem:[#allocation7 + $0x1d8] sm:$0xf] }
 0x32a   :  { %v7187_v47 = vld [vmem:[#allocation7 + $0x610] sm:$0xf]  ;;  %v6932_v58 = vor.u32 %v7919_v33, %v6931_v46  ;;  %v7029_v40 = vld [vmem:[#allocation7 + $0x4f0] sm:$0xf0]  ;;  %v7848_v2 = vld [vmem:[#allocation7 + $0x1f4] sm:$0xf0] }
 0x32b   :  { %4620 = vmatpush.bf16.msrb.mxu0 %v6452_v13  ;;  %4633 = vmatpush.bf16.msrb.mxu1 %v6708_v41  ;;  %v7983_v49 = vld [vmem:[#allocation7 + $0x62c] sm:$0xf0]  ;;  %v6552_v13 = vor.u32 %v7819_v25, %v6549_v14  ;;  %v6808_v41 = vor.u32 %v7883_v28, %v6805_v34  ;;  %v8003_v48 = vld [vmem:[#allocation7 + $0x6d4] sm:$0xf]  ;;  %v6907_v3 = vld [vmem:[#allocation7 + $0x3d8] sm:$0xf]  ;;  %v6652_v28 = vor.u32 %v7848_v2, %v6651_v1 }
 0x32c   :  { %v7188_v59 = vor.u32 %v7983_v49, %v7187_v47  ;;  %v7795_v46 = vld [vmem:[#allocation7 + $0x54] sm:$0xf]  ;;  %v7032_v47 = vor.u32 %v7939_v39, %v7029_v40  ;;  %v7912_v9 = vld [vmem:[#allocation7 + $0x3f4] sm:$0xf0] }
 0x32d   :  { %4645 = vmatpush.bf16.msrb.mxu2 %v6996_v20  ;;  %4658 = vmatpush.bf16.msrb.mxu3 %v7252_v21  ;;  %v7352_v20 = vor.u32 %v8019_v42, %v7349_v16  ;;  %v7875_v21 = vld [vmem:[#allocation7 + $0x2d4] sm:$0xf]  ;;  %v6908_v34 = vor.u32 %v7912_v9, %v6907_v3  ;;  %v6875_v42 = vld [vmem:[#allocation7 + $0x398] sm:$0xf] }
 0x32e   :  { %v6776_v29 = vor.u32 %v7875_v21, %v6773_v22  ;;  %v6453_v33 = vld [vmem:[#allocation7 + $0x70] sm:$0xf0]  ;;  %v7163_v21 = vld [vmem:[#allocation7 + $0x5d8] sm:$0xf] }
 0x32f   :  { %4621 = vmatpush.bf16.msrb.mxu0 %v6420_v32  ;;  %4634 = vmatpush.bf16.msrb.mxu1 %v6676_v37  ;;  %v7064_v32 = vor.u32 %v7947_v4, %v7061_v23  ;;  %v7320_v37 = vor.u32 %v8011_v24, %v7317_v26  ;;  %v7859_v50 = vld [vmem:[#allocation7 + $0x254] sm:$0xf]  ;;  %v7976_v22 = vld [vmem:[#allocation7 + $0x5f4] sm:$0xf0]  ;;  %v6620_v24 = vor.u32 %v7840_v12, %v6619_v43 }
 0x330   :  { %v6709_v51 = vld [vmem:[#allocation7 + $0x270] sm:$0xf0]  ;;  %v7419_v4 = vld [vmem:[#allocation7 + $0x7d8] sm:$0xf] }
 0x331   :  { %4646 = vmatpush.bf16.msrb.mxu2 %v6964_v38  ;;  %4659 = vmatpush.bf16.msrb.mxu3 %v7220_v44  ;;  %v7285_v38 = vld [vmem:[#allocation7 + $0x6f0] sm:$0xf0]  ;;  %v6488_v44 = vor.u32 %v7803_v30, %v6485_v31  ;;  %v8040_v23 = vld [vmem:[#allocation7 + $0x7f4] sm:$0xf0] }
 0x332   :  { %4622 = vmatmul.bf16.vlgmr.msrb.gmra.mxu0 %v8419_v52  ;;  %4635 = vmatmul.bf16.vlgmr.msrb.gmra.mxu1 %v8421_v53  ;;  %v7288_v49 = vor.u32 %v8003_v48, %v7285_v38  ;;  %v7931_v54 = vld [vmem:[#allocation7 + $0x494] sm:$0xf]  ;;  %v6587_v30 = vld [vmem:[#allocation7 + $0x158] sm:$0xf] }
 0x333   :  { %4666 = vmatpush.bf16.msra.mxu0 %v6648_v35  ;;  %4679 = vmatpush.bf16.msra.mxu1 %v6904_v7  ;;  %v7867_v35 = vld [vmem:[#allocation7 + $0x294] sm:$0xf]  ;;  %v7832_v31 = vld [vmem:[#allocation7 + $0x174] sm:$0xf0] }
 0x334   :  { %v6741_v7 = vld [vmem:[#allocation7 + $0x2b0] sm:$0xf0]  ;;  %v7131_v39 = vld [vmem:[#allocation7 + $0x598] sm:$0xf] }
 0x335   :  { %4647 = vmatpush.bf16.msrb.mxu2 %v6932_v58  ;;  %4660 = vmatpush.bf16.msrb.mxu3 %v7188_v59  ;;  %v6744_v45 = vor.u32 %v7867_v35, %v6741_v7  ;;  %v6997_v55 = vld [vmem:[#allocation7 + $0x4b0] sm:$0xf0]  ;;  %v6456_v58 = vor.u32 %v7795_v46, %v6453_v33  ;;  %v6712_v59 = vor.u32 %v7859_v50, %v6709_v51  ;;  %v6843_v35 = vld [vmem:[#allocation7 + $0x358] sm:$0xf]  ;;  %v8452_v46 = vld [vmem:[%s8528_s9] sm:$0xff] }
 0x336   :  { %v7787_v60 = vld [vmem:[#allocation7 + $0x14] sm:$0xf]  ;;  %v7896_v7 = vld [vmem:[#allocation7 + $0x374] sm:$0xf0] }
 0x337   :  { %4667 = vmatpush.bf16.msra.mxu0 %v6616_v56  ;;  %4680 = vmatpush.bf16.msra.mxu1 %v6872_v57  ;;  %v7995_v56 = vld [vmem:[#allocation7 + $0x694] sm:$0xf]  ;;  %v7968_v40 = vld [vmem:[#allocation7 + $0x5b4] sm:$0xf0] }
 0x338   :  { %4648 = vmatmul.bf16.vlgmr.msrb.gmra.mxu2 %v8425_v10  ;;  %4661 = vmatmul.bf16.vlgmr.msrb.gmra.mxu3 %v8427_v11  ;;  %v7253_v57 = vld [vmem:[#allocation7 + $0x6b0] sm:$0xf0]  ;;  %v7387_v48 = vld [vmem:[#allocation7 + $0x798] sm:$0xf]  ;;  %v7132_v51 = vor.u32 %v7968_v40, %v7131_v39 }
 0x339   :  { %4692 = vmatpush.bf16.msra.mxu2 %v7160_v62  ;;  %4705 = vmatpush.bf16.msra.mxu3 %v7416_v8  ;;  %v6421_v61 = vld [vmem:[#allocation7 + $0x30] sm:$0xf0]  ;;  %v7000_v8 = vor.u32 %v7931_v54, %v6997_v55  ;;  %v7256_v63 = vor.u32 %v7995_v56, %v7253_v57  ;;  %v8032_v38 = vld [vmem:[#allocation7 + $0x7b4] sm:$0xf0] }
 0x33a   :  { %v7851_v62 = vld [vmem:[#allocation7 + $0x214] sm:$0xf]  ;;  %v7824_v50 = vld [vmem:[#allocation7 + $0x134] sm:$0xf0]  ;;  %v7388_v54 = vor.u32 %v8032_v38, %v7387_v48 }
 0x33b   :  { %4668 = vmatpush.bf16.msra.mxu0 %v6584_v6  ;;  %4681 = vmatpush.bf16.msra.mxu1 %v6840_v15  ;;  %v6677_v0 = vld [vmem:[#allocation7 + $0x230] sm:$0xf0]  ;;  %v6811_v55 = vld [vmem:[#allocation7 + $0x318] sm:$0xf] }
 0x33c   :  { %v7923_v6 = vld [vmem:[#allocation7 + $0x454] sm:$0xf]  ;;  %v7888_v56 = vld [vmem:[#allocation7 + $0x334] sm:$0xf0] }
 0x33d   :  { %4693 = vmatpush.bf16.msra.mxu2 %v7128_v36  ;;  %4706 = vmatpush.bf16.msra.mxu3 %v7384_v5  ;;  %v6965_v15 = vld [vmem:[#allocation7 + $0x470] sm:$0xf0]  ;;  %v6424_v36 = vor.u32 %v7787_v60, %v6421_v61  ;;  %v6680_v5 = vor.u32 %v7851_v62, %v6677_v0  ;;  %v7099_v57 = vld [vmem:[#allocation7 + $0x558] sm:$0xf]  ;;  %v3110_v61 = vperm.slane %v8452_v46, 0 }
 0x33e   :  { %v7987_v25 = vld [vmem:[#allocation7 + $0x654] sm:$0xf]  ;;  %v6968_v16 = vor.u32 %v7923_v6, %v6965_v15  ;;  %v8024_v60 = vld [vmem:[#allocation7 + $0x774] sm:$0xf0] }
 0x33f   :  { %4669 = vmatpush.bf16.msra.mxu0 %v6552_v13  ;;  %4682 = vmatpush.bf16.msra.mxu1 %v6808_v41  ;;  %v7221_v14 = vld [vmem:[#allocation7 + $0x670] sm:$0xf0]  ;;  %v7904_v41 = vld [vmem:[#allocation7 + $0x3b4] sm:$0xf0] }
 0x340   :  { %v7224_v13 = vor.u32 %v7987_v25, %v7221_v14  ;;  %v7915_v17 = vld [vmem:[#allocation7 + $0x414] sm:$0xf]  ;;  %v6876_v26 = vor.u32 %v7904_v41, %v6875_v42  ;;  %v7816_v0 = vld [vmem:[#allocation7 + $0xf4] sm:$0xf0] }
 0x341   :  { %4694 = vmatpush.bf16.msra.mxu2 %v7096_v19  ;;  %4707 = vmatpush.bf16.msra.mxu3 %v7352_v20  ;;  %v6933_v18 = vld [vmem:[#allocation7 + $0x430] sm:$0xf0]  ;;  %v6779_v3 = vld [vmem:[#allocation7 + $0x2d8] sm:$0xf] }
 0x342   :  { %v7979_v19 = vld [vmem:[#allocation7 + $0x614] sm:$0xf]  ;;  %v7880_v9 = vld [vmem:[#allocation7 + $0x2f4] sm:$0xf0] }
 0x343   :  { %4670 = vmatpush.bf16.msra.mxu0 %v6520_v27  ;;  %4683 = vmatpush.bf16.msra.mxu1 %v6776_v29  ;;  %v7189_v20 = vld [vmem:[#allocation7 + $0x630] sm:$0xf0]  ;;  %v6936_v27 = vor.u32 %v7915_v17, %v6933_v18  ;;  %v7067_v6 = vld [vmem:[#allocation7 + $0x518] sm:$0xf] }
 0x344   :  { %v7192_v29 = vor.u32 %v7979_v19, %v7189_v20  ;;  %v7952_v15 = vld [vmem:[#allocation7 + $0x534] sm:$0xf0] }
 0x345   :  { %4695 = vmatpush.bf16.msra.mxu2 %v7064_v32  ;;  %4708 = vmatpush.bf16.msra.mxu3 %v7320_v37  ;;  %v7164_v32 = vor.u32 %v7976_v22, %v7163_v21  ;;  %v7420_v37 = vor.u32 %v8040_v23, %v7419_v4  ;;  %v7323_v25 = vld [vmem:[#allocation7 + $0x718] sm:$0xf] }
 0x346   :  { %v8016_v14 = vld [vmem:[#allocation7 + $0x734] sm:$0xf0] }
 0x347   :  { %4671 = vmatpush.bf16.msra.mxu0 %v6488_v44  ;;  %4684 = vmatpush.bf16.msra.mxu1 %v6744_v45  ;;  %v6588_v44 = vor.u32 %v7832_v31, %v6587_v30  ;;  %v6844_v45 = vor.u32 %v7896_v7, %v6843_v35  ;;  %v6491_v12 = vld [vmem:[#allocation7 + $0x98] sm:$0xf] }
 0x348   :  { %v7808_v42 = vld [vmem:[#allocation7 + $0xb4] sm:$0xf0] }
 0x349   :  { %4696 = vmatpush.bf16.msra.mxu2 %v7032_v47  ;;  %4709 = vmatpush.bf16.msra.mxu3 %v7288_v49  ;;  %v6555_v49 = vld [vmem:[#allocation7 + $0x118] sm:$0xf]  ;;  %v6492_v4 = vor.u32 %v7808_v42, %v6491_v12 }
 0x34a   :  { %v6556_v62 = vor.u32 %v7824_v50, %v6555_v49  ;;  %v6747_v41 = vld [vmem:[#allocation7 + $0x298] sm:$0xf] }
 0x34b   :  { %4672 = vmatpush.bf16.msra.mxu0 %v6456_v58  ;;  %4685 = vmatpush.bf16.msra.mxu1 %v6712_v59  ;;  %v7960_v58 = vld [vmem:[#allocation7 + $0x574] sm:$0xf0] }
 0x34c   :  { %v7355_v59 = vld [vmem:[#allocation7 + $0x758] sm:$0xf]  ;;  %v7100_v1 = vor.u32 %v7960_v58, %v7099_v57  ;;  %v7844_v57 = vld [vmem:[#allocation7 + $0x1dc] sm:$0xf] }
 0x34d   :  { %4697 = vmatpush.bf16.msra.mxu2 %v7000_v8  ;;  %4710 = vmatpush.bf16.msra.mxu3 %v7256_v63  ;;  %v6812_v8 = vor.u32 %v7888_v56, %v6811_v55  ;;  %v6523_v63 = vld [vmem:[#allocation7 + $0xd8] sm:$0xf]  ;;  %v7356_v2 = vor.u32 %v8024_v60, %v7355_v59  ;;  %v6653_v58 = vld [vmem:[#allocation7 + $0x1f8] sm:$0xf0] }
 0x34e   :  { %v4415_v33 = vpop.f32.mrf.mxu0  ;;  %v4428_v47 = vpop.f32.mrf.mxu1  ;;  %v7872_v17 = vld [vmem:[#allocation7 + $0x2b4] sm:$0xf0]  ;;  %v7908_v59 = vld [vmem:[#allocation7 + $0x3dc] sm:$0xf] }
 0x34f   :  { %4673 = vmatpush.bf16.msra.mxu0 %v6424_v36  ;;  %4686 = vmatpush.bf16.msra.mxu1 %v6680_v5  ;;  %v4416_v36 = vadd.f32 %v4415_v33, %v3110_v61  ;;  %v6524_v5 = vor.u32 %v7816_v0, %v6523_v63  ;;  %v7035_v18 = vld [vmem:[#allocation7 + $0x4d8] sm:$0xf]  ;;  %v6748_v23 = vor.u32 %v7872_v17, %v6747_v41  ;;  %v6909_v61 = vld [vmem:[#allocation7 + $0x3f8] sm:$0xf0] }
 0x350   :  { %v7944_v19 = vld [vmem:[#allocation7 + $0x4f4] sm:$0xf0]  ;;  %v7972_v41 = vld [vmem:[#allocation7 + $0x5dc] sm:$0xf] }
 0x351   :  { %4698 = vmatpush.bf16.msra.mxu2 %v6968_v16  ;;  %4711 = vmatpush.bf16.msra.mxu3 %v7224_v13  ;;  %v7068_v16 = vor.u32 %v7952_v15, %v7067_v6  ;;  %v7324_v13 = vor.u32 %v8016_v14, %v7323_v25  ;;  %v7291_v20 = vld [vmem:[#allocation7 + $0x6d8] sm:$0xf]  ;;  %v4429_v22 = vadd.f32 %v4428_v47, %v4416_v36  ;;  %v7836_v14 = vld [vmem:[#allocation7 + $0x19c] sm:$0xf] }
 0x352   :  { %4674 = vmatmul.bf16.vlgmr.msra.gmra.mxu0 %v8419_v52  ;;  %4687 = vmatmul.bf16.vlgmr.msra.gmra.mxu1 %v8421_v53  ;;  %v8008_v21 = vld [vmem:[#allocation7 + $0x6f4] sm:$0xf0]  ;;  %v7036_v30 = vor.u32 %v7944_v19, %v7035_v18  ;;  %v6656_v15 = vor.u32 %v7844_v57, %v6653_v58  ;;  %v6912_v25 = vor.u32 %v7908_v59, %v6909_v61  ;;  %v6621_v36 = vld [vmem:[#allocation7 + $0x1b8] sm:$0xf0] }
 0x353   :  { %4718 = vmatpush.bf16.msrb.mxu0 %v6652_v28  ;;  %4731 = vmatpush.bf16.msrb.mxu1 %v6908_v34  ;;  %v6780_v28 = vor.u32 %v7880_v9, %v6779_v3  ;;  %v7292_v31 = vor.u32 %v8008_v21, %v7291_v20  ;;  %v7003_v35 = vld [vmem:[#allocation7 + $0x498] sm:$0xf]  ;;  %v7165_v18 = vld [vmem:[#allocation7 + $0x5f8] sm:$0xf0] }
 0x354   :  { %v7936_v39 = vld [vmem:[#allocation7 + $0x4b4] sm:$0xf0]  ;;  %v8036_v19 = vld [vmem:[#allocation7 + $0x7dc] sm:$0xf] }
 0x355   :  { %4699 = vmatpush.bf16.msra.mxu2 %v6936_v27  ;;  %4712 = vmatpush.bf16.msra.mxu3 %v7192_v29  ;;  %v7259_v40 = vld [vmem:[#allocation7 + $0x698] sm:$0xf]  ;;  %v7004_v55 = vor.u32 %v7936_v39, %v7003_v35  ;;  %v7421_v20 = vld [vmem:[#allocation7 + $0x7f8] sm:$0xf0] }
 0x356   :  { %v4417_v34 = vpop.f32.mrf.mxu0  ;;  %v4430_v43 = vpop.f32.mrf.mxu1  ;;  %v8000_v48 = vld [vmem:[#allocation7 + $0x6b4] sm:$0xf0]  ;;  %v6845_v35 = vld [vmem:[#allocation7 + $0x378] sm:$0xf0] }
 0x357   :  { %4719 = vmatpush.bf16.msrb.mxu0 %v6620_v24  ;;  %4732 = vmatpush.bf16.msrb.mxu1 %v6876_v26  ;;  %v6459_v24 = vld [vmem:[#allocation7 + $0x58] sm:$0xf]  ;;  %v7260_v56 = vor.u32 %v8000_v48, %v7259_v40  ;;  %v6877_v43 = vld [vmem:[#allocation7 + $0x3b8] sm:$0xf0] }
 0x358   :  { %4700 = vmatmul.bf16.vlgmr.msra.gmra.mxu2 %v8425_v10  ;;  %4713 = vmatmul.bf16.vlgmr.msra.gmra.mxu3 %v8427_v11  ;;  %v7800_v26 = vld [vmem:[#allocation7 + $0x74] sm:$0xf0]  ;;  %v7133_v40 = vld [vmem:[#allocation7 + $0x5b8] sm:$0xf0] }
 0x359   :  { %4744 = vmatpush.bf16.msrb.mxu2 %v7164_v32  ;;  %4757 = vmatpush.bf16.msrb.mxu3 %v7420_v37  ;;  %v6715_v32 = vld [vmem:[#allocation7 + $0x258] sm:$0xf]  ;;  %v8028_v48 = vld [vmem:[#allocation7 + $0x79c] sm:$0xf] }
 0x35a   :  { %v7864_v37 = vld [vmem:[#allocation7 + $0x274] sm:$0xf0]  ;;  %v7884_v57 = vld [vmem:[#allocation7 + $0x31c] sm:$0xf] }
 0x35b   :  { %4720 = vmatpush.bf16.msrb.mxu0 %v6588_v44  ;;  %4733 = vmatpush.bf16.msrb.mxu1 %v6844_v45  ;;  %v4441_v27 = vpop.f32.mrf.mxu2  ;;  %v4454_v29 = vpop.f32.mrf.mxu3  ;;  %v6427_v38 = vld [vmem:[#allocation7 + $0x18] sm:$0xf]  ;;  %v6460_v45 = vor.u32 %v7800_v26, %v6459_v24  ;;  %v6716_v33 = vor.u32 %v7864_v37, %v6715_v32  ;;  %v7424_v32 = vor.u32 %v8036_v19, %v7421_v20  ;;  %v7892_v37 = vld [vmem:[#allocation7 + $0x35c] sm:$0xf] }
 0x35c   :  { %v4442_v7 = vadd.f32 %v4441_v27, %v4429_v22  ;;  %v7792_v47 = vld [vmem:[#allocation7 + $0x34] sm:$0xf0]  ;;  %v6813_v58 = vld [vmem:[#allocation7 + $0x338] sm:$0xf0] }
 0x35d   :  { %4745 = vmatpush.bf16.msrb.mxu2 %v7132_v51  ;;  %4758 = vmatpush.bf16.msrb.mxu3 %v7388_v54  ;;  %v6683_v49 = vld [vmem:[#allocation7 + $0x218] sm:$0xf]  ;;  %v7956_v59 = vld [vmem:[#allocation7 + $0x55c] sm:$0xf] }
 0x35e   :  { %v4455_v44 = vadd.f32 %v4454_v29, %v4442_v7  ;;  %v7856_v50 = vld [vmem:[#allocation7 + $0x234] sm:$0xf0]  ;;  %v7828_v29 = vld [vmem:[#allocation7 + $0x15c] sm:$0xf] }
 0x35f   :  { %4721 = vmatpush.bf16.msrb.mxu0 %v6556_v62  ;;  %4734 = vmatpush.bf16.msrb.mxu1 %v6812_v8  ;;  %v4467_v51 = vpop.f32.mrf.mxu0  ;;  %v4480_v54 = vpop.f32.mrf.mxu1  ;;  %v6971_v62 = vld [vmem:[#allocation7 + $0x458] sm:$0xf]  ;;  %v6684_v3 = vor.u32 %v7856_v50, %v6683_v49  ;;  %v7964_v7 = vld [vmem:[#allocation7 + $0x59c] sm:$0xf]  ;;  %v6848_v50 = vor.u32 %v7892_v37, %v6845_v35 }
 0x360   :  { %v7425_v60 = vmul.f32 -1.442695, %v4455_v44  ;;  %v7928_v8 = vld [vmem:[#allocation7 + $0x474] sm:$0xf0]  ;;  %v7101_v61 = vld [vmem:[#allocation7 + $0x578] sm:$0xf0] }
 0x361   :  { %4746 = vmatpush.bf16.msrb.mxu2 %v7100_v1  ;;  %4759 = vmatpush.bf16.msrb.mxu3 %v7356_v2  ;;  %v7227_v63 = vld [vmem:[#allocation7 + $0x658] sm:$0xf]  ;;  %v3111_v1 = vperm.slane %v8452_v46, 1  ;;  %v6428_v2 = vor.u32 %v7792_v47, %v6427_v38  ;;  %v7389_v38 = vld [vmem:[#allocation7 + $0x7b8] sm:$0xf0] }
 0x362   :  { %v7992_v0 = vld [vmem:[#allocation7 + $0x674] sm:$0xf0]  ;;  %8053 = vpow2.f32 %v7425_v60  ;;  %v7796_v35 = vld [vmem:[#allocation7 + $0x5c] sm:$0xf] }
 0x363   :  { %4722 = vmatpush.bf16.msrb.mxu0 %v6524_v5  ;;  %4735 = vmatpush.bf16.msrb.mxu1 %v6780_v28  ;;  %v4443_v9 = vpop.f32.mrf.mxu2  ;;  %v4456_v6 = vpop.f32.mrf.mxu3  ;;  %v7900_v5 = vld [vmem:[#allocation7 + $0x39c] sm:$0xf]  ;;  %v6972_v28 = vor.u32 %v7928_v8, %v6971_v62  ;;  %v7228_v34 = vor.u32 %v7992_v0, %v7227_v63  ;;  %v6939_v12 = vld [vmem:[#allocation7 + $0x418] sm:$0xf]  ;;  %v4468_v17 = vadd.f32 %v4467_v51, %v3111_v1 }
 0x364   :  { %v7920_v42 = vld [vmem:[#allocation7 + $0x434] sm:$0xf0]  ;;  %v7820_v51 = vld [vmem:[#allocation7 + $0x11c] sm:$0xf] }
 0x365   :  { %4747 = vmatpush.bf16.msrb.mxu2 %v7068_v16  ;;  %4760 = vmatpush.bf16.msrb.mxu3 %v7324_v13  ;;  %v7195_v16 = vld [vmem:[#allocation7 + $0x618] sm:$0xf]  ;;  %v6940_v26 = vor.u32 %v7920_v42, %v6939_v12  ;;  %v4481_v39 = vadd.f32 %v4480_v54, %v4468_v17  ;;  %v7392_v54 = vor.u32 %v8028_v48, %v7389_v38  ;;  %v8020_v62 = vld [vmem:[#allocation7 + $0x75c] sm:$0xf]  ;;  %v3112_v48 = vperm.slane %v8452_v46, 2 }
 0x366   :  { %v7984_v13 = vld [vmem:[#allocation7 + $0x634] sm:$0xf0]  ;;  %v7357_v8 = vld [vmem:[#allocation7 + $0x778] sm:$0xf0] }
 0x367   :  { %4723 = vmatpush.bf16.msrb.mxu0 %v6492_v4  ;;  %4736 = vmatpush.bf16.msrb.mxu1 %v6748_v23  ;;  %v4469_v21 = vpop.f32.mrf.mxu0  ;;  %v4482_v22 = vpop.f32.mrf.mxu1  ;;  %v6624_v4 = vor.u32 %v7836_v14, %v6621_v36  ;;  %v6880_v23 = vor.u32 %v7900_v5, %v6877_v43  ;;  %v7196_v27 = vor.u32 %v7984_v13, %v7195_v16  ;;  %v7812_v9 = vld [vmem:[#allocation7 + $0xdc] sm:$0xf] }
 0x368   :  { %v8054_v24 = vpop.eup %8053  ;;  %v6525_v6 = vld [vmem:[#allocation7 + $0xf8] sm:$0xf0] }
 0x369   :  { %4748 = vmatpush.bf16.msrb.mxu2 %v7036_v30  ;;  %4761 = vmatpush.bf16.msrb.mxu3 %v7292_v31  ;;  %v6589_v30 = vld [vmem:[#allocation7 + $0x178] sm:$0xf0]  ;;  %v7168_v31 = vor.u32 %v7972_v41, %v7165_v18  ;;  %v8460_v44 = vadd.f32 1.0, %v8054_v24  ;;  %v6528_v16 = vor.u32 %v7812_v9, %v6525_v6 }
 0x36a   :  { %v6592_v49 = vor.u32 %v7828_v29, %v6589_v30  ;;  %v7876_v14 = vld [vmem:[#allocation7 + $0x2dc] sm:$0xf] }
 0x36b   :  { %4724 = vmatpush.bf16.msrb.mxu0 %v6460_v45  ;;  %4737 = vmatpush.bf16.msrb.mxu1 %v6716_v33  ;;  %v4493_v45 = vpop.f32.mrf.mxu2  ;;  %v4506_v33 = vpop.f32.mrf.mxu3  ;;  %8055 = vrcp.f32 %v8460_v44  ;;  %v6781_v36 = vld [vmem:[#allocation7 + $0x2f8] sm:$0xf0]  ;;  %vm4859_vm1 = vweird.f32 %v8460_v44 }
 0x36c   :  { %v4494_v47 = vadd.f32 %v4493_v45, %v4481_v39  ;;  %v7948_v5 = vld [vmem:[#allocation7 + $0x51c] sm:$0xf]  ;;  %v6784_v13 = vor.u32 %v7876_v14, %v6781_v36 }
 0x36d   :  { %4749 = vmatpush.bf16.msrb.mxu2 %v7004_v55  ;;  %4762 = vmatpush.bf16.msrb.mxu3 %v7260_v56  ;;  %v6557_v55 = vld [vmem:[#allocation7 + $0x138] sm:$0xf0]  ;;  %v7136_v56 = vor.u32 %v7964_v7, %v7133_v40 }
 0x36e   :  { %v4507_v60 = vadd.f32 %v4506_v33, %v4494_v47  ;;  %v7325_v43 = vld [vmem:[#allocation7 + $0x738] sm:$0xf0] }
 0x36f   :  { %4725 = vmatpush.bf16.msrb.mxu0 %v6428_v2  ;;  %4738 = vmatpush.bf16.msrb.mxu1 %v6684_v3  ;;  %v8465_v63 = vpop.f32.mrf.mxu0  ;;  %v8467_v0 = vpop.f32.mrf.mxu1  ;;  %v6560_v2 = vor.u32 %v7820_v51, %v6557_v55  ;;  %v6816_v3 = vor.u32 %v7884_v57, %v6813_v58  ;;  %v7804_v41 = vld [vmem:[#allocation7 + $0x9c] sm:$0xf] }
 0x370   :  { %v7426_v1 = vmul.f32 -1.442695, %v4507_v60  ;;  %v6493_v17 = vld [vmem:[#allocation7 + $0xb8] sm:$0xf0] }
 0x371   :  { %4750 = vmatpush.bf16.msrb.mxu2 %v6972_v28  ;;  %4763 = vmatpush.bf16.msrb.mxu3 %v7228_v34  ;;  %v7069_v28 = vld [vmem:[#allocation7 + $0x538] sm:$0xf0]  ;;  %v8469_v18 = vpop.eup %8055 }
 0x372   :  { %4726 = vmatmul.bf16.vlgmr.msrb.gmra.mxu0 %v8419_v52  ;;  %4739 = vmatmul.bf16.vlgmr.msrb.gmra.mxu1 %v8421_v53  ;;  %8057 = vpow2.f32 %v7426_v1  ;;  %v8012_v34 = vld [vmem:[#allocation7 + $0x71c] sm:$0xf]  ;;  %v7072_v19 = vor.u32 %v7948_v5, %v7069_v28  ;;  %vm4860_vm0 = vweird.f32 %v8469_v18 }
 0x373   :  { %4770 = vmatpush.bf16.msra.mxu0 %v6656_v15  ;;  %4783 = vmatpush.bf16.msra.mxu1 %v6912_v25  ;;  %v7104_v15 = vor.u32 %v7956_v59, %v7101_v61  ;;  %v7360_v25 = vor.u32 %v8020_v62, %v7357_v8  ;;  %v4495_v12 = vpop.f32.mrf.mxu2  ;;  %v4508_v42 = vpop.f32.mrf.mxu3  ;;  %v7328_v20 = vor.u32 %v8012_v34, %v7325_v43  ;;  %v7868_v21 = vld [vmem:[#allocation7 + $0x29c] sm:$0xf]  ;;  %vm8490_vm3 = vmor %vm4859_vm1, %vm4860_vm0 }
 0x374   :  { %v6749_v22 = vld [vmem:[#allocation7 + $0x2b8] sm:$0xf0]  ;;  %v4520_v61 = vadd.f32 %v8465_v63, %v3112_v48 }
 0x375   :  { %4751 = vmatpush.bf16.msrb.mxu2 %v6940_v26  ;;  %4764 = vmatpush.bf16.msrb.mxu3 %v7196_v27  ;;  %v8004_v24 = vld [vmem:[#allocation7 + $0x6dc] sm:$0xf]  ;;  %v6752_v37 = vor.u32 %v7868_v21, %v6749_v22  ;;  %v4865_v22 = vand.u32 2147483648, %v8460_v44 }
 0x376   :  { %v7293_v26 = vld [vmem:[#allocation7 + $0x6f8] sm:$0xf0]  ;;  %v4533_v28 = vadd.f32 %v8467_v0, %v4520_v61 }
 0x377   :  { %4771 = vmatpush.bf16.msra.mxu0 %v6624_v4  ;;  %4784 = vmatpush.bf16.msra.mxu1 %v6880_v23  ;;  %v7940_v4 = vld [vmem:[#allocation7 + $0x4dc] sm:$0xf]  ;;  %v4521_v27 = vpop.f32.mrf.mxu0  ;;  %v4534_v29 = vpop.f32.mrf.mxu1  ;;  %v7296_v45 = vor.u32 %v8004_v24, %v7293_v26  ;;  %v4863_v24 = vand.u32 2147483647, %v8460_v44 }
 0x378   :  { %4752 = vmatmul.bf16.vlgmr.msrb.gmra.mxu2 %v8425_v10  ;;  %4765 = vmatmul.bf16.vlgmr.msrb.gmra.mxu3 %v8427_v11  ;;  %v7037_v23 = vld [vmem:[#allocation7 + $0x4f8] sm:$0xf0]  ;;  %v8058_v30 = vpop.eup %8057 }
 0x379   :  { %4796 = vmatpush.bf16.msra.mxu2 %v7168_v31  ;;  %4809 = vmatpush.bf16.msra.mxu3 %v7424_v32  ;;  %v4855_v31 = vmul.f32 %v8469_v18, %v8460_v44  ;;  %v6496_v32 = vor.u32 %v7804_v41, %v6493_v17  ;;  %v6461_v7 = vld [vmem:[#allocation7 + $0x78] sm:$0xf0]  ;;  %v8473_v40 = vadd.f32 1.0, %v8058_v30  ;;  %v7040_v38 = vor.u32 %v7940_v4, %v7037_v23 }
 0x37a   :  { %v7860_v39 = vld [vmem:[#allocation7 + $0x25c] sm:$0xf]  ;;  %v6464_v57 = vor.u32 %v7796_v35, %v6461_v7  ;;  %vm4864_vm6 = vcmp.eq.f32.partialorder %v4863_v24, 8.507059e+37 }
 0x37b   :  { %4772 = vmatpush.bf16.msra.mxu0 %v6592_v49  ;;  %4785 = vmatpush.bf16.msra.mxu1 %v6848_v50  ;;  %v6717_v33 = vld [vmem:[#allocation7 + $0x278] sm:$0xf0]  ;;  %8059 = vrcp.f32 %v8473_v40  ;;  %v4856_v55 = vsub.f32 1.0, %v4855_v31  ;;  %v4880_v4 = vand.u32 2147483648, %v8473_v40  ;;  %v4878_v27 = vand.u32 2147483647, %v8473_v40 }
 0x37c   :  { %v7932_v47 = vld [vmem:[#allocation7 + $0x49c] sm:$0xf]  ;;  %v6720_v58 = vor.u32 %v7860_v39, %v6717_v33  ;;  %vm4874_vm4 = vweird.f32 %v8473_v40 }
 0x37d   :  { %4797 = vmatpush.bf16.msra.mxu2 %v7136_v56  ;;  %4810 = vmatpush.bf16.msra.mxu3 %v7392_v54  ;;  %v7005_v49 = vld [vmem:[#allocation7 + $0x4b8] sm:$0xf0]  ;;  %v4545_v56 = vpop.f32.mrf.mxu2  ;;  %v4558_v54 = vpop.f32.mrf.mxu3  ;;  %vm4879_vm7 = vcmp.eq.f32.partialorder %v4878_v27, 8.507059e+37 }
 0x37e   :  { %v7996_v50 = vld [vmem:[#allocation7 + $0x69c] sm:$0xf]  ;;  %v7008_v62 = vor.u32 %v7932_v47, %v7005_v49  ;;  %v4546_v41 = vadd.f32 %v4545_v56, %v4533_v28 }
 0x37f   :  { %4773 = vmatpush.bf16.msra.mxu0 %v6560_v2  ;;  %4786 = vmatpush.bf16.msra.mxu1 %v6816_v3  ;;  %v7261_v51 = vld [vmem:[#allocation7 + $0x6b8] sm:$0xf0] }
 0x380   :  { %v7788_v59 = vld [vmem:[#allocation7 + $0x1c] sm:$0xf]  ;;  %v7264_v8 = vor.u32 %v7996_v50, %v7261_v51  ;;  %v4559_v30 = vadd.f32 %v4558_v54, %v4546_v41 }
 0x381   :  { %4798 = vmatpush.bf16.msra.mxu2 %v7104_v15  ;;  %4811 = vmatpush.bf16.msra.mxu3 %v7360_v25  ;;  %v6429_v60 = vld [vmem:[#allocation7 + $0x38] sm:$0xf0]  ;;  %v4857_v25 = vmul.f32 %v8469_v18, %v4856_v55  ;;  %v8060_v5 = vpop.eup %8059 }
 0x382   :  { %v7852_v1 = vld [vmem:[#allocation7 + $0x21c] sm:$0xf]  ;;  %v6432_v14 = vor.u32 %v7788_v59, %v6429_v60  ;;  %v4870_v42 = vmul.f32 %v8060_v5, %v8473_v40  ;;  %vm4875_vm2 = vweird.f32 %v8060_v5  ;;  %v3113_v40 = vperm.slane %v8452_v46, 3 }
 0x383   :  { %4774 = vmatpush.bf16.msra.mxu0 %v6528_v16  ;;  %4787 = vmatpush.bf16.msra.mxu1 %v6784_v13  ;;  %v6685_v2 = vld [vmem:[#allocation7 + $0x238] sm:$0xf0]  ;;  %v4858_v17 = vadd.f32 %v8469_v18, %v4857_v25  ;;  %vm4876_vm5 = vmor %vm4874_vm4, %vm4875_vm2 }
 0x384   :  { %v7924_v3 = vld [vmem:[#allocation7 + $0x45c] sm:$0xf]  ;;  %v6688_v36 = vor.u32 %v7852_v1, %v6685_v2 }
 0x385   :  { %4799 = vmatpush.bf16.msra.mxu2 %v7072_v19  ;;  %4812 = vmatpush.bf16.msra.mxu3 %v7328_v20  ;;  %v6973_v9 = vld [vmem:[#allocation7 + $0x478] sm:$0xf0]  ;;  %v4871_v19 = vsub.f32 1.0, %v4870_v42  ;;  %v4547_v20 = vpop.f32.mrf.mxu2  ;;  %v4560_v0 = vpop.f32.mrf.mxu3  ;;  %v4862_v31 = vsel %vm8490_vm3, %v8469_v18, %v4858_v17  ;;  %v3114_v42 = vperm.slane %v8452_v46, 4 }
 0x386   :  { %v7988_v6 = vld [vmem:[#allocation7 + $0x65c] sm:$0xf]  ;;  %v6976_v63 = vor.u32 %v7924_v3, %v6973_v9 }
 0x387   :  { %4775 = vmatpush.bf16.msra.mxu0 %v6496_v32  ;;  %4788 = vmatpush.bf16.msra.mxu1 %v6752_v37  ;;  %v7229_v15 = vld [vmem:[#allocation7 + $0x678] sm:$0xf0]  ;;  %v4872_v26 = vmul.f32 %v8060_v5, %v4871_v19  ;;  %v4866_v32 = vor.u32 1.1754944e-38, %v4865_v22  ;;  %v4881_v37 = vor.u32 1.1754944e-38, %v4880_v4 }
 0x388   :  { %v7232_v34 = vor.u32 %v7988_v6, %v7229_v15  ;;  %v7916_v43 = vld [vmem:[#allocation7 + $0x41c] sm:$0xf] }
 0x389   :  { %4800 = vmatpush.bf16.msra.mxu2 %v7040_v38  ;;  %4813 = vmatpush.bf16.msra.mxu3 %v7296_v45  ;;  %v6941_v12 = vld [vmem:[#allocation7 + $0x438] sm:$0xf0]  ;;  %v4873_v44 = vadd.f32 %v8060_v5, %v4872_v26  ;;  %v4867_v7 = vsel %vm4864_vm6, %v4866_v32, %v4862_v31 }
 0x38a   :  { %v7980_v16 = vld [vmem:[#allocation7 + $0x61c] sm:$0xf]  ;;  %v6944_v21 = vor.u32 %v7916_v43, %v6941_v12 }
 0x38b   :  { %4776 = vmatpush.bf16.msra.mxu0 %v6464_v57  ;;  %4789 = vmatpush.bf16.msra.mxu1 %v6720_v58  ;;  %v7197_v13 = vld [vmem:[#allocation7 + $0x638] sm:$0xf0]  ;;  %v4877_v35 = vsel %vm4876_vm5, %v8060_v5, %v4873_v44  ;;  %v3115_v44 = vperm.slane %v8452_v46, 5 }
 0x38c   :  { %v7200_v23 = vor.u32 %v7980_v16, %v7197_v13  ;;  %v4882_v39 = vsel %vm4879_vm7, %v4881_v37, %v4877_v35 }
 0x38d   :  { %4801 = vmatpush.bf16.msra.mxu2 %v7008_v62  ;;  %4814 = vmatpush.bf16.msra.mxu3 %v7264_v8  ;;  %v4974_v48 = vpack.c.bf16 %v4882_v39, %v4867_v7 }
 0x38f   :  { %4777 = vmatpush.bf16.msra.mxu0 %v6432_v14  ;;  %4790 = vmatpush.bf16.msra.mxu1 %v6688_v36  ;;  %v4584_v18 = vpop.f32.mrf.mxu1  ;;  %4978 = vst [vmem:[%s8529_s10] sm:$0xff] %v4974_v48 }
 0x391   :  { %4802 = vmatpush.bf16.msra.mxu2 %v6976_v63  ;;  %4815 = vmatpush.bf16.msra.mxu3 %v7232_v34 }
 0x392   :  { %4778 = vmatmul.bf16.vlgmr.msra.gmra.mxu0 %v8419_v52  ;;  %4791 = vmatmul.bf16.vlgmr.msra.gmra.mxu1 %v8421_v53  ;;  %v7427_v52 = vmul.f32 -1.442695, %v4559_v30  ;;  %v4571_v53 = vpop.f32.mrf.mxu0 }
 0x393   :  { %v4572_v38 = vadd.f32 %v4571_v53, %v3113_v40 }
 0x394   :  { %8061 = vpow2.f32 %v7427_v52 }
 0x395   :  { %4803 = vmatpush.bf16.msra.mxu2 %v6944_v21  ;;  %4816 = vmatpush.bf16.msra.mxu3 %v7200_v23  ;;  %v4585_v49 = vadd.f32 %v4584_v18, %v4572_v38 }
 0x397   :  { %v4586_v33 = vpop.f32.mrf.mxu1 }
 0x398   :  { %4804 = vmatmul.bf16.vlgmr.msra.gmra.mxu2 %v8425_v10  ;;  %4817 = vmatmul.bf16.vlgmr.msra.gmra.mxu3 %v8427_v11 }
 0x39a   :  { %v4573_v45 = vpop.f32.mrf.mxu0  ;;  %v8062_v47 = vpop.eup %8061 }
 0x39b   :  { %v4848_v50 = vadd.f32 1.0, %v8062_v47  ;;  %v4597_v51 = vpop.f32.mrf.mxu2  ;;  %v4610_v55 = vpop.f32.mrf.mxu3 }
 0x39c   :  { %v4598_v10 = vadd.f32 %v4597_v51, %v4585_v49 }
 0x39d   :  { %8063 = vrcp.f32 %v4848_v50  ;;  %vm4889_vm9 = vweird.f32 %v4848_v50  ;;  %v4895_v25 = vand.u32 2147483648, %v4848_v50  ;;  %v4893_v28 = vand.u32 2147483647, %v4848_v50 }
 0x39e   :  { %v4611_v56 = vadd.f32 %v4610_v55, %v4598_v10 }
 0x39f   :  { %v4896_v16 = vor.u32 1.1754944e-38, %v4895_v25  ;;  %vm4894_vm14 = vcmp.eq.f32.partialorder %v4893_v28, 8.507059e+37 }
 0x3a0   :  { %v7428_v11 = vmul.f32 -1.442695, %v4611_v56 }
 0x3a2   :  { %8065 = vpow2.f32 %v7428_v11 }
 0x3a3   :  { %v4599_v54 = vpop.f32.mrf.mxu2  ;;  %v4612_v57 = vpop.f32.mrf.mxu3 }
 0x3a4   :  { %v8064_v58 = vpop.eup %8063 }
 0x3a5   :  { %v4885_v60 = vmul.f32 %v8064_v58, %v4848_v50  ;;  %vm4890_vm8 = vweird.f32 %v8064_v58 }
 0x3a6   :  { %vm4891_vm11 = vmor %vm4889_vm9, %vm4890_vm8 }
 0x3a7   :  { %v4886_v62 = vsub.f32 1.0, %v4885_v60 }
 0x3a8   :  { %v8066_v59 = vpop.eup %8065 }
 0x3a9   :  { %v4849_v61 = vadd.f32 1.0, %v8066_v59  ;;  %v4887_v2 = vmul.f32 %v8064_v58, %v4886_v62 }
 0x3ab   :  { %8067 = vrcp.f32 %v4849_v61  ;;  %v4888_v6 = vadd.f32 %v8064_v58, %v4887_v2  ;;  %v4910_v14 = vand.u32 2147483648, %v4849_v61  ;;  %v4908_v34 = vand.u32 2147483647, %v4849_v61 }
 0x3ac   :  { %vm4904_vm12 = vweird.f32 %v4849_v61 }
 0x3ad   :  { %v4892_v43 = vsel %vm4891_vm11, %v8064_v58, %v4888_v6  ;;  %v4911_v13 = vor.u32 1.1754944e-38, %v4910_v14  ;;  %vm4909_vm15 = vcmp.eq.f32.partialorder %v4908_v34, 8.507059e+37 }
 0x3ae   :  { %v4897_v20 = vsel %vm4894_vm14, %v4896_v16, %v4892_v43 }
 0x3af   :  { %v4623_v8 = vpop.f32.mrf.mxu0  ;;  %v4636_v1 = vpop.f32.mrf.mxu1 }
 0x3b0   :  { %v4624_v22 = vadd.f32 %v4623_v8, %v3114_v42 }
 0x3b1   :  { %v8068_v3 = vpop.eup %8067 }
 0x3b2   :  { %v4900_v9 = vmul.f32 %v8068_v3, %v4849_v61  ;;  %vm4905_vm10 = vweird.f32 %v8068_v3  ;;  %v4637_v4 = vadd.f32 %v4636_v1, %v4624_v22 }
 0x3b3   :  { %vm4906_vm13 = vmor %vm4904_vm12, %vm4905_vm10 }
 0x3b4   :  { %v4901_v15 = vsub.f32 1.0, %v4900_v9  ;;  %v3116_v9 = vperm.slane %v8452_v46, 6 }
 0x3b6   :  { %v4902_v63 = vmul.f32 %v8068_v3, %v4901_v15 }
 0x3b7   :  { %v4625_v36 = vpop.f32.mrf.mxu0  ;;  %v4638_v5 = vpop.f32.mrf.mxu1 }
 0x3b8   :  { %v4903_v12 = vadd.f32 %v8068_v3, %v4902_v63 }
 0x3ba   :  { %v4907_v19 = vsel %vm4906_vm13, %v8068_v3, %v4903_v12 }
 0x3bb   :  { %v4649_v41 = vpop.f32.mrf.mxu2  ;;  %v4662_v17 = vpop.f32.mrf.mxu3  ;;  %v4912_v0 = vsel %vm4909_vm15, %v4911_v13, %v4907_v19 }
 0x3bc   :  { %v4975_v21 = vpack.c.bf16 %v4912_v0, %v4897_v20  ;;  %v4650_v26 = vadd.f32 %v4649_v41, %v4637_v4 }
 0x3be   :  { %4979 = vst [vmem:[%s8529_s10 + $0x8] sm:$0xff] %v4975_v21  ;;  %v4663_v27 = vadd.f32 %v4662_v17, %v4650_v26  ;;  %v3117_v21 = vperm.slane %v8452_v46, 7 }
 0x3c0   :  { %v7429_v29 = vmul.f32 -1.442695, %v4663_v27 }
 0x3c2   :  { %8069 = vpow2.f32 %v7429_v29 }
 0x3c3   :  { %v4651_v23 = vpop.f32.mrf.mxu2  ;;  %v4664_v24 = vpop.f32.mrf.mxu3 }
 0x3c8   :  { %v8070_v7 = vpop.eup %8069 }
 0x3c9   :  { %v4850_v52 = vadd.f32 1.0, %v8070_v7 }
 0x3cb   :  { %8071 = vrcp.f32 %v4850_v52  ;;  %vm4919_vm1 = vweird.f32 %v4850_v52  ;;  %v4925_v60 = vand.u32 2147483648, %v4850_v52  ;;  %v4923_v1 = vand.u32 2147483647, %v4850_v52 }
 0x3cd   :  { %v4926_v25 = vor.u32 1.1754944e-38, %v4925_v60  ;;  %vm4924_vm6 = vcmp.eq.f32.partialorder %v4923_v1, 8.507059e+37 }
 0x3cf   :  { %v4675_v30 = vpop.f32.mrf.mxu0  ;;  %v4688_v31 = vpop.f32.mrf.mxu1 }
 0x3d0   :  { %v4676_v32 = vadd.f32 %v4675_v30, %v3115_v44 }
 0x3d1   :  { %v8072_v47 = vpop.eup %8071 }
 0x3d2   :  { %v4689_v39 = vadd.f32 %v4688_v31, %v4676_v32  ;;  %v4915_v50 = vmul.f32 %v8072_v47, %v4850_v52  ;;  %vm4920_vm0 = vweird.f32 %v8072_v47 }
 0x3d3   :  { %vm4921_vm3 = vmor %vm4919_vm1, %vm4920_vm0 }
 0x3d4   :  { %v4916_v55 = vsub.f32 1.0, %v4915_v50 }
 0x3d6   :  { %v4917_v11 = vmul.f32 %v8072_v47, %v4916_v55 }
 0x3d7   :  { %v4677_v37 = vpop.f32.mrf.mxu0  ;;  %v4690_v35 = vpop.f32.mrf.mxu1 }
 0x3d8   :  { %v4918_v58 = vadd.f32 %v8072_v47, %v4917_v11 }
 0x3da   :  { %v4922_v6 = vsel %vm4921_vm3, %v8072_v47, %v4918_v58 }
 0x3db   :  { %v4701_v48 = vpop.f32.mrf.mxu2  ;;  %v4714_v53 = vpop.f32.mrf.mxu3  ;;  %v4927_v63 = vsel %vm4924_vm6, %v4926_v25, %v4922_v6 }
 0x3dc   :  { %v4702_v18 = vadd.f32 %v4701_v48, %v4689_v39 }
 0x3de   :  { %v4715_v40 = vadd.f32 %v4714_v53, %v4702_v18 }
 0x3e0   :  { %v7430_v38 = vmul.f32 -1.442695, %v4715_v40 }
 0x3e2   :  { %8073 = vpow2.f32 %v7430_v38 }
 0x3e3   :  { %v4703_v45 = vpop.f32.mrf.mxu2  ;;  %v4716_v33 = vpop.f32.mrf.mxu3 }
 0x3e8   :  { %v8074_v49 = vpop.eup %8073 }
 0x3e9   :  { %v4851_v51 = vadd.f32 1.0, %v8074_v49 }
 0x3eb   :  { %8075 = vrcp.f32 %v4851_v51  ;;  %v4940_v61 = vand.u32 2147483648, %v4851_v51  ;;  %v4938_v3 = vand.u32 2147483647, %v4851_v51  ;;  %vm4934_vm4 = vweird.f32 %v4851_v51 }
 0x3ed   :  { %v4941_v14 = vor.u32 1.1754944e-38, %v4940_v61  ;;  %vm4939_vm7 = vcmp.eq.f32.partialorder %v4938_v3, 8.507059e+37 }
 0x3ef   :  { %v4727_v10 = vpop.f32.mrf.mxu0  ;;  %v4740_v56 = vpop.f32.mrf.mxu1 }
 0x3f0   :  { %v4728_v43 = vadd.f32 %v4727_v10, %v3116_v9 }
 0x3f1   :  { %v8076_v54 = vpop.eup %8075 }
 0x3f2   :  { %v4930_v57 = vmul.f32 %v8076_v54, %v4851_v51  ;;  %vm4935_vm2 = vweird.f32 %v8076_v54  ;;  %v4741_v42 = vadd.f32 %v4740_v56, %v4728_v43 }
 0x3f3   :  { %vm4936_vm5 = vmor %vm4934_vm4, %vm4935_vm2 }
 0x3f4   :  { %v4931_v59 = vsub.f32 1.0, %v4930_v57 }
 0x3f6   :  { %v4932_v2 = vmul.f32 %v8076_v54, %v4931_v59 }
 0x3f7   :  { %v4729_v62 = vpop.f32.mrf.mxu0  ;;  %v4742_v8 = vpop.f32.mrf.mxu1 }
 0x3f8   :  { %v4933_v15 = vadd.f32 %v8076_v54, %v4932_v2 }
 0x3fa   :  { %v4937_v28 = vsel %vm4936_vm5, %v8076_v54, %v4933_v15 }
 0x3fb   :  { %v4753_v36 = vpop.f32.mrf.mxu2  ;;  %v4766_v5 = vpop.f32.mrf.mxu3  ;;  %v4942_v34 = vsel %vm4939_vm7, %v4941_v14, %v4937_v28 }
 0x3fc   :  { %v4976_v12 = vpack.c.bf16 %v4942_v34, %v4927_v63  ;;  %v4754_v16 = vadd.f32 %v4753_v36, %v4741_v42 }
 0x3fe   :  { %4980 = vst [vmem:[%s8529_s10 + $0x10] sm:$0xff] %v4976_v12  ;;  %v4767_v17 = vadd.f32 %v4766_v5, %v4754_v16 }
 0x400   :  { %v7431_v19 = vmul.f32 -1.442695, %v4767_v17 }
 0x402   :  { %8077 = vpow2.f32 %v7431_v19 }
 0x403   :  { %v4755_v13 = vpop.f32.mrf.mxu2  ;;  %v4768_v41 = vpop.f32.mrf.mxu3 }
 0x408   :  { %v8078_v4 = vpop.eup %8077 }
 0x409   :  { %v4852_v27 = vadd.f32 1.0, %v8078_v4 }
 0x40b   :  { %8079 = vrcp.f32 %v4852_v27  ;;  %vm4949_vm9 = vweird.f32 %v4852_v27  ;;  %v4955_v33 = vand.u32 2147483648, %v4852_v27  ;;  %v4953_v49 = vand.u32 2147483647, %v4852_v27 }
 0x40d   :  { %v4956_v56 = vor.u32 1.1754944e-38, %v4955_v33  ;;  %vm4954_vm14 = vcmp.eq.f32.partialorder %v4953_v49, 8.507059e+37 }
 0x40f   :  { %v4779_v20 = vpop.f32.mrf.mxu0  ;;  %v4792_v0 = vpop.f32.mrf.mxu1 }
 0x410   :  { %v4780_v22 = vadd.f32 %v4779_v20, %v3117_v21 }
 0x411   :  { %v8080_v7 = vpop.eup %8079 }
 0x412   :  { %v4793_v26 = vadd.f32 %v4792_v0, %v4780_v22  ;;  %v4945_v52 = vmul.f32 %v8080_v7, %v4852_v27  ;;  %vm4950_vm8 = vweird.f32 %v8080_v7 }
 0x413   :  { %vm4951_vm11 = vmor %vm4949_vm9, %vm4950_vm8 }
 0x414   :  { %v4946_v46 = vsub.f32 1.0, %v4945_v52 }
 0x416   :  { %v4947_v53 = vmul.f32 %v8080_v7, %v4946_v46 }
 0x417   :  { %v4781_v23 = vpop.f32.mrf.mxu0  ;;  %v4794_v24 = vpop.f32.mrf.mxu1 }
 0x418   :  { %v4948_v38 = vadd.f32 %v8080_v7, %v4947_v53 }
 0x41a   :  { %v4952_v55 = vsel %vm4951_vm11, %v8080_v7, %v4948_v38 }
 0x41b   :  { %v4805_v29 = vpop.f32.mrf.mxu2  ;;  %v4818_v30 = vpop.f32.mrf.mxu3  ;;  %v4957_v57 = vsel %vm4954_vm14, %v4956_v56, %v4952_v55 }
 0x41c   :  { %v4806_v31 = vadd.f32 %v4805_v29, %v4793_v26 }
 0x41e   :  { %v4819_v44 = vadd.f32 %v4818_v30, %v4806_v31 }
 0x420   :  { %v7432_v32 = vmul.f32 -1.442695, %v4819_v44 }
 0x422   :  { %8081 = vpow2.f32 %v7432_v32 }
 0x423   :  { %v4807_v37 = vpop.f32.mrf.mxu2  ;;  %v4820_v35 = vpop.f32.mrf.mxu3 }
 0x428   :  { %v8082_v39 = vpop.eup %8081 }
 0x429   :  { %v4853_v48 = vadd.f32 1.0, %v8082_v39 }
 0x42b   :  { %8083 = vrcp.f32 %v4853_v48  ;;  %v4970_v47 = vand.u32 2147483648, %v4853_v48  ;;  %v4968_v51 = vand.u32 2147483647, %v4853_v48  ;;  %vm4964_vm12 = vweird.f32 %v4853_v48 }
 0x42d   :  { %v4971_v11 = vor.u32 1.1754944e-38, %v4970_v47  ;;  %vm4969_vm15 = vcmp.eq.f32.partialorder %v4968_v51, 8.507059e+37 }
 0x431   :  { %v8084_v18 = vpop.eup %8083 }
 0x432   :  { %v4960_v40 = vmul.f32 %v8084_v18, %v4853_v48  ;;  %vm4965_vm10 = vweird.f32 %v8084_v18 }
 0x433   :  { %vm4966_vm13 = vmor %vm4964_vm12, %vm4965_vm10 }
 0x434   :  { %v4961_v45 = vsub.f32 1.0, %v4960_v40 }
 0x436   :  { %v4962_v50 = vmul.f32 %v8084_v18, %v4961_v45 }
 0x438   :  { %v4963_v10 = vadd.f32 %v8084_v18, %v4962_v50 }
 0x43a   :  { %v4967_v54 = vsel %vm4966_vm13, %v8084_v18, %v4963_v10 }
 0x43b   :  { %v4972_v58 = vsel %vm4969_vm15, %v4971_v11, %v4967_v54 }
 0x43c   :  { %v4977_v59 = vpack.c.bf16 %v4972_v58, %v4957_v57 }
 0x43e   :  { %4981 = vst [vmem:[%s8529_s10 + $0x18] sm:$0xff] %v4977_v59 }
 0x43f   :  { %4990 = vsyncpa [#allocation3], 1 }
 0x440   :  { %4991 = vsyncpa [#allocation5], 1 }
 0x441   :  { %4992 = vsyncpa [#allocation8], 1 }

</bundles_post_ra>
